<compile_context>
chip_gen: v6e
topology: v6e:2x2x1
jax: 0.10.0
libtpu: 0.0.40
codegen_flags: <defaults>
</compile_context>

<pallas_src>
import functools

import jax
import jax.numpy as jnp
from jax.experimental import pallas as pl
from jax.experimental.pallas import tpu as pltpu

_GROUP = 8          # channels per group (f32 sublane packing)
_MAX_TILE = 512     # output pixels per grid step (lane axis, multiple of 128)


def _grid_sample_kernel(coords_ref, yf_ref, img_ref, out_ref, *, hp, wp, cg):
    """Bilinear grid_sample (zeros padding, align_corners) for one pixel tile.

    coords_ref : VMEM (2, tile)      f32  row0 = ix (width coord), row1 = iy
    yf_ref     : VMEM (hp*cg, 1)     f32  source-row index of interleaved row
    img_ref    : VMEM (hp*cg, wp)    f32  padded image, row = y*cg + channel
    out_ref    : VMEM (cg, tile)     f32
    """
    tile = coords_ref.shape[1]
    ix = coords_ref[0:1, :]                        # (1, tile)
    iy = coords_ref[1:2, :]                        # (1, tile)

    # Column (width) bilinear weights: hat function relu(1 - |xf - ix|).
    # Out-of-range sample positions get zero weight == grid_sample "zeros".
    xf = jax.lax.broadcasted_iota(jnp.int32, (wp, tile), 0).astype(jnp.float32)
    wx = jnp.maximum(0.0, 1.0 - jnp.abs(xf - ix))  # (wp, tile)

    # Column gather + x interpolation for every (source row, channel) at once
    # on the MXU:  g[y*cg + c, p] = (1-fx)*img[y, x0, c] + fx*img[y, x0+1, c]
    g = jnp.dot(img_ref[...], wx, preferred_element_type=jnp.float32)

    # Row (height) weights with the same hat form; yf is a constant column.
    wy = jnp.maximum(0.0, 1.0 - jnp.abs(yf_ref[...] - iy))   # (hp*cg, tile)

    # y interpolation: multiply fused into the leaves of a balanced tree
    # reduction over the hp source rows (sublane-aligned cg-row slices).
    chunks = []
    y = 0
    while y + 1 < hp:
        lo, mid, hi = y * cg, (y + 1) * cg, (y + 2) * cg
        chunks.append(g[lo:mid, :] * wy[lo:mid, :]
                      + g[mid:hi, :] * wy[mid:hi, :])
        y += 2
    if y < hp:
        lo = y * cg
        chunks.append(g[lo:lo + cg, :] * wy[lo:lo + cg, :])
    while len(chunks) > 1:
        nxt = [chunks[i] + chunks[i + 1] for i in range(0, len(chunks) - 1, 2)]
        if len(chunks) % 2:
            nxt.append(chunks[-1])
        chunks = nxt
    out_ref[...] = chunks[0]


def _affine_coeffs(p, w_in, w_pad):
    """The 2x3 affine matrix of AffineTransform.theta(), flattened to scalars."""
    ca = jnp.cos(p["angle"])
    sa = jnp.sin(p["angle"])
    a00 = p["scaleX"] * ca + p["shearX"] * sa * p["scaleX"]
    a01 = -sa * p["scaleY"] + p["shearX"] * p["scaleY"] * ca
    a10 = p["shearY"] * p["scaleX"] * ca + sa * p["scaleX"]
    a11 = -p["shearY"] * sa * p["scaleY"] + p["scaleY"] * ca
    # ss = (theta[:, 2] * W / W_pad).index_select([1, 0])  (PyTorch swaps X/Y)
    sgx = p["shiftY"] * float(w_in) / float(w_pad)
    sgy = p["shiftX"] * float(w_in) / float(w_pad)
    return a00, a01, a10, a11, sgx, sgy


def _pick_tile(npix, max_tile=_MAX_TILE):
    """Lane tile: multiple of 128, capped, >=2 grid steps when possible (v7x)."""
    t = min(max_tile, max(128, pl.cdiv(npix, 2)))
    return pl.cdiv(t, 128) * 128


def affine_transform_forward(x, params, *, pad=20, max_tile=_MAX_TILE):
    """Pallas equivalent of AffineTransform.forward(x)."""
    n, c, h, w = x.shape
    if not (pad < h and pad < w):
        raise ValueError("ReflectionPad2d requires pad < H and pad < W")
    hp, wp = h + 2 * pad, w + 2 * pad
    nc = n * c
    n_groups = -(-nc // _GROUP)
    ncg = n_groups * _GROUP

    x = x.astype(jnp.float32)
    # TODO(synk): reflection padding + the channel-group re-layout, yf column
    # and affine sampling-coordinate table are tiny parameter-light jnp ops in
    # the wrapper (no clean in-kernel reflection-gather equivalent).
    x_pad = jnp.pad(x, ((0, 0), (0, 0), (pad, pad), (pad, pad)), mode="reflect")
    xp = x_pad.reshape(nc, hp, wp)
    if ncg != nc:
        xp = jnp.concatenate([xp, jnp.zeros((ncg - nc, hp, wp), jnp.float32)], 0)
    # row index = ((g*hp + y) * _GROUP + local_channel)
    img = jnp.transpose(xp.reshape(n_groups, _GROUP, hp, wp),
                        (0, 2, 1, 3)).reshape(n_groups * hp * _GROUP, wp)

    # Constant per-row source-row index (same for every channel group).
    yf = jnp.repeat(jnp.arange(hp, dtype=jnp.float32),
                    _GROUP).reshape(hp * _GROUP, 1)

    # Affine grid over the padded frame (align_corners normalized coords),
    # restricted to the pixels that survive the crop, then un-normalized to
    # padded-frame pixel coordinates; the kernel only does the 4-tap gather.
    xx1 = jnp.linspace(-1.0, 1.0, hp).astype(jnp.float32)[pad:pad + h]   # rows
    xx2 = jnp.linspace(-1.0, 1.0, wp).astype(jnp.float32)[pad:pad + w]   # cols
    c_col = jnp.broadcast_to(xx2[None, :], (h, w)).reshape(-1)
    c_row = jnp.broadcast_to(xx1[:, None], (h, w)).reshape(-1)
    a00, a01, a10, a11, sgx, sgy = _affine_coeffs(params, w, wp)
    gx = a00 * c_col + a01 * c_row + sgx          # grid[..., 0]  (width)
    gy = a10 * c_col + a11 * c_row + sgy          # grid[..., 1]  (height)
    ix = (gx + 1.0) * (0.5 * (wp - 1))            # un-normalized (align_corners)
    iy = (gy + 1.0) * (0.5 * (hp - 1))
    coords = jnp.stack([ix, iy], axis=0).astype(jnp.float32)    # (2, h*w)

    npix = h * w
    tile = _pick_tile(npix, max_tile)
    npix_pad = pl.cdiv(npix, tile) * tile
    if npix_pad != npix:
        coords = jnp.pad(coords, ((0, 0), (0, npix_pad - npix)))

    kernel = functools.partial(_grid_sample_kernel, hp=hp, wp=wp, cg=_GROUP)
    out2 = pl.pallas_call(
        kernel,
        out_shape=jax.ShapeDtypeStruct((ncg, npix_pad), jnp.float32),
        grid_spec=pltpu.PrefetchScalarGridSpec(
            num_scalar_prefetch=0,
            grid=(n_groups, npix_pad // tile),
            in_specs=[
                # per-pixel sampling coordinates (changes per tile)
                pl.BlockSpec((2, tile), lambda g, t: (0, t)),
                # constant row-index column: single-buffer (grid-invariant)
                pl.BlockSpec((hp * _GROUP, 1), lambda g, t: (0, 0),
                             pipeline_mode=pl.Buffered(1)),
                # resident padded image for the current channel group:
                # single-buffer when it never changes (1 group)
                pl.BlockSpec((hp * _GROUP, wp), lambda g, t: (g, 0),
                             pipeline_mode=(pl.Buffered(1) if n_groups == 1
                                            else pl.Buffered(2))),
            ],
            out_specs=pl.BlockSpec((_GROUP, tile), lambda g, t: (g, t)),
        ),
        compiler_params=pltpu.CompilerParams(
            dimension_semantics=("parallel", "parallel"),
            vmem_limit_bytes=48 * 1024 * 1024,
        ),
    )(coords, yf, img)

    return out2[:nc, :npix].reshape(n, c, h, w)


def affine_transform_reference(x, params, *, pad=20):
    """Pure-JAX mirror of the PyTorch AffineTransform.forward."""
    n, c, h, w = x.shape
    hp, wp = h + 2 * pad, w + 2 * pad
    x = x.astype(jnp.float32)
    x_pad = jnp.pad(x, ((0, 0), (0, 0), (pad, pad), (pad, pad)), mode="reflect")

    xx1 = jnp.linspace(-1.0, 1.0, hp).astype(jnp.float32)
    xx2 = jnp.linspace(-1.0, 1.0, wp).astype(jnp.float32)
    XX, YY = jnp.meshgrid(xx1, xx2, indexing="ij")              # (hp, wp)

    a00, a01, a10, a11, sgx, sgy = _affine_coeffs(params, w, wp)
    gx = a00 * YY + a01 * XX + sgx                              # grid[..., 0]
    gy = a10 * YY + a11 * XX + sgy                              # grid[..., 1]

    # grid_sample: bilinear, zeros padding, align_corners=True.
    ix = (gx + 1.0) * 0.5 * (wp - 1)
    iy = (gy + 1.0) * 0.5 * (hp - 1)
    x0 = jnp.floor(ix).astype(jnp.int32)
    y0 = jnp.floor(iy).astype(jnp.int32)
    fx = ix - x0
    fy = iy - y0

    def tap(yy, xx):
        valid = (xx >= 0) & (xx < wp) & (yy >= 0) & (yy < hp)
        v = x_pad[:, :, jnp.clip(yy, 0, hp - 1), jnp.clip(xx, 0, wp - 1)]
        return v * valid[None, None].astype(jnp.float32)

    out_pad = (tap(y0, x0) * ((1 - fy) * (1 - fx))[None, None]
               + tap(y0, x0 + 1) * ((1 - fy) * fx)[None, None]
               + tap(y0 + 1, x0) * (fy * (1 - fx))[None, None]
               + tap(y0 + 1, x0 + 1) * (fy * fx)[None, None])
    return out_pad[:, :, pad:-pad, pad:-pad]


if __name__ == "__main__":
    key = jax.random.PRNGKey(0)
    kx, kp = jax.random.split(key)

    # The PyTorch module builds a batch-1 sampling grid, so forward implies N=1.
    # C=12 exercises channel-grouping (2 groups of 8) and channel padding.
    N, C, H, W = 1, 12, 32, 32
    PAD = 20                                    # module default (needs PAD < H, W)
    x = jax.random.normal(kx, (N, C, H, W), dtype=jnp.float32)

    pv = jax.random.normal(kp, (7,), dtype=jnp.float32)
    params = {
        "scaleX": 1.0 + 0.1 * pv[0],
        "scaleY": 1.0 + 0.1 * pv[1],
        "shiftX": 0.1 * pv[2],
        "shiftY": 0.1 * pv[3],
        "shearX": 0.1 * pv[4],
        "shearY": 0.1 * pv[5],
        "angle": 0.3 * pv[6],
    }

    fwd = jax.jit(functools.partial(affine_transform_forward, pad=PAD))
    out = jax.block_until_ready(fwd(x, params))

    ref = affine_transform_reference(x, params, pad=PAD)
    assert out.shape == (N, C, H, W)
    err = float(jnp.max(jnp.abs(out - ref)))
    assert err < 1e-3, f"max abs error vs reference: {err}"
    print("KERNEL_OK")
</pallas_src>

<mosaic_0001>
module attributes {stable_mosaic.version = 11 : i64} {
  func.func @_grid_sample_kernel(%arg0: i32, %arg1: i32, %arg2: memref<2x512xf32, #tpu.memory_space<vmem>>, %arg3: memref<576x1xf32, #tpu.memory_space<vmem>>, %arg4: memref<576x72xf32, #tpu.memory_space<vmem>>, %arg5: memref<8x512xf32, #tpu.memory_space<vmem>>) attributes {dimension_semantics = [#tpu.dimension_semantics<parallel>, #tpu.dimension_semantics<parallel>], iteration_bounds = array<i64: 2, 2>, scalar_prefetch = 0 : i64, scratch_operands = 0 : i64, tpu.core_type = #tpu.core_type<tc>, window_params = [{transform_indices = @transform_0, window_bounds = array<i64: 2, 512>}, {pipeline_mode = #tpu.pipeline_mode<synchronous>, transform_indices = @transform_1, window_bounds = array<i64: 576, 1>}, {pipeline_mode = #tpu.pipeline_mode<double_buffered>, transform_indices = @transform_2, window_bounds = array<i64: 576, 72>}, {transform_indices = @transform_3, window_bounds = array<i64: 8, 512>}]} {
    %c0 = arith.constant 0 : index
    %c0_0 = arith.constant 0 : index
    %0 = vector.load %arg2[%c0, %c0_0] : memref<2x512xf32, #tpu.memory_space<vmem>>, vector<1x512xf32>
    %c1 = arith.constant 1 : index
    %c0_1 = arith.constant 0 : index
    %1 = vector.load %arg2[%c1, %c0_1] : memref<2x512xf32, #tpu.memory_space<vmem>>, vector<1x512xf32>
    %2 = tpu.iota {dimensions = array<i32: 0>} : vector<72x512xi32>
    %3 = arith.sitofp %2 : vector<72x512xi32> to vector<72x512xf32>
    %4 = vector.broadcast %0 : vector<1x512xf32> to vector<72x512xf32>
    %5 = arith.subf %3, %4 : vector<72x512xf32>
    %6 = math.absf %5 : vector<72x512xf32>
    %cst = arith.constant 1.000000e+00 : f32
    %7 = vector.broadcast %cst : f32 to vector<72x512xf32>
    %8 = arith.subf %7, %6 : vector<72x512xf32>
    %cst_2 = arith.constant 0.000000e+00 : f32
    %9 = vector.broadcast %cst_2 : f32 to vector<72x512xf32>
    %10 = arith.maximumf %9, %8 : vector<72x512xf32>
    %c0_3 = arith.constant 0 : index
    %c0_4 = arith.constant 0 : index
    %11 = vector.load %arg4[%c0_3, %c0_4] : memref<576x72xf32, #tpu.memory_space<vmem>>, vector<576x72xf32>
    %cst_5 = arith.constant dense<0.000000e+00> : vector<576x512xf32>
    %12 = tpu.matmul %11, %10, %cst_5 {dimension_numbers = #tpu.dot_dimension_numbers<[1], [0], [0], [1], [0, 0, 1, 1], [], []>} : vector<576x72xf32>, vector<72x512xf32>, vector<576x512xf32> -> vector<576x512xf32>
    %c0_6 = arith.constant 0 : index
    %c0_7 = arith.constant 0 : index
    %13 = vector.load %arg3[%c0_6, %c0_7] : memref<576x1xf32, #tpu.memory_space<vmem>>, vector<576x1xf32>
    %14 = vector.broadcast %13 : vector<576x1xf32> to vector<576x512xf32>
    %15 = vector.broadcast %1 : vector<1x512xf32> to vector<576x512xf32>
    %16 = arith.subf %14, %15 : vector<576x512xf32>
    %17 = math.absf %16 : vector<576x512xf32>
    %cst_8 = arith.constant 1.000000e+00 : f32
    %18 = vector.broadcast %cst_8 : f32 to vector<576x512xf32>
    %19 = arith.subf %18, %17 : vector<576x512xf32>
    %cst_9 = arith.constant 0.000000e+00 : f32
    %20 = vector.broadcast %cst_9 : f32 to vector<576x512xf32>
    %21 = arith.maximumf %20, %19 : vector<576x512xf32>
    %22 = vector.extract_strided_slice %12 {offsets = [0, 0], sizes = [8, 512], strides = [1, 1]} : vector<576x512xf32> to vector<8x512xf32>
    %23 = vector.extract_strided_slice %21 {offsets = [0, 0], sizes = [8, 512], strides = [1, 1]} : vector<576x512xf32> to vector<8x512xf32>
    %24 = arith.mulf %22, %23 : vector<8x512xf32>
    %25 = vector.extract_strided_slice %12 {offsets = [8, 0], sizes = [8, 512], strides = [1, 1]} : vector<576x512xf32> to vector<8x512xf32>
    %26 = vector.extract_strided_slice %21 {offsets = [8, 0], sizes = [8, 512], strides = [1, 1]} : vector<576x512xf32> to vector<8x512xf32>
    %27 = arith.mulf %25, %26 : vector<8x512xf32>
    %28 = arith.addf %24, %27 : vector<8x512xf32>
    %29 = vector.extract_strided_slice %12 {offsets = [16, 0], sizes = [8, 512], strides = [1, 1]} : vector<576x512xf32> to vector<8x512xf32>
    %30 = vector.extract_strided_slice %21 {offsets = [16, 0], sizes = [8, 512], strides = [1, 1]} : vector<576x512xf32> to vector<8x512xf32>
    %31 = arith.mulf %29, %30 : vector<8x512xf32>
    %32 = vector.extract_strided_slice %12 {offsets = [24, 0], sizes = [8, 512], strides = [1, 1]} : vector<576x512xf32> to vector<8x512xf32>
    %33 = vector.extract_strided_slice %21 {offsets = [24, 0], sizes = [8, 512], strides = [1, 1]} : vector<576x512xf32> to vector<8x512xf32>
    %34 = arith.mulf %32, %33 : vector<8x512xf32>
    %35 = arith.addf %31, %34 : vector<8x512xf32>
    %36 = vector.extract_strided_slice %12 {offsets = [32, 0], sizes = [8, 512], strides = [1, 1]} : vector<576x512xf32> to vector<8x512xf32>
    %37 = vector.extract_strided_slice %21 {offsets = [32, 0], sizes = [8, 512], strides = [1, 1]} : vector<576x512xf32> to vector<8x512xf32>
    %38 = arith.mulf %36, %37 : vector<8x512xf32>
    %39 = vector.extract_strided_slice %12 {offsets = [40, 0], sizes = [8, 512], strides = [1, 1]} : vector<576x512xf32> to vector<8x512xf32>
    %40 = vector.extract_strided_slice %21 {offsets = [40, 0], sizes = [8, 512], strides = [1, 1]} : vector<576x512xf32> to vector<8x512xf32>
    %41 = arith.mulf %39, %40 : vector<8x512xf32>
    %42 = arith.addf %38, %41 : vector<8x512xf32>
    %43 = vector.extract_strided_slice %12 {offsets = [48, 0], sizes = [8, 512], strides = [1, 1]} : vector<576x512xf32> to vector<8x512xf32>
    %44 = vector.extract_strided_slice %21 {offsets = [48, 0], sizes = [8, 512], strides = [1, 1]} : vector<576x512xf32> to vector<8x512xf32>
    %45 = arith.mulf %43, %44 : vector<8x512xf32>
    %46 = vector.extract_strided_slice %12 {offsets = [56, 0], sizes = [8, 512], strides = [1, 1]} : vector<576x512xf32> to vector<8x512xf32>
    %47 = vector.extract_strided_slice %21 {offsets = [56, 0], sizes = [8, 512], strides = [1, 1]} : vector<576x512xf32> to vector<8x512xf32>
    %48 = arith.mulf %46, %47 : vector<8x512xf32>
    %49 = arith.addf %45, %48 : vector<8x512xf32>
    %50 = vector.extract_strided_slice %12 {offsets = [64, 0], sizes = [8, 512], strides = [1, 1]} : vector<576x512xf32> to vector<8x512xf32>
    %51 = vector.extract_strided_slice %21 {offsets = [64, 0], sizes = [8, 512], strides = [1, 1]} : vector<576x512xf32> to vector<8x512xf32>
    %52 = arith.mulf %50, %51 : vector<8x512xf32>
    %53 = vector.extract_strided_slice %12 {offsets = [72, 0], sizes = [8, 512], strides = [1, 1]} : vector<576x512xf32> to vector<8x512xf32>
    %54 = vector.extract_strided_slice %21 {offsets = [72, 0], sizes = [8, 512], strides = [1, 1]} : vector<576x512xf32> to vector<8x512xf32>
    %55 = arith.mulf %53, %54 : vector<8x512xf32>
    %56 = arith.addf %52, %55 : vector<8x512xf32>
    %57 = vector.extract_strided_slice %12 {offsets = [80, 0], sizes = [8, 512], strides = [1, 1]} : vector<576x512xf32> to vector<8x512xf32>
    %58 = vector.extract_strided_slice %21 {offsets = [80, 0], sizes = [8, 512], strides = [1, 1]} : vector<576x512xf32> to vector<8x512xf32>
    %59 = arith.mulf %57, %58 : vector<8x512xf32>
    %60 = vector.extract_strided_slice %12 {offsets = [88, 0], sizes = [8, 512], strides = [1, 1]} : vector<576x512xf32> to vector<8x512xf32>
    %61 = vector.extract_strided_slice %21 {offsets = [88, 0], sizes = [8, 512], strides = [1, 1]} : vector<576x512xf32> to vector<8x512xf32>
    %62 = arith.mulf %60, %61 : vector<8x512xf32>
    %63 = arith.addf %59, %62 : vector<8x512xf32>
    %64 = vector.extract_strided_slice %12 {offsets = [96, 0], sizes = [8, 512], strides = [1, 1]} : vector<576x512xf32> to vector<8x512xf32>
    %65 = vector.extract_strided_slice %21 {offsets = [96, 0], sizes = [8, 512], strides = [1, 1]} : vector<576x512xf32> to vector<8x512xf32>
    %66 = arith.mulf %64, %65 : vector<8x512xf32>
    %67 = vector.extract_strided_slice %12 {offsets = [104, 0], sizes = [8, 512], strides = [1, 1]} : vector<576x512xf32> to vector<8x512xf32>
    %68 = vector.extract_strided_slice %21 {offsets = [104, 0], sizes = [8, 512], strides = [1, 1]} : vector<576x512xf32> to vector<8x512xf32>
    %69 = arith.mulf %67, %68 : vector<8x512xf32>
    %70 = arith.addf %66, %69 : vector<8x512xf32>
    %71 = vector.extract_strided_slice %12 {offsets = [112, 0], sizes = [8, 512], strides = [1, 1]} : vector<576x512xf32> to vector<8x512xf32>
    %72 = vector.extract_strided_slice %21 {offsets = [112, 0], sizes = [8, 512], strides = [1, 1]} : vector<576x512xf32> to vector<8x512xf32>
    %73 = arith.mulf %71, %72 : vector<8x512xf32>
    %74 = vector.extract_strided_slice %12 {offsets = [120, 0], sizes = [8, 512], strides = [1, 1]} : vector<576x512xf32> to vector<8x512xf32>
    %75 = vector.extract_strided_slice %21 {offsets = [120, 0], sizes = [8, 512], strides = [1, 1]} : vector<576x512xf32> to vector<8x512xf32>
    %76 = arith.mulf %74, %75 : vector<8x512xf32>
    %77 = arith.addf %73, %76 : vector<8x512xf32>
    %78 = vector.extract_strided_slice %12 {offsets = [128, 0], sizes = [8, 512], strides = [1, 1]} : vector<576x512xf32> to vector<8x512xf32>
    %79 = vector.extract_strided_slice %21 {offsets = [128, 0], sizes = [8, 512], strides = [1, 1]} : vector<576x512xf32> to vector<8x512xf32>
    %80 = arith.mulf %78, %79 : vector<8x512xf32>
    %81 = vector.extract_strided_slice %12 {offsets = [136, 0], sizes = [8, 512], strides = [1, 1]} : vector<576x512xf32> to vector<8x512xf32>
    %82 = vector.extract_strided_slice %21 {offsets = [136, 0], sizes = [8, 512], strides = [1, 1]} : vector<576x512xf32> to vector<8x512xf32>
    %83 = arith.mulf %81, %82 : vector<8x512xf32>
    %84 = arith.addf %80, %83 : vector<8x512xf32>
    %85 = vector.extract_strided_slice %12 {offsets = [144, 0], sizes = [8, 512], strides = [1, 1]} : vector<576x512xf32> to vector<8x512xf32>
    %86 = vector.extract_strided_slice %21 {offsets = [144, 0], sizes = [8, 512], strides = [1, 1]} : vector<576x512xf32> to vector<8x512xf32>
    %87 = arith.mulf %85, %86 : vector<8x512xf32>
    %88 = vector.extract_strided_slice %12 {offsets = [152, 0], sizes = [8, 512], strides = [1, 1]} : vector<576x512xf32> to vector<8x512xf32>
    %89 = vector.extract_strided_slice %21 {offsets = [152, 0], sizes = [8, 512], strides = [1, 1]} : vector<576x512xf32> to vector<8x512xf32>
    %90 = arith.mulf %88, %89 : vector<8x512xf32>
    %91 = arith.addf %87, %90 : vector<8x512xf32>
    %92 = vector.extract_strided_slice %12 {offsets = [160, 0], sizes = [8, 512], strides = [1, 1]} : vector<576x512xf32> to vector<8x512xf32>
    %93 = vector.extract_strided_slice %21 {offsets = [160, 0], sizes = [8, 512], strides = [1, 1]} : vector<576x512xf32> to vector<8x512xf32>
    %94 = arith.mulf %92, %93 : vector<8x512xf32>
    %95 = vector.extract_strided_slice %12 {offsets = [168, 0], sizes = [8, 512], strides = [1, 1]} : vector<576x512xf32> to vector<8x512xf32>
    %96 = vector.extract_strided_slice %21 {offsets = [168, 0], sizes = [8, 512], strides = [1, 1]} : vector<576x512xf32> to vector<8x512xf32>
    %97 = arith.mulf %95, %96 : vector<8x512xf32>
    %98 = arith.addf %94, %97 : vector<8x512xf32>
    %99 = vector.extract_strided_slice %12 {offsets = [176, 0], sizes = [8, 512], strides = [1, 1]} : vector<576x512xf32> to vector<8x512xf32>
    %100 = vector.extract_strided_slice %21 {offsets = [176, 0], sizes = [8, 512], strides = [1, 1]} : vector<576x512xf32> to vector<8x512xf32>
    %101 = arith.mulf %99, %100 : vector<8x512xf32>
    %102 = vector.extract_strided_slice %12 {offsets = [184, 0], sizes = [8, 512], strides = [1, 1]} : vector<576x512xf32> to vector<8x512xf32>
    %103 = vector.extract_strided_slice %21 {offsets = [184, 0], sizes = [8, 512], strides = [1, 1]} : vector<576x512xf32> to vector<8x512xf32>
    %104 = arith.mulf %102, %103 : vector<8x512xf32>
    %105 = arith.addf %101, %104 : vector<8x512xf32>
    %106 = vector.extract_strided_slice %12 {offsets = [192, 0], sizes = [8, 512], strides = [1, 1]} : vector<576x512xf32> to vector<8x512xf32>
    %107 = vector.extract_strided_slice %21 {offsets = [192, 0], sizes = [8, 512], strides = [1, 1]} : vector<576x512xf32> to vector<8x512xf32>
    %108 = arith.mulf %106, %107 : vector<8x512xf32>
    %109 = vector.extract_strided_slice %12 {offsets = [200, 0], sizes = [8, 512], strides = [1, 1]} : vector<576x512xf32> to vector<8x512xf32>
    %110 = vector.extract_strided_slice %21 {offsets = [200, 0], sizes = [8, 512], strides = [1, 1]} : vector<576x512xf32> to vector<8x512xf32>
    %111 = arith.mulf %109, %110 : vector<8x512xf32>
    %112 = arith.addf %108, %111 : vector<8x512xf32>
    %113 = vector.extract_strided_slice %12 {offsets = [208, 0], sizes = [8, 512], strides = [1, 1]} : vector<576x512xf32> to vector<8x512xf32>
    %114 = vector.extract_strided_slice %21 {offsets = [208, 0], sizes = [8, 512], strides = [1, 1]} : vector<576x512xf32> to vector<8x512xf32>
    %115 = arith.mulf %113, %114 : vector<8x512xf32>
    %116 = vector.extract_strided_slice %12 {offsets = [216, 0], sizes = [8, 512], strides = [1, 1]} : vector<576x512xf32> to vector<8x512xf32>
    %117 = vector.extract_strided_slice %21 {offsets = [216, 0], sizes = [8, 512], strides = [1, 1]} : vector<576x512xf32> to vector<8x512xf32>
    %118 = arith.mulf %116, %117 : vector<8x512xf32>
    %119 = arith.addf %115, %118 : vector<8x512xf32>
    %120 = vector.extract_strided_slice %12 {offsets = [224, 0], sizes = [8, 512], strides = [1, 1]} : vector<576x512xf32> to vector<8x512xf32>
    %121 = vector.extract_strided_slice %21 {offsets = [224, 0], sizes = [8, 512], strides = [1, 1]} : vector<576x512xf32> to vector<8x512xf32>
    %122 = arith.mulf %120, %121 : vector<8x512xf32>
    %123 = vector.extract_strided_slice %12 {offsets = [232, 0], sizes = [8, 512], strides = [1, 1]} : vector<576x512xf32> to vector<8x512xf32>
    %124 = vector.extract_strided_slice %21 {offsets = [232, 0], sizes = [8, 512], strides = [1, 1]} : vector<576x512xf32> to vector<8x512xf32>
    %125 = arith.mulf %123, %124 : vector<8x512xf32>
    %126 = arith.addf %122, %125 : vector<8x512xf32>
    %127 = vector.extract_strided_slice %12 {offsets = [240, 0], sizes = [8, 512], strides = [1, 1]} : vector<576x512xf32> to vector<8x512xf32>
    %128 = vector.extract_strided_slice %21 {offsets = [240, 0], sizes = [8, 512], strides = [1, 1]} : vector<576x512xf32> to vector<8x512xf32>
    %129 = arith.mulf %127, %128 : vector<8x512xf32>
    %130 = vector.extract_strided_slice %12 {offsets = [248, 0], sizes = [8, 512], strides = [1, 1]} : vector<576x512xf32> to vector<8x512xf32>
    %131 = vector.extract_strided_slice %21 {offsets = [248, 0], sizes = [8, 512], strides = [1, 1]} : vector<576x512xf32> to vector<8x512xf32>
    %132 = arith.mulf %130, %131 : vector<8x512xf32>
    %133 = arith.addf %129, %132 : vector<8x512xf32>
    %134 = vector.extract_strided_slice %12 {offsets = [256, 0], sizes = [8, 512], strides = [1, 1]} : vector<576x512xf32> to vector<8x512xf32>
    %135 = vector.extract_strided_slice %21 {offsets = [256, 0], sizes = [8, 512], strides = [1, 1]} : vector<576x512xf32> to vector<8x512xf32>
    %136 = arith.mulf %134, %135 : vector<8x512xf32>
    %137 = vector.extract_strided_slice %12 {offsets = [264, 0], sizes = [8, 512], strides = [1, 1]} : vector<576x512xf32> to vector<8x512xf32>
    %138 = vector.extract_strided_slice %21 {offsets = [264, 0], sizes = [8, 512], strides = [1, 1]} : vector<576x512xf32> to vector<8x512xf32>
    %139 = arith.mulf %137, %138 : vector<8x512xf32>
    %140 = arith.addf %136, %139 : vector<8x512xf32>
    %141 = vector.extract_strided_slice %12 {offsets = [272, 0], sizes = [8, 512], strides = [1, 1]} : vector<576x512xf32> to vector<8x512xf32>
    %142 = vector.extract_strided_slice %21 {offsets = [272, 0], sizes = [8, 512], strides = [1, 1]} : vector<576x512xf32> to vector<8x512xf32>
    %143 = arith.mulf %141, %142 : vector<8x512xf32>
    %144 = vector.extract_strided_slice %12 {offsets = [280, 0], sizes = [8, 512], strides = [1, 1]} : vector<576x512xf32> to vector<8x512xf32>
    %145 = vector.extract_strided_slice %21 {offsets = [280, 0], sizes = [8, 512], strides = [1, 1]} : vector<576x512xf32> to vector<8x512xf32>
    %146 = arith.mulf %144, %145 : vector<8x512xf32>
    %147 = arith.addf %143, %146 : vector<8x512xf32>
    %148 = vector.extract_strided_slice %12 {offsets = [288, 0], sizes = [8, 512], strides = [1, 1]} : vector<576x512xf32> to vector<8x512xf32>
    %149 = vector.extract_strided_slice %21 {offsets = [288, 0], sizes = [8, 512], strides = [1, 1]} : vector<576x512xf32> to vector<8x512xf32>
    %150 = arith.mulf %148, %149 : vector<8x512xf32>
    %151 = vector.extract_strided_slice %12 {offsets = [296, 0], sizes = [8, 512], strides = [1, 1]} : vector<576x512xf32> to vector<8x512xf32>
    %152 = vector.extract_strided_slice %21 {offsets = [296, 0], sizes = [8, 512], strides = [1, 1]} : vector<576x512xf32> to vector<8x512xf32>
    %153 = arith.mulf %151, %152 : vector<8x512xf32>
    %154 = arith.addf %150, %153 : vector<8x512xf32>
    %155 = vector.extract_strided_slice %12 {offsets = [304, 0], sizes = [8, 512], strides = [1, 1]} : vector<576x512xf32> to vector<8x512xf32>
    %156 = vector.extract_strided_slice %21 {offsets = [304, 0], sizes = [8, 512], strides = [1, 1]} : vector<576x512xf32> to vector<8x512xf32>
    %157 = arith.mulf %155, %156 : vector<8x512xf32>
    %158 = vector.extract_strided_slice %12 {offsets = [312, 0], sizes = [8, 512], strides = [1, 1]} : vector<576x512xf32> to vector<8x512xf32>
    %159 = vector.extract_strided_slice %21 {offsets = [312, 0], sizes = [8, 512], strides = [1, 1]} : vector<576x512xf32> to vector<8x512xf32>
    %160 = arith.mulf %158, %159 : vector<8x512xf32>
    %161 = arith.addf %157, %160 : vector<8x512xf32>
    %162 = vector.extract_strided_slice %12 {offsets = [320, 0], sizes = [8, 512], strides = [1, 1]} : vector<576x512xf32> to vector<8x512xf32>
    %163 = vector.extract_strided_slice %21 {offsets = [320, 0], sizes = [8, 512], strides = [1, 1]} : vector<576x512xf32> to vector<8x512xf32>
    %164 = arith.mulf %162, %163 : vector<8x512xf32>
    %165 = vector.extract_strided_slice %12 {offsets = [328, 0], sizes = [8, 512], strides = [1, 1]} : vector<576x512xf32> to vector<8x512xf32>
    %166 = vector.extract_strided_slice %21 {offsets = [328, 0], sizes = [8, 512], strides = [1, 1]} : vector<576x512xf32> to vector<8x512xf32>
    %167 = arith.mulf %165, %166 : vector<8x512xf32>
    %168 = arith.addf %164, %167 : vector<8x512xf32>
    %169 = vector.extract_strided_slice %12 {offsets = [336, 0], sizes = [8, 512], strides = [1, 1]} : vector<576x512xf32> to vector<8x512xf32>
    %170 = vector.extract_strided_slice %21 {offsets = [336, 0], sizes = [8, 512], strides = [1, 1]} : vector<576x512xf32> to vector<8x512xf32>
    %171 = arith.mulf %169, %170 : vector<8x512xf32>
    %172 = vector.extract_strided_slice %12 {offsets = [344, 0], sizes = [8, 512], strides = [1, 1]} : vector<576x512xf32> to vector<8x512xf32>
    %173 = vector.extract_strided_slice %21 {offsets = [344, 0], sizes = [8, 512], strides = [1, 1]} : vector<576x512xf32> to vector<8x512xf32>
    %174 = arith.mulf %172, %173 : vector<8x512xf32>
    %175 = arith.addf %171, %174 : vector<8x512xf32>
    %176 = vector.extract_strided_slice %12 {offsets = [352, 0], sizes = [8, 512], strides = [1, 1]} : vector<576x512xf32> to vector<8x512xf32>
    %177 = vector.extract_strided_slice %21 {offsets = [352, 0], sizes = [8, 512], strides = [1, 1]} : vector<576x512xf32> to vector<8x512xf32>
    %178 = arith.mulf %176, %177 : vector<8x512xf32>
    %179 = vector.extract_strided_slice %12 {offsets = [360, 0], sizes = [8, 512], strides = [1, 1]} : vector<576x512xf32> to vector<8x512xf32>
    %180 = vector.extract_strided_slice %21 {offsets = [360, 0], sizes = [8, 512], strides = [1, 1]} : vector<576x512xf32> to vector<8x512xf32>
    %181 = arith.mulf %179, %180 : vector<8x512xf32>
    %182 = arith.addf %178, %181 : vector<8x512xf32>
    %183 = vector.extract_strided_slice %12 {offsets = [368, 0], sizes = [8, 512], strides = [1, 1]} : vector<576x512xf32> to vector<8x512xf32>
    %184 = vector.extract_strided_slice %21 {offsets = [368, 0], sizes = [8, 512], strides = [1, 1]} : vector<576x512xf32> to vector<8x512xf32>
    %185 = arith.mulf %183, %184 : vector<8x512xf32>
    %186 = vector.extract_strided_slice %12 {offsets = [376, 0], sizes = [8, 512], strides = [1, 1]} : vector<576x512xf32> to vector<8x512xf32>
    %187 = vector.extract_strided_slice %21 {offsets = [376, 0], sizes = [8, 512], strides = [1, 1]} : vector<576x512xf32> to vector<8x512xf32>
    %188 = arith.mulf %186, %187 : vector<8x512xf32>
    %189 = arith.addf %185, %188 : vector<8x512xf32>
    %190 = vector.extract_strided_slice %12 {offsets = [384, 0], sizes = [8, 512], strides = [1, 1]} : vector<576x512xf32> to vector<8x512xf32>
    %191 = vector.extract_strided_slice %21 {offsets = [384, 0], sizes = [8, 512], strides = [1, 1]} : vector<576x512xf32> to vector<8x512xf32>
    %192 = arith.mulf %190, %191 : vector<8x512xf32>
    %193 = vector.extract_strided_slice %12 {offsets = [392, 0], sizes = [8, 512], strides = [1, 1]} : vector<576x512xf32> to vector<8x512xf32>
    %194 = vector.extract_strided_slice %21 {offsets = [392, 0], sizes = [8, 512], strides = [1, 1]} : vector<576x512xf32> to vector<8x512xf32>
    %195 = arith.mulf %193, %194 : vector<8x512xf32>
    %196 = arith.addf %192, %195 : vector<8x512xf32>
    %197 = vector.extract_strided_slice %12 {offsets = [400, 0], sizes = [8, 512], strides = [1, 1]} : vector<576x512xf32> to vector<8x512xf32>
    %198 = vector.extract_strided_slice %21 {offsets = [400, 0], sizes = [8, 512], strides = [1, 1]} : vector<576x512xf32> to vector<8x512xf32>
    %199 = arith.mulf %197, %198 : vector<8x512xf32>
    %200 = vector.extract_strided_slice %12 {offsets = [408, 0], sizes = [8, 512], strides = [1, 1]} : vector<576x512xf32> to vector<8x512xf32>
    %201 = vector.extract_strided_slice %21 {offsets = [408, 0], sizes = [8, 512], strides = [1, 1]} : vector<576x512xf32> to vector<8x512xf32>
    %202 = arith.mulf %200, %201 : vector<8x512xf32>
    %203 = arith.addf %199, %202 : vector<8x512xf32>
    %204 = vector.extract_strided_slice %12 {offsets = [416, 0], sizes = [8, 512], strides = [1, 1]} : vector<576x512xf32> to vector<8x512xf32>
    %205 = vector.extract_strided_slice %21 {offsets = [416, 0], sizes = [8, 512], strides = [1, 1]} : vector<576x512xf32> to vector<8x512xf32>
    %206 = arith.mulf %204, %205 : vector<8x512xf32>
    %207 = vector.extract_strided_slice %12 {offsets = [424, 0], sizes = [8, 512], strides = [1, 1]} : vector<576x512xf32> to vector<8x512xf32>
    %208 = vector.extract_strided_slice %21 {offsets = [424, 0], sizes = [8, 512], strides = [1, 1]} : vector<576x512xf32> to vector<8x512xf32>
    %209 = arith.mulf %207, %208 : vector<8x512xf32>
    %210 = arith.addf %206, %209 : vector<8x512xf32>
    %211 = vector.extract_strided_slice %12 {offsets = [432, 0], sizes = [8, 512], strides = [1, 1]} : vector<576x512xf32> to vector<8x512xf32>
    %212 = vector.extract_strided_slice %21 {offsets = [432, 0], sizes = [8, 512], strides = [1, 1]} : vector<576x512xf32> to vector<8x512xf32>
    %213 = arith.mulf %211, %212 : vector<8x512xf32>
    %214 = vector.extract_strided_slice %12 {offsets = [440, 0], sizes = [8, 512], strides = [1, 1]} : vector<576x512xf32> to vector<8x512xf32>
    %215 = vector.extract_strided_slice %21 {offsets = [440, 0], sizes = [8, 512], strides = [1, 1]} : vector<576x512xf32> to vector<8x512xf32>
    %216 = arith.mulf %214, %215 : vector<8x512xf32>
    %217 = arith.addf %213, %216 : vector<8x512xf32>
    %218 = vector.extract_strided_slice %12 {offsets = [448, 0], sizes = [8, 512], strides = [1, 1]} : vector<576x512xf32> to vector<8x512xf32>
    %219 = vector.extract_strided_slice %21 {offsets = [448, 0], sizes = [8, 512], strides = [1, 1]} : vector<576x512xf32> to vector<8x512xf32>
    %220 = arith.mulf %218, %219 : vector<8x512xf32>
    %221 = vector.extract_strided_slice %12 {offsets = [456, 0], sizes = [8, 512], strides = [1, 1]} : vector<576x512xf32> to vector<8x512xf32>
    %222 = vector.extract_strided_slice %21 {offsets = [456, 0], sizes = [8, 512], strides = [1, 1]} : vector<576x512xf32> to vector<8x512xf32>
    %223 = arith.mulf %221, %222 : vector<8x512xf32>
    %224 = arith.addf %220, %223 : vector<8x512xf32>
    %225 = vector.extract_strided_slice %12 {offsets = [464, 0], sizes = [8, 512], strides = [1, 1]} : vector<576x512xf32> to vector<8x512xf32>
    %226 = vector.extract_strided_slice %21 {offsets = [464, 0], sizes = [8, 512], strides = [1, 1]} : vector<576x512xf32> to vector<8x512xf32>
    %227 = arith.mulf %225, %226 : vector<8x512xf32>
    %228 = vector.extract_strided_slice %12 {offsets = [472, 0], sizes = [8, 512], strides = [1, 1]} : vector<576x512xf32> to vector<8x512xf32>
    %229 = vector.extract_strided_slice %21 {offsets = [472, 0], sizes = [8, 512], strides = [1, 1]} : vector<576x512xf32> to vector<8x512xf32>
    %230 = arith.mulf %228, %229 : vector<8x512xf32>
    %231 = arith.addf %227, %230 : vector<8x512xf32>
    %232 = vector.extract_strided_slice %12 {offsets = [480, 0], sizes = [8, 512], strides = [1, 1]} : vector<576x512xf32> to vector<8x512xf32>
    %233 = vector.extract_strided_slice %21 {offsets = [480, 0], sizes = [8, 512], strides = [1, 1]} : vector<576x512xf32> to vector<8x512xf32>
    %234 = arith.mulf %232, %233 : vector<8x512xf32>
    %235 = vector.extract_strided_slice %12 {offsets = [488, 0], sizes = [8, 512], strides = [1, 1]} : vector<576x512xf32> to vector<8x512xf32>
    %236 = vector.extract_strided_slice %21 {offsets = [488, 0], sizes = [8, 512], strides = [1, 1]} : vector<576x512xf32> to vector<8x512xf32>
    %237 = arith.mulf %235, %236 : vector<8x512xf32>
    %238 = arith.addf %234, %237 : vector<8x512xf32>
    %239 = vector.extract_strided_slice %12 {offsets = [496, 0], sizes = [8, 512], strides = [1, 1]} : vector<576x512xf32> to vector<8x512xf32>
    %240 = vector.extract_strided_slice %21 {offsets = [496, 0], sizes = [8, 512], strides = [1, 1]} : vector<576x512xf32> to vector<8x512xf32>
    %241 = arith.mulf %239, %240 : vector<8x512xf32>
    %242 = vector.extract_strided_slice %12 {offsets = [504, 0], sizes = [8, 512], strides = [1, 1]} : vector<576x512xf32> to vector<8x512xf32>
    %243 = vector.extract_strided_slice %21 {offsets = [504, 0], sizes = [8, 512], strides = [1, 1]} : vector<576x512xf32> to vector<8x512xf32>
    %244 = arith.mulf %242, %243 : vector<8x512xf32>
    %245 = arith.addf %241, %244 : vector<8x512xf32>
    %246 = vector.extract_strided_slice %12 {offsets = [512, 0], sizes = [8, 512], strides = [1, 1]} : vector<576x512xf32> to vector<8x512xf32>
    %247 = vector.extract_strided_slice %21 {offsets = [512, 0], sizes = [8, 512], strides = [1, 1]} : vector<576x512xf32> to vector<8x512xf32>
    %248 = arith.mulf %246, %247 : vector<8x512xf32>
    %249 = vector.extract_strided_slice %12 {offsets = [520, 0], sizes = [8, 512], strides = [1, 1]} : vector<576x512xf32> to vector<8x512xf32>
    %250 = vector.extract_strided_slice %21 {offsets = [520, 0], sizes = [8, 512], strides = [1, 1]} : vector<576x512xf32> to vector<8x512xf32>
    %251 = arith.mulf %249, %250 : vector<8x512xf32>
    %252 = arith.addf %248, %251 : vector<8x512xf32>
    %253 = vector.extract_strided_slice %12 {offsets = [528, 0], sizes = [8, 512], strides = [1, 1]} : vector<576x512xf32> to vector<8x512xf32>
    %254 = vector.extract_strided_slice %21 {offsets = [528, 0], sizes = [8, 512], strides = [1, 1]} : vector<576x512xf32> to vector<8x512xf32>
    %255 = arith.mulf %253, %254 : vector<8x512xf32>
    %256 = vector.extract_strided_slice %12 {offsets = [536, 0], sizes = [8, 512], strides = [1, 1]} : vector<576x512xf32> to vector<8x512xf32>
    %257 = vector.extract_strided_slice %21 {offsets = [536, 0], sizes = [8, 512], strides = [1, 1]} : vector<576x512xf32> to vector<8x512xf32>
    %258 = arith.mulf %256, %257 : vector<8x512xf32>
    %259 = arith.addf %255, %258 : vector<8x512xf32>
    %260 = vector.extract_strided_slice %12 {offsets = [544, 0], sizes = [8, 512], strides = [1, 1]} : vector<576x512xf32> to vector<8x512xf32>
    %261 = vector.extract_strided_slice %21 {offsets = [544, 0], sizes = [8, 512], strides = [1, 1]} : vector<576x512xf32> to vector<8x512xf32>
    %262 = arith.mulf %260, %261 : vector<8x512xf32>
    %263 = vector.extract_strided_slice %12 {offsets = [552, 0], sizes = [8, 512], strides = [1, 1]} : vector<576x512xf32> to vector<8x512xf32>
    %264 = vector.extract_strided_slice %21 {offsets = [552, 0], sizes = [8, 512], strides = [1, 1]} : vector<576x512xf32> to vector<8x512xf32>
    %265 = arith.mulf %263, %264 : vector<8x512xf32>
    %266 = arith.addf %262, %265 : vector<8x512xf32>
    %267 = vector.extract_strided_slice %12 {offsets = [560, 0], sizes = [8, 512], strides = [1, 1]} : vector<576x512xf32> to vector<8x512xf32>
    %268 = vector.extract_strided_slice %21 {offsets = [560, 0], sizes = [8, 512], strides = [1, 1]} : vector<576x512xf32> to vector<8x512xf32>
    %269 = arith.mulf %267, %268 : vector<8x512xf32>
    %270 = vector.extract_strided_slice %12 {offsets = [568, 0], sizes = [8, 512], strides = [1, 1]} : vector<576x512xf32> to vector<8x512xf32>
    %271 = vector.extract_strided_slice %21 {offsets = [568, 0], sizes = [8, 512], strides = [1, 1]} : vector<576x512xf32> to vector<8x512xf32>
    %272 = arith.mulf %270, %271 : vector<8x512xf32>
    %273 = arith.addf %269, %272 : vector<8x512xf32>
    %274 = arith.addf %28, %35 : vector<8x512xf32>
    %275 = arith.addf %42, %49 : vector<8x512xf32>
    %276 = arith.addf %56, %63 : vector<8x512xf32>
    %277 = arith.addf %70, %77 : vector<8x512xf32>
    %278 = arith.addf %84, %91 : vector<8x512xf32>
    %279 = arith.addf %98, %105 : vector<8x512xf32>
    %280 = arith.addf %112, %119 : vector<8x512xf32>
    %281 = arith.addf %126, %133 : vector<8x512xf32>
    %282 = arith.addf %140, %147 : vector<8x512xf32>
    %283 = arith.addf %154, %161 : vector<8x512xf32>
    %284 = arith.addf %168, %175 : vector<8x512xf32>
    %285 = arith.addf %182, %189 : vector<8x512xf32>
    %286 = arith.addf %196, %203 : vector<8x512xf32>
    %287 = arith.addf %210, %217 : vector<8x512xf32>
    %288 = arith.addf %224, %231 : vector<8x512xf32>
    %289 = arith.addf %238, %245 : vector<8x512xf32>
    %290 = arith.addf %252, %259 : vector<8x512xf32>
    %291 = arith.addf %266, %273 : vector<8x512xf32>
    %292 = arith.addf %274, %275 : vector<8x512xf32>
    %293 = arith.addf %276, %277 : vector<8x512xf32>
    %294 = arith.addf %278, %279 : vector<8x512xf32>
    %295 = arith.addf %280, %281 : vector<8x512xf32>
    %296 = arith.addf %282, %283 : vector<8x512xf32>
    %297 = arith.addf %284, %285 : vector<8x512xf32>
    %298 = arith.addf %286, %287 : vector<8x512xf32>
    %299 = arith.addf %288, %289 : vector<8x512xf32>
    %300 = arith.addf %290, %291 : vector<8x512xf32>
    %301 = arith.addf %292, %293 : vector<8x512xf32>
    %302 = arith.addf %294, %295 : vector<8x512xf32>
    %303 = arith.addf %296, %297 : vector<8x512xf32>
    %304 = arith.addf %298, %299 : vector<8x512xf32>
    %305 = arith.addf %301, %302 : vector<8x512xf32>
    %306 = arith.addf %303, %304 : vector<8x512xf32>
    %307 = arith.addf %305, %306 : vector<8x512xf32>
    %308 = arith.addf %307, %300 : vector<8x512xf32>
    %c0_10 = arith.constant 0 : index
    %c0_11 = arith.constant 0 : index
    %309 = vector.load %arg5[%c0_10, %c0_11] : memref<8x512xf32, #tpu.memory_space<vmem>>, vector<8x512xf32>
    tpu.vector_store %arg5[%c0_10, %c0_11], %308 {strides = array<i32>} : memref<8x512xf32, #tpu.memory_space<vmem>>, vector<8x512xf32>,
    return
  }
  func.func @transform_0(%arg0: i32, %arg1: i32) -> (i32, i32) {
    %c0_i32 = arith.constant 0 : i32
    %c0_i32_0 = arith.constant 0 : i32
    return %c0_i32, %arg1 : i32, i32
  }
  func.func @transform_1(%arg0: i32, %arg1: i32) -> (i32, i32) {
    %c0_i32 = arith.constant 0 : i32
    %c0_i32_0 = arith.constant 0 : i32
    %c0_i32_1 = arith.constant 0 : i32
    return %c0_i32, %c0_i32_0 : i32, i32
  }
  func.func @transform_2(%arg0: i32, %arg1: i32) -> (i32, i32) {
    %c0_i32 = arith.constant 0 : i32
    %c0_i32_0 = arith.constant 0 : i32
    return %arg0, %c0_i32 : i32, i32
  }
  func.func @transform_3(%arg0: i32, %arg1: i32) -> (i32, i32) {
    %c0_i32 = arith.constant 0 : i32
    return %arg0, %arg1 : i32, i32
  }
}

</mosaic_0001>

<bundles_post_ra>
// kernel: affine_transform_forward.1
= control target key start
LH: loop header
LB: loop body
LE: loop exit
PB: predicated region body
PF: predicated region fallthrough
CT: control target
= control target key end

     0   :  { %s4229_s12 = smov 0   ;;  %s4231_s13 = smov 0   ;;  %s6843_s0 = inlined_call_operand.vmem [shape: f32[2,1024], index: 0, kind: input, shape index: {}]   ;;  %s6844_s1 = inlined_call_operand.vmem [shape: f32[576,1], index: 1, kind: input, shape index: {}]   ;;  %s6845_s2 = inlined_call_operand.vmem [shape: f32[1152,72], index: 2, kind: input, shape index: {}]   ;;  %s6846_s3 = inlined_call_operand.vmem [shape: f32[16,1024], index: 3, kind: output, shape index: {}]  }
   0x1   :  { %s4233_s14 = smov 0   ;;  %s4235_s15 = smov 0  }
   0x2   :  { %s4237_s16 = smov 0  }
   0x3 LB: > { %s22_s17 = sadd.s32 1, %s4197_s14  ;;  %s25_s18 = sadd.s32 1, %s4201_s15  ;;  %s4205_s16 = sphi %s4237_s16, %s13_s16   ;;  %s4201_s15 = sphi %s4235_s15, %s7163_s15   ;;  %s4197_s14 = sphi %s4233_s14, %s7162_s14   ;;  %s4193_s13 = sphi %s4231_s13, %s7161_s13   ;;  %s4189_s12 = sphi %s4229_s12, %s7160_s12  }
   0x4   : > { %p23_p0 = scmp.ge.s32.totalorder %s22_s17, 2  ;;  %p3969_p1 = scmp.ge.s32.totalorder %s4205_s16, 1 }
   0x5   : > { %p163_p2 = scmp.lt.s32.totalorder %s4205_s16, 5 }
   0x6   : > { %s7165_s17 = smov (%p23_p0, %s22_s17), 0  ;;  %s7167_s18 = smov (!%p23_p0, %s25_s18), %s4201_s15 }
   0x7   : > { %p164_p3 = pnand %p3969_p1, %p163_p2  ;;  %p27_p4 = scmp.ge.s32.totalorder %s7167_s18, 2 }
   0x9   : > { %s7169_s18 = smov (%p27_p4, %s7167_s18), 0  ;;  %167 = sbr.rel (%p164_p3) target bundleno = 586 (0x24a), region = 32 }
   0xe   : > { %s3970_s19 = sshll.u32 %s4189_s12, 2  ;;  %v221_v0 = vlaneseq  ;;  %v1688_v1 = vld [vmem:[%s6844_s1] sm:$0xff]  ;;  %v6847_v2 = vmov 0.0   ;;  %v1690_v3 = vld [vmem:[%s6844_s1 + $0x10] sm:$0xff]  ;;  %v4208_v5 = vmov 0   ;;  %v1689_v10 = vld [vmem:[%s6844_s1 + $0x8] sm:$0xff] }
   0xf   : > { %p197_p5 = scmp.lt.s32.totalorder %s3970_s19, 7  ;;  %758 = vmatprep.mubr.f32.mxu0 %v6847_v2  ;;  %1255 = vmatprep.mubr.f32.mxu1 %v6847_v2  ;;  %v1691_v11 = vld [vmem:[%s6844_s1 + $0x18] sm:$0xff]  ;;  %v1693_v29 = vld [vmem:[%s6844_s1 + $0x28] sm:$0xff]  ;;  %v1692_v34 = vld [vmem:[%s6844_s1 + $0x20] sm:$0xff]  ;;  %s202_s30 = smul.u32 72, %s4193_s13  ;;  %vm477_vm0 = vcmask 588800  }
  0x10   : > { %v4269_v4 = vshrl.u32 %v221_v0, 7  ;;  %4165 = vset.pattern.permute.xlu0 %v4208_v5  ;;  %4166 = vset.pattern.permute.xlu1 %v4208_v5  ;;  %v1695_v43 = vld [vmem:[%s6844_s1 + $0x38] sm:$0xff]  ;;  %v1694_v44 = vld [vmem:[%s6844_s1 + $0x30] sm:$0xff]  ;;  %p209_p7 = scmp.lt.s32.totalorder %s4193_s13, 1 }
  0x11   : > { %s7171_s19 = smov (!%p197_p5, %s3970_s19), 7  ;;  %1762 = vperm.xlu0 %4165, %v1688_v1   ;;  %1772 = vperm.xlu1 %4166, %v1690_v3   ;;  %p4409_p6 = scmp.lt.s32.totalorder %s202_s30, 143 }
  0x12   : > { %v230_v6 = vadd.s32 64, %v4269_v4  ;;  %v247_v7 = vsub.s32 1, %v4269_v4  ;;  %v255_v8 = vsub.s32 3, %v4269_v4  ;;  %v243_v9 = vsub.s32 0, %v4269_v4  ;;  %s3971_s28 = sshll.u32 %s7171_s19, 1  ;;  %s7175_s13 = smov (!%p209_p7, %s4193_s13), 1 }
  0x13   : > { %v251_v12 = vsub.s32 2, %v4269_v4  ;;  %v229_v13 = vadd.s32 56, %v4269_v4  ;;  %v228_v14 = vadd.s32 48, %v4269_v4  ;;  %v227_v15 = vadd.s32 40, %v4269_v4  ;;  %s4291_s4 = scalar_lea.vmem %s6843_s0, %s3971_s28  ;;  %s7173_s30 = smov (!%p4409_p6, %s202_s30), 143 }
  0x14   : > { %v239_v16 = vcvt.s32.f32 %v230_v6  ;;  %v226_v17 = vadd.s32 32, %v4269_v4  ;;  %v225_v18 = vadd.s32 24, %v4269_v4  ;;  %v224_v19 = vadd.s32 16, %v4269_v4  ;;  %v218_v20 = vld [vmem:[%s4291_s4] ss:$2 sm:$0xf] }
  0x15   : > { %v238_v21 = vcvt.s32.f32 %v229_v13  ;;  %v4297_v22 = vcvt.s32.f32 %v228_v14  ;;  %v4299_v23 = vcvt.s32.f32 %v227_v15  ;;  %v4302_v24 = vcvt.s32.f32 %v4269_v4  ;;  %1767 = vperm.xlu0 %4165, %v1689_v10   ;;  %1777 = vperm.xlu1 %4166, %v1691_v11   ;;  %s3972_s25 = sshll.u32 %s7173_s30, 3 }
  0x16   : > { %v4306_v25 = vrot.slane %v218_v20, %v247_v7  ;;  %v4310_v26 = vrot.slane %v218_v20, %v255_v8  ;;  %v4314_v27 = vrot.slane %v218_v20, %v243_v9  ;;  %v4318_v28 = vrot.slane %v218_v20, %v251_v12  ;;  %v1696_v20 = vld [vmem:[%s6844_s1 + $0x40] sm:$0xff]  ;;  %s4452_s28 = scalar_lea.vmem %s6845_s2, %s3972_s25 }
  0x17   : > { %v4323_v30 = vcvt.s32.f32 %v226_v17  ;;  %v4325_v31 = vcvt.s32.f32 %v225_v18  ;;  %v4327_v32 = vcvt.s32.f32 %v224_v19  ;;  %v4330_v33 = vadd.s32 8, %v4269_v4  ;;  %v1697_v19 = vld [vmem:[%s6844_s1 + $0x48] sm:$0xff] }
  0x18   : > { %v294_v35 = vsub.f32 %v239_v16, %v4306_v25  ;;  %v296_v36 = vsub.f32 %v239_v16, %v4310_v26  ;;  %v293_v37 = vsub.f32 %v239_v16, %v4314_v27  ;;  %v295_v38 = vsub.f32 %v239_v16, %v4318_v28 }
  0x19   : > { %v290_v39 = vsub.f32 %v238_v21, %v4306_v25  ;;  %v292_v40 = vsub.f32 %v238_v21, %v4310_v26  ;;  %v289_v41 = vsub.f32 %v238_v21, %v4314_v27  ;;  %v291_v42 = vsub.f32 %v238_v21, %v4318_v28  ;;  %1787 = vperm.xlu1 %4166, %v1693_v29  }
  0x1a   : > { %v330_v45 = vand.u32 2147483647, %v294_v35  ;;  %v332_v46 = vand.u32 2147483647, %v296_v36  ;;  %v329_v47 = vand.u32 2147483647, %v293_v37  ;;  %v286_v48 = vsub.f32 %v4297_v22, %v4306_v25  ;;  %1782 = vperm.xlu0 %4165, %v1692_v34  }
  0x1b   : > { %v331_v49 = vand.u32 2147483647, %v295_v38  ;;  %v326_v50 = vand.u32 2147483647, %v290_v39  ;;  %v328_v51 = vand.u32 2147483647, %v292_v40  ;;  %v288_v52 = vsub.f32 %v4297_v22, %v4310_v26 }
  0x1c   : > { %v366_v53 = vsub.f32 1.0, %v330_v45  ;;  %v368_v54 = vsub.f32 1.0, %v332_v46  ;;  %v365_v55 = vsub.f32 1.0, %v329_v47  ;;  %v325_v56 = vand.u32 2147483647, %v289_v41  ;;  %v1699_v47 = vld [vmem:[%s6844_s1 + $0x58] sm:$0xff] }
  0x1d   : > { %v367_v57 = vsub.f32 1.0, %v331_v49  ;;  %v362_v58 = vsub.f32 1.0, %v326_v50  ;;  %v364_v59 = vsub.f32 1.0, %v328_v51  ;;  %v327_v60 = vand.u32 2147483647, %v291_v42  ;;  %1797 = vperm.xlu1 %4166, %v1695_v43  }
  0x1e   : > { %v402_v61 = vmax.f32 %v366_v53, 0.0  ;;  %v404_v62 = vmax.f32 %v368_v54, 0.0  ;;  %v401_v63 = vmax.f32 %v365_v55, 0.0  ;;  %v361_v0 = vsub.f32 1.0, %v325_v56  ;;  %1792 = vperm.xlu0 %4165, %v1694_v44  }
  0x1f   : > { %v403_v1 = vmax.f32 %v367_v57, 0.0  ;;  %v398_v3 = vmax.f32 %v362_v58, 0.0  ;;  %v400_v5 = vmax.f32 %v364_v59, 0.0  ;;  %v363_v6 = vsub.f32 1.0, %v327_v60  ;;  %v1698_v59 = vld [vmem:[%s6844_s1 + $0x50] sm:$0xff] }
  0x20   : > { %708 = vmatprep.subr.mxu0 %v402_v61  ;;  %1205 = vmatprep.subr.mxu1 %v404_v62  ;;  %v397_v10 = vmax.f32 %v361_v0, 0.0  ;;  %v322_v11 = vand.u32 2147483647, %v286_v48  ;;  %v324_v13 = vand.u32 2147483647, %v288_v52  ;;  %v285_v14 = vsub.f32 %v4297_v22, %v4314_v27  ;;  %v1701_v0 = vld [vmem:[%s6844_s1 + $0x68] sm:$0xff] }
  0x21   : > { %709 = vmatpush1.msra.mxu0 %v401_v63  ;;  %1206 = vmatpush1.msra.mxu1 %v403_v1  ;;  %v399_v15 = vmax.f32 %v363_v6, 0.0  ;;  %v287_v16 = vsub.f32 %v4297_v22, %v4318_v28  ;;  %v282_v17 = vsub.f32 %v4299_v23, %v4306_v25  ;;  %v284_v18 = vsub.f32 %v4299_v23, %v4310_v26 }
  0x22   : > { %710 = vmatprep.subr.mxu0 %v398_v3  ;;  %1207 = vmatprep.subr.mxu1 %v400_v5  ;;  %v358_v21 = vsub.f32 1.0, %v322_v11  ;;  %v360_v29 = vsub.f32 1.0, %v324_v13  ;;  %v321_v34 = vand.u32 2147483647, %v285_v14  ;;  %v281_v22 = vsub.f32 %v4299_v23, %v4314_v27 }
  0x23   : > { %711 = vmatpush1.msra.mxu0 %v397_v10  ;;  %1208 = vmatpush1.msra.mxu1 %v399_v15  ;;  %v323_v35 = vand.u32 2147483647, %v287_v16  ;;  %v318_v36 = vand.u32 2147483647, %v282_v17  ;;  %v320_v37 = vand.u32 2147483647, %v284_v18  ;;  %v283_v38 = vsub.f32 %v4299_v23, %v4318_v28 }
  0x24   : > { %v394_v39 = vmax.f32 %v358_v21, 0.0  ;;  %v396_v40 = vmax.f32 %v360_v29, 0.0  ;;  %v357_v41 = vsub.f32 1.0, %v321_v34  ;;  %v317_v42 = vand.u32 2147483647, %v281_v22  ;;  %1807 = vperm.xlu1 %4166, %v1697_v19   ;;  %1802 = vperm.xlu0 %4165, %v1696_v20   ;;  %v1700_v18 = vld [vmem:[%s6844_s1 + $0x60] sm:$0xff] }
  0x25   : > { %v359_v43 = vsub.f32 1.0, %v323_v35  ;;  %v354_v44 = vsub.f32 1.0, %v318_v36  ;;  %v356_v45 = vsub.f32 1.0, %v320_v37  ;;  %v319_v46 = vand.u32 2147483647, %v283_v38  ;;  %v1703_v34 = vld [vmem:[%s6844_s1 + $0x78] sm:$0xff] }
  0x26   : > { %712 = vmatprep.subr.mxu0 %v394_v39  ;;  %1209 = vmatprep.subr.mxu1 %v396_v40  ;;  %v393_v48 = vmax.f32 %v357_v41, 0.0  ;;  %v353_v49 = vsub.f32 1.0, %v317_v42  ;;  %v278_v23 = vsub.f32 %v4323_v30, %v4306_v25  ;;  %v280_v50 = vsub.f32 %v4323_v30, %v4310_v26 }
  0x27   : > { %v395_v51 = vmax.f32 %v359_v43, 0.0  ;;  %v390_v52 = vmax.f32 %v354_v44, 0.0  ;;  %v392_v53 = vmax.f32 %v356_v45, 0.0  ;;  %v355_v54 = vsub.f32 1.0, %v319_v46  ;;  %v1702_v45 = vld [vmem:[%s6844_s1 + $0x70] sm:$0xff] }
  0x28   : > { %713 = vmatpush1.msra.mxu0 %v393_v48  ;;  %v389_v55 = vmax.f32 %v353_v49, 0.0  ;;  %v314_v56 = vand.u32 2147483647, %v278_v23  ;;  %v316_v57 = vand.u32 2147483647, %v280_v50  ;;  %v277_v58 = vsub.f32 %v4323_v30, %v4314_v27  ;;  %1817 = vperm.xlu1 %4166, %v1699_v47   ;;  %v1705_v23 = vld [vmem:[%s6844_s1 + $0x88] sm:$0xff] }
  0x29   : > { %1210 = vmatpush1.msra.mxu1 %v395_v51  ;;  %714 = vmatprep.subr.mxu0 %v390_v52  ;;  %v391_v60 = vmax.f32 %v355_v54, 0.0  ;;  %v279_v61 = vsub.f32 %v4323_v30, %v4318_v28  ;;  %v274_v62 = vsub.f32 %v4325_v31, %v4306_v25  ;;  %v276_v63 = vsub.f32 %v4325_v31, %v4310_v26 }
  0x2a   : > { %1211 = vmatprep.subr.mxu1 %v392_v53  ;;  %715 = vmatpush1.msra.mxu0 %v389_v55  ;;  %v350_v1 = vsub.f32 1.0, %v314_v56  ;;  %v352_v3 = vsub.f32 1.0, %v316_v57  ;;  %v313_v5 = vand.u32 2147483647, %v277_v58  ;;  %v273_v6 = vsub.f32 %v4325_v31, %v4314_v27 }
  0x2b   : > { %1212 = vmatpush1.msra.mxu1 %v391_v60  ;;  %v315_v30 = vand.u32 2147483647, %v279_v61  ;;  %v310_v10 = vand.u32 2147483647, %v274_v62  ;;  %v312_v11 = vand.u32 2147483647, %v276_v63  ;;  %v275_v13 = vsub.f32 %v4325_v31, %v4318_v28  ;;  %1812 = vperm.xlu0 %4165, %v1698_v59  }
  0x2c   : > { %v386_v14 = vmax.f32 %v350_v1, 0.0  ;;  %v388_v15 = vmax.f32 %v352_v3, 0.0  ;;  %v349_v16 = vsub.f32 1.0, %v313_v5  ;;  %v309_v17 = vand.u32 2147483647, %v273_v6  ;;  %1827 = vperm.xlu1 %4166, %v1701_v0   ;;  %v1704_v60 = vld [vmem:[%s6844_s1 + $0x80] sm:$0xff] }
  0x2d   : > { %v351_v19 = vsub.f32 1.0, %v315_v30  ;;  %v346_v20 = vsub.f32 1.0, %v310_v10  ;;  %v348_v21 = vsub.f32 1.0, %v312_v11  ;;  %v311_v29 = vand.u32 2147483647, %v275_v13 }
  0x2e   : > { %716 = vmatprep.subr.mxu0 %v386_v14  ;;  %1213 = vmatprep.subr.mxu1 %v388_v15  ;;  %v385_v31 = vmax.f32 %v349_v16, 0.0  ;;  %v345_v22 = vsub.f32 1.0, %v309_v17  ;;  %v270_v35 = vsub.f32 %v4327_v32, %v4306_v25  ;;  %v272_v36 = vsub.f32 %v4327_v32, %v4310_v26 }
  0x2f   : > { %v387_v37 = vmax.f32 %v351_v19, 0.0  ;;  %v382_v38 = vmax.f32 %v346_v20, 0.0  ;;  %v384_v39 = vmax.f32 %v348_v21, 0.0  ;;  %v347_v40 = vsub.f32 1.0, %v311_v29  ;;  %1822 = vperm.xlu0 %4165, %v1700_v18   ;;  %v1706_v29 = vld [vmem:[%s6844_s1 + $0x90] sm:$0xff] }
  0x30   : > { %717 = vmatpush1.msra.mxu0 %v385_v31  ;;  %v381_v41 = vmax.f32 %v345_v22, 0.0  ;;  %v306_v42 = vand.u32 2147483647, %v270_v35  ;;  %v308_v43 = vand.u32 2147483647, %v272_v36  ;;  %v269_v44 = vsub.f32 %v4327_v32, %v4314_v27  ;;  %1837 = vperm.xlu1 %4166, %v1703_v34   ;;  %v405_v36 = vld [vmem:[%s4452_s28] sm:$0xff] }
  0x31   : > { %1214 = vmatpush1.msra.mxu1 %v387_v37  ;;  %718 = vmatprep.subr.mxu0 %v382_v38  ;;  %v383_v46 = vmax.f32 %v347_v40, 0.0  ;;  %v271_v47 = vsub.f32 %v4327_v32, %v4318_v28  ;;  %v232_v48 = vcvt.s32.f32 %v4330_v33  ;;  %v262_v49 = vsub.f32 %v4302_v24, %v4306_v25  ;;  %v1709_v38 = vld [vmem:[%s6844_s1 + $0xa8] sm:$0xff] }
  0x32   : > { %1215 = vmatprep.subr.mxu1 %v384_v39  ;;  %719 = vmatpush1.msra.mxu0 %v381_v41  ;;  %v342_v50 = vsub.f32 1.0, %v306_v42  ;;  %v344_v51 = vsub.f32 1.0, %v308_v43  ;;  %v305_v52 = vand.u32 2147483647, %v269_v44  ;;  %v264_v53 = vsub.f32 %v4302_v24, %v4310_v26  ;;  %v1708_v39 = vld [vmem:[%s6844_s1 + $0xa0] sm:$0xff]  ;;  %v406_v40 = vld [vmem:[%s4452_s28 + $0x8] sm:$0xff] }
  0x33   : > { %1216 = vmatpush1.msra.mxu1 %v383_v46  ;;  %v307_v32 = vand.u32 2147483647, %v271_v47  ;;  %v266_v33 = vsub.f32 %v232_v48, %v4306_v25  ;;  %v268_v54 = vsub.f32 %v232_v48, %v4310_v26  ;;  %v265_v55 = vsub.f32 %v232_v48, %v4314_v27  ;;  %1832 = vperm.xlu0 %4165, %v1702_v45   ;;  %v1707_v26 = vld [vmem:[%s6844_s1 + $0x98] sm:$0xff]  ;;  %v1710_v42 = vld [vmem:[%s6844_s1 + $0xb0] sm:$0xff]  ;;  %v1713_v44 = vld [vmem:[%s6844_s1 + $0xc8] sm:$0xff] }
  0x34   : > { %v378_v56 = vmax.f32 %v342_v50, 0.0  ;;  %v380_v57 = vmax.f32 %v344_v51, 0.0  ;;  %v341_v58 = vsub.f32 1.0, %v305_v52  ;;  %v267_v59 = vsub.f32 %v232_v48, %v4318_v28  ;;  %1847 = vperm.xlu1 %4166, %v1705_v23   ;;  %v1711_v41 = vld [vmem:[%s6844_s1 + $0xb8] sm:$0xff]  ;;  %v407_v43 = vld [vmem:[%s4452_s28 + $0x10] sm:$0xff]  ;;  %v1712_v45 = vld [vmem:[%s6844_s1 + $0xc0] sm:$0xff] }
  0x35   : > { %v343_v61 = vsub.f32 1.0, %v307_v32  ;;  %v302_v62 = vand.u32 2147483647, %v266_v33  ;;  %v304_v63 = vand.u32 2147483647, %v268_v54  ;;  %v261_v25 = vsub.f32 %v4302_v24, %v4314_v27  ;;  %v408_v46 = vld [vmem:[%s4452_s28 + $0x18] sm:$0xff] }
  0x36   : > { %720 = vmatprep.subr.mxu0 %v378_v56  ;;  %1217 = vmatprep.subr.mxu1 %v380_v57  ;;  %v377_v0 = vmax.f32 %v341_v58, 0.0  ;;  %v301_v1 = vand.u32 2147483647, %v265_v55  ;;  %v303_v3 = vand.u32 2147483647, %v267_v59  ;;  %v263_v5 = vsub.f32 %v4302_v24, %v4318_v28  ;;  %v1715_v47 = vld [vmem:[%s6844_s1 + $0xd8] sm:$0xff] }
  0x37   : > { %v379_v6 = vmax.f32 %v343_v61, 0.0  ;;  %v338_v30 = vsub.f32 1.0, %v302_v62  ;;  %v340_v10 = vsub.f32 1.0, %v304_v63  ;;  %v298_v11 = vand.u32 2147483647, %v262_v49  ;;  %1842 = vperm.xlu0 %4165, %v1704_v60   ;;  %v1714_v48 = vld [vmem:[%s6844_s1 + $0xd0] sm:$0xff] }
  0x38   : > { %721 = vmatpush1.msra.mxu0 %v377_v0  ;;  %v337_v27 = vsub.f32 1.0, %v301_v1  ;;  %v339_v13 = vsub.f32 1.0, %v303_v3  ;;  %v300_v14 = vand.u32 2147483647, %v264_v53  ;;  %v297_v15 = vand.u32 2147483647, %v261_v25  ;;  %1857 = vperm.xlu1 %4166, %v1707_v26  }
  0x39   : > { %1218 = vmatpush1.msra.mxu1 %v379_v6  ;;  %v374_v16 = vmax.f32 %v338_v30, 0.0  ;;  %v376_v17 = vmax.f32 %v340_v10, 0.0  ;;  %v334_v18 = vsub.f32 1.0, %v298_v11  ;;  %v299_v19 = vand.u32 2147483647, %v263_v5  ;;  %v409_v49 = vld [vmem:[%s4452_s28 + $0x20] sm:$0xff] }
  0x3a   : > { %v373_v24 = vmax.f32 %v337_v27, 0.0  ;;  %v375_v28 = vmax.f32 %v339_v13, 0.0  ;;  %v336_v20 = vsub.f32 1.0, %v300_v14  ;;  %v333_v21 = vsub.f32 1.0, %v297_v15  ;;  %v1717_v23 = vld [vmem:[%s6844_s1 + $0xe8] sm:$0xff]  ;;  %v1716_v50 = vld [vmem:[%s6844_s1 + $0xe0] sm:$0xff] }
  0x3b   : > { %722 = vmatprep.subr.mxu0 %v374_v16  ;;  %1219 = vmatprep.subr.mxu1 %v376_v17  ;;  %v370_v34 = vmax.f32 %v334_v18, 0.0  ;;  %v335_v31 = vsub.f32 1.0, %v299_v19  ;;  %v410_v51 = vld [vmem:[%s4452_s28 + $0x28] sm:$0xff]  ;;  %v1719_v52 = vld [vmem:[%s6844_s1 + $0xf8] sm:$0xff]  ;;  %v1718_v53 = vld [vmem:[%s6844_s1 + $0xf0] sm:$0xff] }
  0x3c   : > { %723 = vmatpush1.msra.mxu0 %v373_v24  ;;  %1220 = vmatpush1.msra.mxu1 %v375_v28  ;;  %v372_v22 = vmax.f32 %v336_v20, 0.0  ;;  %v369_v35 = vmax.f32 %v333_v21, 0.0  ;;  %v411_v32 = vld [vmem:[%s4452_s28 + $0x30] sm:$0xff]  ;;  %v1721_v33 = vld [vmem:[%s6844_s1 + $0x108] sm:$0xff]  ;;  %v1720_v54 = vld [vmem:[%s6844_s1 + $0x100] sm:$0xff] }
  0x3d   : > { %724 = vmatprep.subr.mxu0 %v370_v34  ;;  %v371_v37 = vmax.f32 %v335_v31, 0.0  ;;  %1852 = vperm.xlu0 %4165, %v1706_v29   ;;  %v412_v55 = vld [vmem:[%s4452_s28 + $0x38] sm:$0xff]  ;;  %v1722_v57 = vld [vmem:[%s6844_s1 + $0x110] sm:$0xff]  ;;  %v413_v58 = vld [vmem:[%s4452_s28 + $0x40] sm:$0xff] }
  0x3e   : > { %1221 = vmatprep.subr.mxu1 %v372_v22  ;;  %725 = vmatpush1.msra.mxu0 %v369_v35  ;;  %v1723_v56 = vld [vmem:[%s6844_s1 + $0x118] sm:$0xff]  ;;  %v1725_v59 = vld [vmem:[%s6844_s1 + $0x128] sm:$0xff]  ;;  %v1724_v60 = vld [vmem:[%s6844_s1 + $0x120] sm:$0xff] }
  0x3f   : > { %1222 = vmatpush1.msra.mxu1 %v371_v37  ;;  %3977 = vmatmul.mubr.msk.f32.vlgmr.msra.gmra.mxu0 %vm477_vm0, %v405_v36  ;;  %v414_v61 = vld [vmem:[%s4452_s28 + $0x48] sm:$0xff]  ;;  %v1727_v62 = vld [vmem:[%s6844_s1 + $0x138] sm:$0xff]  ;;  %v1726_v63 = vld [vmem:[%s6844_s1 + $0x130] sm:$0xff] }
  0x40   : > { %4049 = vmatmul.mubr.msk.f32.vlgmr.msra.gmra.mxu1 %vm477_vm0, %v405_v36  ;;  %764 = vmatprep.mubr.f32.mxu0 %v6847_v2  ;;  %v415_v25 = vld [vmem:[%s4452_s28 + $0x50] sm:$0xff]  ;;  %v1729_v26 = vld [vmem:[%s6844_s1 + $0x148] sm:$0xff]  ;;  %v1728_v0 = vld [vmem:[%s6844_s1 + $0x140] sm:$0xff] }
  0x41   : > { %1261 = vmatprep.mubr.f32.mxu1 %v6847_v2  ;;  %1867 = vperm.xlu1 %4166, %v1709_v38   ;;  %v416_v1 = vld [vmem:[%s4452_s28 + $0x58] sm:$0xff]  ;;  %v1730_v5 = vld [vmem:[%s6844_s1 + $0x150] sm:$0xff]  ;;  %v417_v6 = vld [vmem:[%s4452_s28 + $0x60] sm:$0xff] }
  0x42   : > { %1862 = vperm.xlu0 %4165, %v1708_v39   ;;  %v1731_v3 = vld [vmem:[%s6844_s1 + $0x158] sm:$0xff]  ;;  %v1733_v30 = vld [vmem:[%s6844_s1 + $0x168] sm:$0xff]  ;;  %v1732_v10 = vld [vmem:[%s6844_s1 + $0x160] sm:$0xff] }
  0x43   : > { %3978 = vmatmul.mubr.msk.f32.gmra.mxu0 %vm477_vm0, %v406_v40  ;;  %v418_v11 = vld [vmem:[%s4452_s28 + $0x68] sm:$0xff]  ;;  %v1735_v27 = vld [vmem:[%s6844_s1 + $0x178] sm:$0xff]  ;;  %v1734_v13 = vld [vmem:[%s6844_s1 + $0x170] sm:$0xff] }
  0x44   : > { %4050 = vmatmul.mubr.msk.f32.gmra.mxu1 %vm477_vm0, %v406_v40  ;;  %770 = vmatprep.mubr.f32.mxu0 %v6847_v2  ;;  %v419_v14 = vld [vmem:[%s4452_s28 + $0x70] sm:$0xff]  ;;  %v1737_v15 = vld [vmem:[%s6844_s1 + $0x188] sm:$0xff]  ;;  %v1736_v16 = vld [vmem:[%s6844_s1 + $0x180] sm:$0xff] }
  0x45   : > { %1267 = vmatprep.mubr.f32.mxu1 %v6847_v2  ;;  %1877 = vperm.xlu1 %4166, %v1711_v41   ;;  %v420_v17 = vld [vmem:[%s4452_s28 + $0x78] sm:$0xff]  ;;  %v1738_v19 = vld [vmem:[%s6844_s1 + $0x190] sm:$0xff]  ;;  %v421_v24 = vld [vmem:[%s4452_s28 + $0x80] sm:$0xff] }
  0x46   : > { %1872 = vperm.xlu0 %4165, %v1710_v42   ;;  %v1739_v18 = vld [vmem:[%s6844_s1 + $0x198] sm:$0xff]  ;;  %v1741_v28 = vld [vmem:[%s6844_s1 + $0x1a8] sm:$0xff]  ;;  %v1740_v20 = vld [vmem:[%s6844_s1 + $0x1a0] sm:$0xff] }
  0x47   : > { %3979 = vmatmul.mubr.msk.f32.gmra.mxu0 %vm477_vm0, %v407_v43  ;;  %v422_v21 = vld [vmem:[%s4452_s28 + $0x88] sm:$0xff]  ;;  %v1743_v29 = vld [vmem:[%s6844_s1 + $0x1b8] sm:$0xff]  ;;  %v1742_v34 = vld [vmem:[%s6844_s1 + $0x1b0] sm:$0xff] }
  0x48   : > { %4051 = vmatmul.mubr.msk.f32.gmra.mxu1 %vm477_vm0, %v407_v43  ;;  %776 = vmatprep.mubr.f32.mxu0 %v6847_v2  ;;  %v423_v31 = vld [vmem:[%s4452_s28 + $0x90] sm:$0xff]  ;;  %v3976_v22 = vld [vmem:[%s4291_s4 + $0x1] ss:$2 sm:$0xf]  ;;  %v1745_v35 = vld [vmem:[%s6844_s1 + $0x1c8] sm:$0xff] }
  0x49   : > { %1273 = vmatprep.mubr.f32.mxu1 %v6847_v2  ;;  %1887 = vperm.xlu1 %4166, %v1713_v44   ;;  %v1744_v36 = vld [vmem:[%s6844_s1 + $0x1c0] sm:$0xff]  ;;  %v424_v37 = vld [vmem:[%s4452_s28 + $0x98] sm:$0xff]  ;;  %v4670_v38 = vrot.slane %v3976_v22, %v243_v9  ;;  %v4674_v39 = vrot.slane %v3976_v22, %v251_v12  ;;  %v4678_v40 = vrot.slane %v3976_v22, %v247_v7  ;;  %v1746_v9 = vld [vmem:[%s6844_s1 + $0x1d0] sm:$0xff] }
  0x4a   : > { %1882 = vperm.xlu0 %4165, %v1712_v45   ;;  %v1747_v41 = vld [vmem:[%s6844_s1 + $0x1d8] sm:$0xff]  ;;  %v4685_v42 = vrot.slane %v3976_v22, %v255_v8  ;;  %v425_v7 = vld [vmem:[%s4452_s28 + $0xa0] sm:$0xff]  ;;  %v1749_v45 = vld [vmem:[%s6844_s1 + $0x1e8] sm:$0xff] }
  0x4b   : > { %3980 = vmatmul.mubr.msk.f32.gmra.mxu0 %vm477_vm0, %v408_v46 }
  0x4c   : > { %4052 = vmatmul.mubr.msk.f32.gmra.mxu1 %vm477_vm0, %v408_v46  ;;  %782 = vmatprep.mubr.f32.mxu0 %v6847_v2 }
  0x4d   : > { %1279 = vmatprep.mubr.f32.mxu1 %v6847_v2  ;;  %1897 = vperm.xlu1 %4166, %v1715_v47  }
  0x4e   : > { %1892 = vperm.xlu0 %4165, %v1714_v48  }
  0x4f   : > { %3981 = vmatmul.mubr.msk.f32.gmra.mxu0 %vm477_vm0, %v409_v49 }
  0x50   : > { %4053 = vmatmul.mubr.msk.f32.gmra.mxu1 %vm477_vm0, %v409_v49  ;;  %788 = vmatprep.mubr.f32.mxu0 %v6847_v2 }
  0x51   : > { %1285 = vmatprep.mubr.f32.mxu1 %v6847_v2  ;;  %1907 = vperm.xlu1 %4166, %v1717_v23   ;;  %v1748_v23 = vld [vmem:[%s6844_s1 + $0x1e0] sm:$0xff] }
  0x52   : > { %1902 = vperm.xlu0 %4165, %v1716_v50  }
  0x53   : > { %3982 = vmatmul.mubr.msk.f32.gmra.mxu0 %vm477_vm0, %v410_v51 }
  0x54   : > { %4054 = vmatmul.mubr.msk.f32.gmra.mxu1 %vm477_vm0, %v410_v51  ;;  %794 = vmatprep.mubr.f32.mxu0 %v6847_v2  ;;  %v426_v51 = vld [vmem:[%s4452_s28 + $0xa8] sm:$0xff] }
  0x55   : > { %1291 = vmatprep.mubr.f32.mxu1 %v6847_v2  ;;  %1917 = vperm.xlu1 %4166, %v1719_v52  }
  0x56   : > { %1912 = vperm.xlu0 %4165, %v1718_v53  }
  0x57   : > { %3983 = vmatmul.mubr.msk.f32.gmra.mxu0 %vm477_vm0, %v411_v32 }
  0x58   : > { %4055 = vmatmul.mubr.msk.f32.gmra.mxu1 %vm477_vm0, %v411_v32  ;;  %800 = vmatprep.mubr.f32.mxu0 %v6847_v2  ;;  %v1751_v32 = vld [vmem:[%s6844_s1 + $0x1f8] sm:$0xff] }
  0x59   : > { %1297 = vmatprep.mubr.f32.mxu1 %v6847_v2  ;;  %1927 = vperm.xlu1 %4166, %v1721_v33  }
  0x5a   : > { %1922 = vperm.xlu0 %4165, %v1720_v54  }
  0x5b   : > { %3984 = vmatmul.mubr.msk.f32.gmra.mxu0 %vm477_vm0, %v412_v55 }
  0x5c   : > { %4056 = vmatmul.mubr.msk.f32.gmra.mxu1 %vm477_vm0, %v412_v55  ;;  %806 = vmatprep.mubr.f32.mxu0 %v6847_v2 }
  0x5d   : > { %1303 = vmatprep.mubr.f32.mxu1 %v6847_v2  ;;  %1937 = vperm.xlu1 %4166, %v1723_v56   ;;  %v1750_v56 = vld [vmem:[%s6844_s1 + $0x1f0] sm:$0xff] }
  0x5e   : > { %1932 = vperm.xlu0 %4165, %v1722_v57  }
  0x5f   : > { %3985 = vmatmul.mubr.msk.f32.gmra.mxu0 %vm477_vm0, %v413_v58 }
  0x60   : > { %4057 = vmatmul.mubr.msk.f32.gmra.mxu1 %vm477_vm0, %v413_v58  ;;  %812 = vmatprep.mubr.f32.mxu0 %v6847_v2 }
  0x61   : > { %1309 = vmatprep.mubr.f32.mxu1 %v6847_v2  ;;  %1947 = vperm.xlu1 %4166, %v1725_v59   ;;  %v427_v59 = vld [vmem:[%s4452_s28 + $0xb0] sm:$0xff] }
  0x62   : > { %1942 = vperm.xlu0 %4165, %v1724_v60  }
  0x63   : > { %3986 = vmatmul.mubr.msk.f32.gmra.mxu0 %vm477_vm0, %v414_v61 }
  0x64   : > { %4058 = vmatmul.mubr.msk.f32.gmra.mxu1 %vm477_vm0, %v414_v61  ;;  %818 = vmatprep.mubr.f32.mxu0 %v6847_v2 }
  0x65   : > { %1315 = vmatprep.mubr.f32.mxu1 %v6847_v2  ;;  %1957 = vperm.xlu1 %4166, %v1727_v62  }
  0x66   : > { %1952 = vperm.xlu0 %4165, %v1726_v63   ;;  %v1753_v63 = vld [vmem:[%s6844_s1 + $0x208] sm:$0xff] }
  0x67   : > { %3987 = vmatmul.mubr.msk.f32.gmra.mxu0 %vm477_vm0, %v415_v25 }
  0x68   : > { %4059 = vmatmul.mubr.msk.f32.gmra.mxu1 %vm477_vm0, %v415_v25  ;;  %824 = vmatprep.mubr.f32.mxu0 %v6847_v2 }
  0x69   : > { %1321 = vmatprep.mubr.f32.mxu1 %v6847_v2  ;;  %1967 = vperm.xlu1 %4166, %v1729_v26  }
  0x6a   : > { %1962 = vperm.xlu0 %4165, %v1728_v0  }
  0x6b   : > { %3988 = vmatmul.mubr.msk.f32.gmra.mxu0 %vm477_vm0, %v416_v1 }
  0x6c   : > { %4060 = vmatmul.mubr.msk.f32.gmra.mxu1 %vm477_vm0, %v416_v1  ;;  %830 = vmatprep.mubr.f32.mxu0 %v6847_v2 }
  0x6d   : > { %1327 = vmatprep.mubr.f32.mxu1 %v6847_v2  ;;  %1977 = vperm.xlu1 %4166, %v1731_v3   ;;  %v1752_v3 = vld [vmem:[%s6844_s1 + $0x200] sm:$0xff] }
  0x6e   : > { %1972 = vperm.xlu0 %4165, %v1730_v5  }
  0x6f   : > { %3989 = vmatmul.mubr.msk.f32.gmra.mxu0 %vm477_vm0, %v417_v6 }
  0x70   : > { %4061 = vmatmul.mubr.msk.f32.gmra.mxu1 %vm477_vm0, %v417_v6  ;;  %836 = vmatprep.mubr.f32.mxu0 %v6847_v2  ;;  %v428_v6 = vld [vmem:[%s4452_s28 + $0xb8] sm:$0xff] }
  0x71   : > { %1333 = vmatprep.mubr.f32.mxu1 %v6847_v2  ;;  %1987 = vperm.xlu1 %4166, %v1733_v30  }
  0x72   : > { %1982 = vperm.xlu0 %4165, %v1732_v10  }
  0x73   : > { %3990 = vmatmul.mubr.msk.f32.gmra.mxu0 %vm477_vm0, %v418_v11 }
  0x74   : > { %4062 = vmatmul.mubr.msk.f32.gmra.mxu1 %vm477_vm0, %v418_v11  ;;  %842 = vmatprep.mubr.f32.mxu0 %v6847_v2 }
  0x75   : > { %1339 = vmatprep.mubr.f32.mxu1 %v6847_v2  ;;  %1997 = vperm.xlu1 %4166, %v1735_v27  }
  0x76   : > { %1992 = vperm.xlu0 %4165, %v1734_v13  }
  0x77   : > { %3991 = vmatmul.mubr.msk.f32.gmra.mxu0 %vm477_vm0, %v419_v14 }
  0x78   : > { %4063 = vmatmul.mubr.msk.f32.gmra.mxu1 %vm477_vm0, %v419_v14  ;;  %848 = vmatprep.mubr.f32.mxu0 %v6847_v2 }
  0x79   : > { %1345 = vmatprep.mubr.f32.mxu1 %v6847_v2  ;;  %2007 = vperm.xlu1 %4166, %v1737_v15  }
  0x7a   : > { %2002 = vperm.xlu0 %4165, %v1736_v16  }
  0x7b   : > { %3992 = vmatmul.mubr.msk.f32.gmra.mxu0 %vm477_vm0, %v420_v17 }
  0x7c   : > { %4064 = vmatmul.mubr.msk.f32.gmra.mxu1 %vm477_vm0, %v420_v17  ;;  %854 = vmatprep.mubr.f32.mxu0 %v6847_v2 }
  0x7d   : > { %1351 = vmatprep.mubr.f32.mxu1 %v6847_v2  ;;  %2017 = vperm.xlu1 %4166, %v1739_v18  }
  0x7e   : > { %2012 = vperm.xlu0 %4165, %v1738_v19  }
  0x7f   : > { %3993 = vmatmul.mubr.msk.f32.gmra.mxu0 %vm477_vm0, %v421_v24 }
  0x80   : > { %4065 = vmatmul.mubr.msk.f32.gmra.mxu1 %vm477_vm0, %v421_v24  ;;  %860 = vmatprep.mubr.f32.mxu0 %v6847_v2  ;;  %v1755_v24 = vld [vmem:[%s6844_s1 + $0x218] sm:$0xff] }
  0x81   : > { %1357 = vmatprep.mubr.f32.mxu1 %v6847_v2  ;;  %2027 = vperm.xlu1 %4166, %v1741_v28  }
  0x82   : > { %2022 = vperm.xlu0 %4165, %v1740_v20  }
  0x83   : > { %3994 = vmatmul.mubr.msk.f32.gmra.mxu0 %vm477_vm0, %v422_v21 }
  0x84   : > { %4066 = vmatmul.mubr.msk.f32.gmra.mxu1 %vm477_vm0, %v422_v21  ;;  %866 = vmatprep.mubr.f32.mxu0 %v6847_v2  ;;  %v1754_v21 = vld [vmem:[%s6844_s1 + $0x210] sm:$0xff] }
  0x85   : > { %1363 = vmatprep.mubr.f32.mxu1 %v6847_v2  ;;  %2037 = vperm.xlu1 %4166, %v1743_v29  }
  0x86   : > { %2032 = vperm.xlu0 %4165, %v1742_v34  }
  0x87   : > { %3995 = vmatmul.mubr.msk.f32.gmra.mxu0 %vm477_vm0, %v423_v31 }
  0x88   : > { %4067 = vmatmul.mubr.msk.f32.gmra.mxu1 %vm477_vm0, %v423_v31  ;;  %872 = vmatprep.mubr.f32.mxu0 %v6847_v2 }
  0x89   : > { %1369 = vmatprep.mubr.f32.mxu1 %v6847_v2  ;;  %2047 = vperm.xlu1 %4166, %v1745_v35   ;;  %v429_v35 = vld [vmem:[%s4452_s28 + $0xc0] sm:$0xff] }
  0x8a   : > { %2042 = vperm.xlu0 %4165, %v1744_v36  }
  0x8b   : > { %3996 = vmatmul.mubr.msk.f32.gmra.mxu0 %vm477_vm0, %v424_v37 }
  0x8c   : > { %4068 = vmatmul.mubr.msk.f32.gmra.mxu1 %vm477_vm0, %v424_v37  ;;  %878 = vmatprep.mubr.f32.mxu0 %v6847_v2  ;;  %v1763_v12 = vpop.permute.xlu0 %1762  ;;  %v4695_v43 = vpop.permute.xlu1 %1772 }
  0x8d   : > { %1375 = vmatprep.mubr.f32.mxu1 %v6847_v2  ;;  %2057 = vperm.xlu1 %4166, %v1747_v41   ;;  %v2141_v4 = vsub.f32 %v1763_v12, %v4670_v38  ;;  %v2143_v8 = vsub.f32 %v1763_v12, %v4674_v39  ;;  %v2142_v44 = vsub.f32 %v1763_v12, %v4678_v40 }
  0x8e   : > { %2052 = vperm.xlu0 %4165, %v1746_v9   ;;  %v2144_v46 = vsub.f32 %v1763_v12, %v4685_v42  ;;  %v2149_v47 = vsub.f32 %v4695_v43, %v4670_v38  ;;  %v2151_v48 = vsub.f32 %v4695_v43, %v4674_v39  ;;  %v2150_v49 = vsub.f32 %v4695_v43, %v4678_v40 }
  0x8f   : > { %3997 = vmatmul.mubr.msk.f32.gmra.mxu0 %vm477_vm0, %v425_v7  ;;  %v2152_v50 = vsub.f32 %v4695_v43, %v4685_v42  ;;  %v2429_v57 = vand.u32 2147483647, %v2141_v4  ;;  %v2431_v58 = vand.u32 2147483647, %v2143_v8  ;;  %v2430_v60 = vand.u32 2147483647, %v2142_v44 }
  0x90   : > { %4069 = vmatmul.mubr.msk.f32.gmra.mxu1 %vm477_vm0, %v425_v7  ;;  %884 = vmatprep.mubr.f32.mxu0 %v6847_v2  ;;  %v1768_v52 = vpop.permute.xlu0 %1767  ;;  %v2432_v61 = vand.u32 2147483647, %v2144_v46  ;;  %v2437_v62 = vand.u32 2147483647, %v2149_v47  ;;  %v1778_v1 = vpop.permute.xlu1 %1777  ;;  %v2439_v5 = vand.u32 2147483647, %v2151_v48 }
  0x91   : > { %1381 = vmatprep.mubr.f32.mxu1 %v6847_v2  ;;  %2067 = vperm.xlu1 %4166, %v1749_v45   ;;  %v2145_v53 = vsub.f32 %v1768_v52, %v4670_v38  ;;  %v2147_v33 = vsub.f32 %v1768_v52, %v4674_v39  ;;  %v2146_v54 = vsub.f32 %v1768_v52, %v4678_v40  ;;  %v2717_v26 = vsub.f32 1.0, %v2429_v57  ;;  %v1757_v8 = vld [vmem:[%s6844_s1 + $0x228] sm:$0xff] }
  0x92   : > { %2062 = vperm.xlu0 %4165, %v1748_v23   ;;  %v2148_v55 = vsub.f32 %v1768_v52, %v4685_v42  ;;  %v2719_v0 = vsub.f32 1.0, %v2431_v58  ;;  %v2718_v30 = vsub.f32 1.0, %v2430_v60  ;;  %v2720_v10 = vsub.f32 1.0, %v2432_v61  ;;  %v1756_v52 = vld [vmem:[%s6844_s1 + $0x220] sm:$0xff] }
  0x93   : > { %3998 = vmatmul.mubr.msk.f32.gmra.mxu0 %vm477_vm0, %v426_v51  ;;  %v2433_v25 = vand.u32 2147483647, %v2145_v53  ;;  %v2435_v11 = vand.u32 2147483647, %v2147_v33  ;;  %v2153_v27 = vsub.f32 %v1778_v1, %v4670_v38  ;;  %v4749_v14 = vand.u32 2147483647, %v2146_v54 }
  0x94   : > { %4070 = vmatmul.mubr.msk.f32.gmra.mxu1 %vm477_vm0, %v426_v51  ;;  %890 = vmatprep.mubr.f32.mxu0 %v6847_v2  ;;  %v2725_v15 = vsub.f32 1.0, %v2437_v62  ;;  %v2155_v16 = vsub.f32 %v1778_v1, %v4674_v39  ;;  %v2154_v17 = vsub.f32 %v1778_v1, %v4678_v40  ;;  %v4753_v19 = vand.u32 2147483647, %v2148_v55  ;;  %v430_v53 = vld [vmem:[%s4452_s28 + $0xc8] sm:$0xff] }
  0x95   : > { %1387 = vmatprep.mubr.f32.mxu1 %v6847_v2  ;;  %2077 = vperm.xlu1 %4166, %v1751_v32   ;;  %v4747_v13 = vpop.permute.xlu0 %1782  ;;  %v2721_v18 = vsub.f32 1.0, %v2433_v25  ;;  %v2156_v28 = vsub.f32 %v1778_v1, %v4685_v42  ;;  %v2727_v29 = vsub.f32 1.0, %v2439_v5  ;;  %v4765_v34 = vand.u32 2147483647, %v2150_v49  ;;  %v1788_v49 = vpop.permute.xlu1 %1787 }
  0x96   : > { %2072 = vperm.xlu0 %4165, %v1750_v56   ;;  %v2157_v20 = vsub.f32 %v4747_v13, %v4670_v38  ;;  %v2159_v31 = vsub.f32 %v4747_v13, %v4674_v39  ;;  %v2158_v22 = vsub.f32 %v4747_v13, %v4678_v40  ;;  %v4774_v36 = vmax.f32 %v2717_v26, 0.0 }
  0x97   : > { %3999 = vmatmul.mubr.msk.f32.gmra.mxu0 %vm477_vm0, %v427_v59  ;;  %v2723_v37 = vsub.f32 1.0, %v2435_v11  ;;  %v2440_v41 = vand.u32 2147483647, %v2152_v50  ;;  %v2160_v9 = vsub.f32 %v4747_v13, %v4685_v42  ;;  %v4782_v7 = vmax.f32 %v2719_v0, 0.0  ;;  %v1758_v0 = vld [vmem:[%s6844_s1 + $0x230] sm:$0xff] }
  0x98   : > { %4071 = vmatmul.mubr.msk.f32.gmra.mxu1 %vm477_vm0, %v427_v59  ;;  %896 = vmatprep.mubr.f32.mxu0 %v6847_v2  ;;  %v4784_v12 = vmax.f32 %v2718_v30, 0.0  ;;  %v4786_v4 = vmax.f32 %v2720_v10, 0.0  ;;  %v2441_v44 = vand.u32 2147483647, %v2153_v27  ;;  %v2722_v43 = vsub.f32 1.0, %v4749_v14  ;;  %v431_v30 = vld [vmem:[%s4452_s28 + $0xd0] sm:$0xff] }
  0x99   : > { %1393 = vmatprep.mubr.f32.mxu1 %v6847_v2  ;;  %2087 = vperm.xlu1 %4166, %v1753_v63   ;;  %v4792_v45 = vmax.f32 %v2725_v15, 0.0  ;;  %v2443_v46 = vand.u32 2147483647, %v2155_v16  ;;  %v2442_v47 = vand.u32 2147483647, %v2154_v17  ;;  %v4795_v48 = vmax.f32 %v2721_v18, 0.0  ;;  %v4811_v56 = vpop.permute.xlu0 %1792 }
  0x9a   : > { %2082 = vperm.xlu0 %4165, %v1752_v3   ;;  %v2724_v23 = vsub.f32 1.0, %v4753_v19  ;;  %v4798_v50 = vmax.f32 %v2727_v29, 0.0  ;;  %v2726_v51 = vsub.f32 1.0, %v4765_v34  ;;  %v4807_v32 = vmax.f32 %v2723_v37, 0.0  ;;  %v1759_v63 = vld [vmem:[%s6844_s1 + $0x238] sm:$0xff] }
  0x9b   : > { %4000 = vmatmul.mubr.msk.f32.gmra.mxu0 %vm477_vm0, %v428_v6  ;;  %v2728_v33 = vsub.f32 1.0, %v2440_v41  ;;  %v2444_v54 = vand.u32 2147483647, %v2156_v28  ;;  %v2161_v55 = vsub.f32 %v1788_v49, %v4670_v38  ;;  %v2729_v57 = vsub.f32 1.0, %v2441_v44 }
  0x9c   : > { %4072 = vmatmul.mubr.msk.f32.gmra.mxu1 %vm477_vm0, %v428_v6  ;;  %902 = vmatprep.mubr.f32.mxu0 %v6847_v2  ;;  %v4813_v58 = vand.u32 2147483647, %v2157_v20  ;;  %v2163_v59 = vsub.f32 %v1788_v49, %v4674_v39  ;;  %v2162_v60 = vsub.f32 %v1788_v49, %v4678_v40  ;;  %v2731_v61 = vsub.f32 1.0, %v2443_v46  ;;  %v1798_v20 = vpop.permute.xlu1 %1797 }
  0x9d   : > { %1399 = vmatprep.mubr.f32.mxu1 %v6847_v2  ;;  %2097 = vperm.xlu1 %4166, %v1755_v24   ;;  %v2730_v62 = vsub.f32 1.0, %v2442_v47  ;;  %v2164_v25 = vsub.f32 %v1788_v49, %v4685_v42  ;;  %v2165_v26 = vsub.f32 %v4811_v56, %v4670_v38  ;;  %v2447_v1 = vand.u32 2147483647, %v2159_v31 }
  0x9e   : > { %2092 = vperm.xlu0 %4165, %v1754_v21   ;;  %v2446_v3 = vand.u32 2147483647, %v2158_v22  ;;  %v2167_v5 = vsub.f32 %v4811_v56, %v4674_v39  ;;  %v2166_v6 = vsub.f32 %v4811_v56, %v4678_v40  ;;  %v4834_v10 = vmax.f32 %v2722_v43, 0.0  ;;  %v432_v22 = vld [vmem:[%s4452_s28 + $0xd8] sm:$0xff] }
  0x9f   : > { %4001 = vmatmul.mubr.msk.f32.gmra.mxu0 %vm477_vm0, %v429_v35  ;;  %v2732_v11 = vsub.f32 1.0, %v2444_v54  ;;  %v2448_v27 = vand.u32 2147483647, %v2160_v9  ;;  %v2168_v13 = vsub.f32 %v4811_v56, %v4685_v42  ;;  %v4839_v14 = vmax.f32 %v2724_v23, 0.0  ;;  %v433_v56 = vld [vmem:[%s4452_s28 + $0xe0] sm:$0xff] }
  0xa0   : > { %4073 = vmatmul.mubr.msk.f32.gmra.mxu1 %vm477_vm0, %v429_v35  ;;  %908 = vmatprep.mubr.f32.mxu0 %v6847_v2  ;;  %v4841_v15 = vmax.f32 %v2726_v51, 0.0  ;;  %v4843_v16 = vmax.f32 %v2728_v33, 0.0  ;;  %v2449_v17 = vand.u32 2147483647, %v2161_v55  ;;  %v4845_v18 = vmax.f32 %v2729_v57, 0.0 }
  0xa1   : > { %1405 = vmatprep.mubr.f32.mxu1 %v6847_v2  ;;  %2107 = vperm.xlu1 %4166, %v1757_v8   ;;  %v2733_v19 = vsub.f32 1.0, %v4813_v58  ;;  %v2451_v24 = vand.u32 2147483647, %v2163_v59  ;;  %v2450_v28 = vand.u32 2147483647, %v2162_v60  ;;  %v4849_v21 = vmax.f32 %v2731_v61, 0.0  ;;  %v4860_v8 = vpop.permute.xlu0 %1802 }
  0xa2   : > { %2102 = vperm.xlu0 %4165, %v1756_v52   ;;  %v4851_v29 = vmax.f32 %v2730_v62, 0.0  ;;  %v2735_v34 = vsub.f32 1.0, %v2447_v1  ;;  %v2734_v31 = vsub.f32 1.0, %v2446_v3  ;;  %v4856_v35 = vmax.f32 %v2732_v11, 0.0 }
  0xa3   : > { %4002 = vmatmul.mubr.msk.f32.gmra.mxu0 %vm477_vm0, %v430_v53  ;;  %v2736_v37 = vsub.f32 1.0, %v2448_v27  ;;  %v2452_v41 = vand.u32 2147483647, %v2164_v25  ;;  %v2169_v9 = vsub.f32 %v1798_v20, %v4670_v38  ;;  %v2737_v44 = vsub.f32 1.0, %v2449_v17 }
  0xa4   : > { %4074 = vmatmul.mubr.msk.f32.gmra.mxu1 %vm477_vm0, %v430_v53  ;;  %914 = vmatprep.mubr.f32.mxu0 %v6847_v2  ;;  %v2453_v43 = vand.u32 2147483647, %v2165_v26  ;;  %v2171_v46 = vsub.f32 %v1798_v20, %v4674_v39  ;;  %v2170_v47 = vsub.f32 %v1798_v20, %v4678_v40  ;;  %v2739_v49 = vsub.f32 1.0, %v2451_v24 }
  0xa5   : > { %1411 = vmatprep.mubr.f32.mxu1 %v6847_v2  ;;  %2117 = vperm.xlu1 %4166, %v1759_v63   ;;  %v2738_v23 = vsub.f32 1.0, %v2450_v28  ;;  %v2172_v51 = vsub.f32 %v1798_v20, %v4685_v42  ;;  %v2173_v52 = vsub.f32 %v4860_v8, %v4670_v38  ;;  %v2455_v53 = vand.u32 2147483647, %v2167_v5  ;;  %v1808_v5 = vpop.permute.xlu1 %1807 }
  0xa6   : > { %2112 = vperm.xlu0 %4165, %v1758_v0   ;;  %v2454_v33 = vand.u32 2147483647, %v2166_v6  ;;  %v2175_v54 = vsub.f32 %v4860_v8, %v4674_v39  ;;  %v2174_v55 = vsub.f32 %v4860_v8, %v4678_v40  ;;  %v4875_v57 = vmax.f32 %v2733_v19, 0.0  ;;  %v4900_v20 = vpop.permute.xlu0 %1812 }
  0xa7   : > { %4003 = vmatmul.mubr.msk.f32.gmra.mxu0 %vm477_vm0, %v431_v30  ;;  %v2740_v58 = vsub.f32 1.0, %v2452_v41  ;;  %v2456_v59 = vand.u32 2147483647, %v2168_v13  ;;  %v2176_v60 = vsub.f32 %v4860_v8, %v4685_v42  ;;  %v4880_v61 = vmax.f32 %v2735_v34, 0.0  ;;  %v434_v13 = vld [vmem:[%s4452_s28 + $0xe8] sm:$0xff] }
  0xa8   : > { %4075 = vmatmul.mubr.msk.f32.gmra.mxu1 %vm477_vm0, %v431_v30  ;;  %920 = vmatprep.mubr.f32.mxu0 %v6847_v2  ;;  %v4882_v62 = vmax.f32 %v2734_v31, 0.0  ;;  %v4884_v63 = vmax.f32 %v2736_v37, 0.0  ;;  %v2457_v25 = vand.u32 2147483647, %v2169_v9  ;;  %v4886_v26 = vmax.f32 %v2737_v44, 0.0 }
  0xa9   : > { %1417 = vmatprep.mubr.f32.mxu1 %v6847_v2  ;;  %v2741_v0 = vsub.f32 1.0, %v2453_v43  ;;  %v2459_v1 = vand.u32 2147483647, %v2171_v46  ;;  %v2458_v3 = vand.u32 2147483647, %v2170_v47  ;;  %v4889_v6 = vmax.f32 %v2739_v49, 0.0 }
  0xaa   : > { %v4891_v30 = vmax.f32 %v2738_v23, 0.0  ;;  %v2743_v11 = vsub.f32 1.0, %v2455_v53  ;;  %v2742_v27 = vsub.f32 1.0, %v2454_v33  ;;  %v4896_v17 = vmax.f32 %v2740_v58, 0.0  ;;  %v435_v23 = vld [vmem:[%s4452_s28 + $0xf0] sm:$0xff] }
  0xab   : > { %4004 = vmatmul.mubr.msk.f32.gmra.mxu0 %vm477_vm0, %v432_v22  ;;  %v2744_v19 = vsub.f32 1.0, %v2456_v59  ;;  %v2460_v24 = vand.u32 2147483647, %v2172_v51  ;;  %v2177_v28 = vsub.f32 %v1808_v5, %v4670_v38  ;;  %v2745_v34 = vsub.f32 1.0, %v2457_v25 }
  0xac   : > { %4076 = vmatmul.mubr.msk.f32.gmra.mxu1 %vm477_vm0, %v432_v22  ;;  %926 = vmatprep.mubr.f32.mxu0 %v6847_v2  ;;  %v2461_v31 = vand.u32 2147483647, %v2173_v52  ;;  %v2179_v22 = vsub.f32 %v1808_v5, %v4674_v39  ;;  %v2178_v37 = vsub.f32 %v1808_v5, %v4678_v40  ;;  %v2747_v41 = vsub.f32 1.0, %v2459_v1 }
  0xad   : > { %1423 = vmatprep.mubr.f32.mxu1 %v6847_v2  ;;  %v2746_v9 = vsub.f32 1.0, %v2458_v3  ;;  %v2180_v8 = vsub.f32 %v1808_v5, %v4685_v42  ;;  %v2181_v44 = vsub.f32 %v4900_v20, %v4670_v38  ;;  %v2463_v43 = vand.u32 2147483647, %v2175_v54 }
  0xae   : > { %v2462_v46 = vand.u32 2147483647, %v2174_v55  ;;  %v2183_v47 = vsub.f32 %v4900_v20, %v4674_v39  ;;  %v2182_v49 = vsub.f32 %v4900_v20, %v4678_v40  ;;  %v4915_v51 = vmax.f32 %v2741_v0, 0.0 }
  0xaf   : > { %4005 = vmatmul.mubr.msk.f32.gmra.mxu0 %vm477_vm0, %v433_v56  ;;  %v2748_v52 = vsub.f32 1.0, %v2460_v24  ;;  %v2464_v53 = vand.u32 2147483647, %v2176_v60  ;;  %v2184_v33 = vsub.f32 %v4900_v20, %v4685_v42  ;;  %v4920_v54 = vmax.f32 %v2743_v11, 0.0  ;;  %v1818_v60 = vpop.permute.xlu1 %1817 }
  0xb0   : > { %4077 = vmatmul.mubr.msk.f32.gmra.mxu1 %vm477_vm0, %v433_v56  ;;  %932 = vmatprep.mubr.f32.mxu0 %v6847_v2  ;;  %v4922_v55 = vmax.f32 %v2742_v27, 0.0  ;;  %v4924_v56 = vmax.f32 %v2744_v19, 0.0  ;;  %v2465_v58 = vand.u32 2147483647, %v2177_v28  ;;  %v4926_v59 = vmax.f32 %v2745_v34, 0.0  ;;  %v436_v27 = vld [vmem:[%s4452_s28 + $0xf8] sm:$0xff]  ;;  %v4940_v34 = vpop.permute.xlu0 %1822 }
  0xb1   : > { %1429 = vmatprep.mubr.f32.mxu1 %v6847_v2  ;;  %v2749_v25 = vsub.f32 1.0, %v2461_v31  ;;  %v2467_v0 = vand.u32 2147483647, %v2179_v22  ;;  %v2466_v1 = vand.u32 2147483647, %v2178_v37  ;;  %v4929_v3 = vmax.f32 %v2747_v41, 0.0 }
  0xb2   : > { %6860 = vst [vmem:[#allocation2_spill] sm:$0xff] %v4922_v55  ;;  %6861 = vst [vmem:[#allocation3_spill] sm:$0xff] %v4924_v56  ;;  %v4931_v5 = vmax.f32 %v2746_v9, 0.0  ;;  %v2751_v11 = vsub.f32 1.0, %v2463_v43  ;;  %v4936_v19 = vmax.f32 %v2748_v52, 0.0  ;;  %v2752_v24 = vsub.f32 1.0, %v2464_v53 }
  0xb3   : > { %4006 = vmatmul.mubr.msk.f32.gmra.mxu0 %vm477_vm0, %v434_v13  ;;  %6862 = vst [vmem:[#allocation4_spill] sm:$0xff] %v4926_v59  ;;  %6863 = vst [vmem:[#allocation5_spill] sm:$0xff] %v4929_v3  ;;  %v2468_v28 = vand.u32 2147483647, %v2180_v8  ;;  %v2185_v20 = vsub.f32 %v1818_v60, %v4670_v38  ;;  %v2753_v31 = vsub.f32 1.0, %v2465_v58  ;;  %v2187_v37 = vsub.f32 %v1818_v60, %v4674_v39  ;;  %v437_v58 = vld [vmem:[%s4452_s28 + $0x100] sm:$0xff] }
  0xb4   : > { %4078 = vmatmul.mubr.msk.f32.gmra.mxu1 %vm477_vm0, %v434_v13  ;;  %938 = vmatprep.mubr.f32.mxu0 %v6847_v2  ;;  %6864 = vst [vmem:[#allocation6_spill] sm:$0xff] %v4931_v5  ;;  %v2750_v13 = vsub.f32 1.0, %v2462_v46  ;;  %6865 = vst [vmem:[#allocation7_spill] sm:$0xff] %v4936_v19  ;;  %v2469_v22 = vand.u32 2147483647, %v2181_v44  ;;  %v2186_v41 = vsub.f32 %v1818_v60, %v4678_v40  ;;  %v2755_v9 = vsub.f32 1.0, %v2467_v0 }
  0xb5   : > { %1435 = vmatprep.mubr.f32.mxu1 %v6847_v2  ;;  %v2754_v43 = vsub.f32 1.0, %v2466_v1  ;;  %v2188_v46 = vsub.f32 %v1818_v60, %v4685_v42  ;;  %v2189_v8 = vsub.f32 %v4940_v34, %v4670_v38  ;;  %v2470_v52 = vand.u32 2147483647, %v2182_v49 }
  0xb6   : > { %v2191_v53 = vsub.f32 %v4940_v34, %v4674_v39  ;;  %v2190_v44 = vsub.f32 %v4940_v34, %v4678_v40  ;;  %v4955_v0 = vmax.f32 %v2749_v25, 0.0  ;;  %v2756_v1 = vsub.f32 1.0, %v2468_v28 }
  0xb7   : > { %4007 = vmatmul.mubr.msk.f32.gmra.mxu0 %vm477_vm0, %v435_v23  ;;  %v2472_v60 = vand.u32 2147483647, %v2184_v33  ;;  %v2192_v19 = vsub.f32 %v4940_v34, %v4685_v42  ;;  %v4962_v49 = vmax.f32 %v2750_v13, 0.0  ;;  %v4964_v5 = vmax.f32 %v2752_v24, 0.0  ;;  %v1828_v33 = vpop.permute.xlu1 %1827  ;;  %v438_v24 = vld [vmem:[%s4452_s28 + $0x108] sm:$0xff] }
  0xb8   : > { %4079 = vmatmul.mubr.msk.f32.gmra.mxu1 %vm477_vm0, %v435_v23  ;;  %944 = vmatprep.mubr.f32.mxu0 %v6847_v2  ;;  %v2471_v23 = vand.u32 2147483647, %v2183_v47  ;;  %6866 = vst [vmem:[#allocation8_spill] sm:$0xff] %v4955_v0  ;;  %v4960_v47 = vmax.f32 %v2751_v11, 0.0  ;;  %v4966_v3 = vmax.f32 %v2753_v31, 0.0  ;;  %v2757_v59 = vsub.f32 1.0, %v2469_v22 }
  0xb9   : > { %1441 = vmatprep.mubr.f32.mxu1 %v6847_v2  ;;  %6868 = vst [vmem:[#allocation10_spill] sm:$0xff] %v4962_v49  ;;  %6869 = vst [vmem:[#allocation11_spill] sm:$0xff] %v4964_v5  ;;  %v2475_v25 = vand.u32 2147483647, %v2187_v37  ;;  %v2474_v0 = vand.u32 2147483647, %v2186_v41  ;;  %v2193_v37 = vsub.f32 %v1828_v33, %v4670_v38  ;;  %v4980_v41 = vpop.permute.xlu0 %1832 }
  0xba   : > { %6867 = vst [vmem:[#allocation9_spill] sm:$0xff] %v4960_v47  ;;  %6870 = vst [vmem:[#allocation12_spill] sm:$0xff] %v4966_v3  ;;  %v4969_v28 = vmax.f32 %v2755_v9, 0.0  ;;  %v4971_v34 = vmax.f32 %v2754_v43, 0.0  ;;  %v2759_v11 = vsub.f32 1.0, %v2471_v23  ;;  %v6873_v13 = vmov 0.0  }
  0xbb   : > { %4008 = vmatmul.mubr.msk.f32.gmra.mxu0 %vm477_vm0, %v436_v27  ;;  %v2760_v31 = vsub.f32 1.0, %v2472_v60  ;;  %v2476_v22 = vand.u32 2147483647, %v2188_v46  ;;  %v2477_v43 = vand.u32 2147483647, %v2189_v8  ;;  %v2195_v23 = vsub.f32 %v1828_v33, %v4674_v39 }
  0xbc   : > { %4080 = vmatmul.mubr.msk.f32.gmra.mxu1 %vm477_vm0, %v436_v27  ;;  %950 = vmatprep.mubr.f32.mxu0 %v6847_v2  ;;  %v2473_v27 = vand.u32 2147483647, %v2185_v20  ;;  %6871 = vst [vmem:[#allocation13_spill] sm:$0xff] %v4969_v28  ;;  %6872 = vst [vmem:[#allocation14_spill] sm:$0xff] %v4971_v34  ;;  %v4976_v20 = vmax.f32 %v2756_v1, 0.0  ;;  %v2762_v34 = vsub.f32 1.0, %v2474_v0  ;;  %v2196_v1 = vsub.f32 %v1828_v33, %v4685_v42 }
  0xbd   : > { %1447 = vmatprep.mubr.f32.mxu1 %v6847_v2  ;;  %v2758_v2 = vsub.f32 1.0, %v2470_v52  ;;  %v2194_v52 = vsub.f32 %v1828_v33, %v4678_v40  ;;  %v2197_v46 = vsub.f32 %v4980_v41, %v4670_v38  ;;  %v2479_v60 = vand.u32 2147483647, %v2191_v53  ;;  %v439_v0 = vld [vmem:[%s4452_s28 + $0x110] sm:$0xff] }
  0xbe   : > { %6874 = vst [vmem:[#allocation15_spill] sm:$0xff] %v4976_v20  ;;  %v2761_v9 = vsub.f32 1.0, %v2473_v27  ;;  %v2478_v20 = vand.u32 2147483647, %v2190_v44  ;;  %v2199_v28 = vsub.f32 %v4980_v41, %v4674_v39  ;;  %v2198_v8 = vsub.f32 %v4980_v41, %v4678_v40 }
  0xbf   : > { %4009 = vmatmul.mubr.msk.f32.gmra.mxu0 %vm477_vm0, %v437_v58  ;;  %v4995_v27 = vmax.f32 %v2757_v59, 0.0  ;;  %v2480_v33 = vand.u32 2147483647, %v2192_v19  ;;  %v2200_v3 = vsub.f32 %v4980_v41, %v4685_v42  ;;  %v5000_v53 = vmax.f32 %v2759_v11, 0.0  ;;  %v1838_v19 = vpop.permute.xlu1 %1837 }
  0xc0   : > { %4081 = vmatmul.mubr.msk.f32.gmra.mxu1 %vm477_vm0, %v437_v58  ;;  %956 = vmatprep.mubr.f32.mxu0 %v6873_v13  ;;  %v2763_v58 = vsub.f32 1.0, %v2475_v25  ;;  %v2764_v25 = vsub.f32 1.0, %v2476_v22  ;;  %v5002_v44 = vmax.f32 %v2758_v2, 0.0  ;;  %v5004_v5 = vmax.f32 %v2760_v31, 0.0  ;;  %v440_v2 = vld [vmem:[%s4452_s28 + $0x118] sm:$0xff] }
  0xc1   : > { %1453 = vmatprep.mubr.f32.mxu1 %v6873_v13  ;;  %6875 = vst [vmem:[#allocation16_spill] sm:$0xff] %v4995_v27  ;;  %6876 = vst [vmem:[#allocation17_spill] sm:$0xff] %v5000_v53  ;;  %v5006_v49 = vmax.f32 %v2761_v9, 0.0  ;;  %v2765_v47 = vsub.f32 1.0, %v2477_v43  ;;  %v2483_v59 = vand.u32 2147483647, %v2195_v23  ;;  %v2201_v43 = vsub.f32 %v1838_v19, %v4670_v38  ;;  %v5020_v23 = vpop.permute.xlu0 %1842 }
  0xc2   : > { %6877 = vst [vmem:[#allocation18_spill] sm:$0xff] %v5002_v44  ;;  %6878 = vst [vmem:[#allocation19_spill] sm:$0xff] %v5004_v5  ;;  %v2482_v27 = vand.u32 2147483647, %v2194_v52  ;;  %v5009_v22 = vmax.f32 %v2763_v58, 0.0  ;;  %v5011_v41 = vmax.f32 %v2762_v34, 0.0  ;;  %v2202_v58 = vsub.f32 %v1838_v19, %v4678_v40 }
  0xc3   : > { %4010 = vmatmul.mubr.msk.f32.gmra.mxu0 %vm477_vm0, %v438_v24  ;;  %6879 = vst [vmem:[#allocation20_spill] sm:$0xff] %v5006_v49  ;;  %v2767_v11 = vsub.f32 1.0, %v2479_v60  ;;  %v2766_v53 = vsub.f32 1.0, %v2478_v20  ;;  %v5016_v31 = vmax.f32 %v2764_v25, 0.0  ;;  %v2484_v9 = vand.u32 2147483647, %v2196_v1 }
  0xc4   : > { %4082 = vmatmul.mubr.msk.f32.gmra.mxu1 %vm477_vm0, %v438_v24  ;;  %962 = vmatprep.mubr.f32.mxu0 %v6873_v13  ;;  %v2481_v24 = vand.u32 2147483647, %v2193_v37  ;;  %6880 = vst [vmem:[#allocation21_spill] sm:$0xff] %v5009_v22  ;;  %6881 = vst [vmem:[#allocation22_spill] sm:$0xff] %v5011_v41  ;;  %v2768_v37 = vsub.f32 1.0, %v2480_v33  ;;  %v2203_v20 = vsub.f32 %v1838_v19, %v4674_v39  ;;  %v2771_v60 = vsub.f32 1.0, %v2483_v59 }
  0xc5   : > { %1459 = vmatprep.mubr.f32.mxu1 %v6873_v13  ;;  %6882 = vst [vmem:[#allocation23_spill] sm:$0xff] %v5016_v31  ;;  %v2485_v52 = vand.u32 2147483647, %v2197_v46  ;;  %v2204_v25 = vsub.f32 %v1838_v19, %v4685_v42  ;;  %v2205_v1 = vsub.f32 %v5020_v23, %v4670_v38  ;;  %v2487_v33 = vand.u32 2147483647, %v2199_v28 }
  0xc6   : > { %v2769_v34 = vsub.f32 1.0, %v2481_v24  ;;  %v2486_v31 = vand.u32 2147483647, %v2198_v8  ;;  %v2207_v41 = vsub.f32 %v5020_v23, %v4674_v39  ;;  %v2206_v46 = vsub.f32 %v5020_v23, %v4678_v40 }
  0xc7   : > { %4011 = vmatmul.mubr.msk.f32.gmra.mxu0 %vm477_vm0, %v439_v0  ;;  %v5035_v24 = vmax.f32 %v2765_v47, 0.0  ;;  %v2772_v59 = vsub.f32 1.0, %v2484_v9  ;;  %v2488_v19 = vand.u32 2147483647, %v2200_v3  ;;  %v2208_v22 = vsub.f32 %v5020_v23, %v4685_v42  ;;  %v1848_v3 = vpop.permute.xlu1 %1847 }
  0xc8   : > { %4083 = vmatmul.mubr.msk.f32.gmra.mxu1 %vm477_vm0, %v439_v0  ;;  %968 = vmatprep.mubr.f32.mxu0 %v6873_v13  ;;  %v2770_v0 = vsub.f32 1.0, %v2482_v27  ;;  %v441_v27 = vld [vmem:[%s4452_s28 + $0x120] sm:$0xff]  ;;  %v5040_v28 = vmax.f32 %v2767_v11, 0.0  ;;  %v5042_v8 = vmax.f32 %v2766_v53, 0.0  ;;  %v5044_v49 = vmax.f32 %v2768_v37, 0.0  ;;  %v442_v53 = vld [vmem:[%s4452_s28 + $0x128] sm:$0xff] }
  0xc9   : > { %1465 = vmatprep.mubr.f32.mxu1 %v6873_v13  ;;  %6883 = vst [vmem:[#allocation24_spill] sm:$0xff] %v5035_v24  ;;  %v5046_v5 = vmax.f32 %v2769_v34, 0.0  ;;  %v2773_v44 = vsub.f32 1.0, %v2485_v52  ;;  %v2491_v47 = vand.u32 2147483647, %v2203_v20  ;;  %v5049_v9 = vmax.f32 %v2771_v60, 0.0  ;;  %v5060_v20 = vpop.permute.xlu0 %1852 }
  0xca   : > { %6884 = vst [vmem:[#allocation25_spill] sm:$0xff] %v5040_v28  ;;  %6885 = vst [vmem:[#allocation26_spill] sm:$0xff] %v5042_v8  ;;  %v2490_v24 = vand.u32 2147483647, %v2202_v58  ;;  %v5051_v23 = vmax.f32 %v2770_v0, 0.0  ;;  %v2775_v11 = vsub.f32 1.0, %v2487_v33  ;;  %v2209_v52 = vsub.f32 %v1848_v3, %v4670_v38 }
  0xcb   : > { %4012 = vmatmul.mubr.msk.f32.gmra.mxu0 %vm477_vm0, %v440_v2  ;;  %6886 = vst [vmem:[#allocation27_spill] sm:$0xff] %v5044_v49  ;;  %6887 = vst [vmem:[#allocation28_spill] sm:$0xff] %v5046_v5  ;;  %v2774_v28 = vsub.f32 1.0, %v2486_v31  ;;  %v5056_v37 = vmax.f32 %v2772_v59, 0.0  ;;  %v2492_v34 = vand.u32 2147483647, %v2204_v25  ;;  %v2211_v31 = vsub.f32 %v1848_v3, %v4674_v39 }
  0xcc   : > { %4084 = vmatmul.mubr.msk.f32.gmra.mxu1 %vm477_vm0, %v440_v2  ;;  %974 = vmatprep.mubr.f32.mxu0 %v6873_v13  ;;  %v2489_v2 = vand.u32 2147483647, %v2201_v43  ;;  %6888 = vst [vmem:[#allocation29_spill] sm:$0xff] %v5049_v9  ;;  %6889 = vst [vmem:[#allocation30_spill] sm:$0xff] %v5051_v23  ;;  %v2776_v43 = vsub.f32 1.0, %v2488_v19  ;;  %v2210_v0 = vsub.f32 %v1848_v3, %v4678_v40  ;;  %v2779_v33 = vsub.f32 1.0, %v2491_v47 }
  0xcd   : > { %1471 = vmatprep.mubr.f32.mxu1 %v6873_v13  ;;  %6890 = vst [vmem:[#allocation31_spill] sm:$0xff] %v5056_v37  ;;  %v5062_v60 = vand.u32 2147483647, %v2205_v1  ;;  %v2212_v59 = vsub.f32 %v1848_v3, %v4685_v42  ;;  %v2213_v25 = vsub.f32 %v5060_v20, %v4670_v38  ;;  %v2495_v19 = vand.u32 2147483647, %v2207_v41 }
  0xce   : > { %v2777_v58 = vsub.f32 1.0, %v2489_v2  ;;  %v2494_v37 = vand.u32 2147483647, %v2206_v46  ;;  %v2215_v2 = vsub.f32 %v5060_v20, %v4674_v39  ;;  %v2214_v1 = vsub.f32 %v5060_v20, %v4678_v40 }
  0xcf   : > { %4013 = vmatmul.mubr.msk.f32.gmra.mxu0 %vm477_vm0, %v441_v27  ;;  %v5077_v47 = vmax.f32 %v2773_v44, 0.0  ;;  %v5079_v3 = vmax.f32 %v2775_v11, 0.0  ;;  %v2780_v23 = vsub.f32 1.0, %v2492_v34  ;;  %v2216_v41 = vsub.f32 %v5060_v20, %v4685_v42  ;;  %v1858_v34 = vpop.permute.xlu1 %1857 }
  0xd0   : > { %4085 = vmatmul.mubr.msk.f32.gmra.mxu1 %vm477_vm0, %v441_v27  ;;  %980 = vmatprep.mubr.f32.mxu0 %v6873_v13  ;;  %v2778_v27 = vsub.f32 1.0, %v2490_v24  ;;  %v443_v24 = vld [vmem:[%s4452_s28 + $0x130] sm:$0xff]  ;;  %v5084_v46 = vmax.f32 %v2774_v28, 0.0  ;;  %v5086_v9 = vmax.f32 %v2776_v43, 0.0  ;;  %v2496_v5 = vand.u32 2147483647, %v2208_v22 }
  0xd1   : > { %1477 = vmatprep.mubr.f32.mxu1 %v6873_v13  ;;  %6891 = vst [vmem:[#allocation32_spill] sm:$0xff] %v5077_v47  ;;  %6892 = vst [vmem:[#allocation33_spill] sm:$0xff] %v5079_v3  ;;  %v5088_v49 = vmax.f32 %v2777_v58, 0.0  ;;  %v2781_v44 = vsub.f32 1.0, %v5062_v60  ;;  %v2499_v47 = vand.u32 2147483647, %v2211_v31  ;;  %v2217_v60 = vsub.f32 %v1858_v34, %v4670_v38  ;;  %v5103_v31 = vpop.permute.xlu0 %1862 }
  0xd2   : > { %6893 = vst [vmem:[#allocation34_spill] sm:$0xff] %v5084_v46  ;;  %6894 = vst [vmem:[#allocation35_spill] sm:$0xff] %v5086_v9  ;;  %v2498_v11 = vand.u32 2147483647, %v2210_v0  ;;  %v5092_v3 = vmax.f32 %v2779_v33, 0.0  ;;  %v5094_v20 = vmax.f32 %v2778_v27, 0.0  ;;  %v2218_v27 = vsub.f32 %v1858_v34, %v4678_v40 }
  0xd3   : > { %4014 = vmatmul.mubr.msk.f32.gmra.mxu0 %vm477_vm0, %v442_v53  ;;  %6895 = vst [vmem:[#allocation36_spill] sm:$0xff] %v5088_v49  ;;  %v2783_v28 = vsub.f32 1.0, %v2495_v19  ;;  %v2782_v46 = vsub.f32 1.0, %v2494_v37  ;;  %v444_v22 = vld [vmem:[%s4452_s28 + $0x138] sm:$0xff]  ;;  %v5099_v43 = vmax.f32 %v2780_v23, 0.0  ;;  %v2784_v0 = vsub.f32 1.0, %v2496_v5 }
  0xd4   : > { %4086 = vmatmul.mubr.msk.f32.gmra.mxu1 %vm477_vm0, %v442_v53  ;;  %986 = vmatprep.mubr.f32.mxu0 %v6873_v13  ;;  %v2497_v53 = vand.u32 2147483647, %v2209_v52  ;;  %6896 = vst [vmem:[#allocation37_spill] sm:$0xff] %v5092_v3  ;;  %6897 = vst [vmem:[#allocation38_spill] sm:$0xff] %v5094_v20  ;;  %v2500_v52 = vand.u32 2147483647, %v2212_v59  ;;  %v2219_v37 = vsub.f32 %v1858_v34, %v4674_v39 }
  0xd5   : > { %1483 = vmatprep.mubr.f32.mxu1 %v6873_v13  ;;  %6898 = vst [vmem:[#allocation39_spill] sm:$0xff] %v5099_v43  ;;  %v2501_v58 = vand.u32 2147483647, %v2213_v25  ;;  %v2787_v19 = vsub.f32 1.0, %v2499_v47  ;;  %v2220_v23 = vsub.f32 %v1858_v34, %v4685_v42  ;;  %v2221_v59 = vsub.f32 %v5103_v31, %v4670_v38  ;;  %v445_v47 = vld [vmem:[%s4452_s28 + $0x140] sm:$0xff] }
  0xd6   : > { %v2785_v33 = vsub.f32 1.0, %v2497_v53  ;;  %v2503_v25 = vand.u32 2147483647, %v2215_v2  ;;  %v2502_v43 = vand.u32 2147483647, %v2214_v1  ;;  %v2223_v20 = vsub.f32 %v5103_v31, %v4674_v39 }
  0xd7   : > { %4015 = vmatmul.mubr.msk.f32.gmra.mxu0 %vm477_vm0, %v443_v24  ;;  %v2222_v5 = vsub.f32 %v5103_v31, %v4678_v40  ;;  %v2788_v53 = vsub.f32 1.0, %v2500_v52  ;;  %v2504_v34 = vand.u32 2147483647, %v2216_v41  ;;  %v2224_v3 = vsub.f32 %v5103_v31, %v4685_v42 }
  0xd8   : > { %4087 = vmatmul.mubr.msk.f32.gmra.mxu1 %vm477_vm0, %v443_v24  ;;  %992 = vmatprep.mubr.f32.mxu0 %v6873_v13  ;;  %v2786_v24 = vsub.f32 1.0, %v2498_v11  ;;  %v2789_v11 = vsub.f32 1.0, %v2501_v58  ;;  %v5121_v2 = vmax.f32 %v2781_v44, 0.0  ;;  %v5123_v1 = vmax.f32 %v2783_v28, 0.0  ;;  %v1868_v58 = vpop.permute.xlu1 %1867 }
  0xd9   : > { %1489 = vmatprep.mubr.f32.mxu1 %v6873_v13  ;;  %v5125_v49 = vmax.f32 %v2782_v46, 0.0  ;;  %v2505_v9 = vand.u32 2147483647, %v2217_v60  ;;  %v5129_v8 = vmax.f32 %v2785_v33, 0.0  ;;  %v5131_v52 = vmax.f32 %v2787_v19, 0.0  ;;  %v446_v46 = vld [vmem:[%s4452_s28 + $0x148] sm:$0xff] }
  0xda   : > { %6899 = vst [vmem:[#allocation40_spill] sm:$0xff] %v5121_v2  ;;  %6900 = vst [vmem:[#allocation41_spill] sm:$0xff] %v5123_v1  ;;  %v2507_v41 = vand.u32 2147483647, %v2219_v37  ;;  %v5134_v31 = vmax.f32 %v2786_v24, 0.0  ;;  %v2791_v44 = vsub.f32 1.0, %v2503_v25  ;;  %v2225_v33 = vsub.f32 %v1868_v58, %v4670_v38  ;;  %v5145_v37 = vpop.permute.xlu0 %1872 }
  0xdb   : > { %4016 = vmatmul.mubr.msk.f32.gmra.mxu0 %vm477_vm0, %v444_v22  ;;  %6901 = vst [vmem:[#allocation42_spill] sm:$0xff] %v5125_v49  ;;  %6903 = vst [vmem:[#allocation44_spill] sm:$0xff] %v5129_v8  ;;  %v2790_v2 = vsub.f32 1.0, %v2502_v43  ;;  %v2506_v56 = vand.u32 2147483647, %v2218_v27  ;;  %v5139_v28 = vmax.f32 %v2788_v53, 0.0  ;;  %v2227_v27 = vsub.f32 %v1868_v58, %v4674_v39 }
  0xdc   : > { %4088 = vmatmul.mubr.msk.f32.gmra.mxu1 %vm477_vm0, %v444_v22  ;;  %998 = vmatprep.mubr.f32.mxu0 %v6873_v13  ;;  %v5127_v22 = vmax.f32 %v2784_v0, 0.0  ;;  %6904 = vst [vmem:[#allocation45_spill] sm:$0xff] %v5131_v52  ;;  %6905 = vst [vmem:[#allocation46_spill] sm:$0xff] %v5134_v31  ;;  %v5141_v60 = vmax.f32 %v2789_v11, 0.0  ;;  %v2792_v0 = vsub.f32 1.0, %v2504_v34  ;;  %v2793_v19 = vsub.f32 1.0, %v2505_v9 }
  0xdd   : > { %1495 = vmatprep.mubr.f32.mxu1 %v6873_v13  ;;  %6906 = vst [vmem:[#allocation47_spill] sm:$0xff] %v5139_v28  ;;  %v5147_v43 = vand.u32 2147483647, %v2220_v23  ;;  %v2226_v24 = vsub.f32 %v1868_v58, %v4678_v40  ;;  %v2795_v25 = vsub.f32 1.0, %v2507_v41  ;;  %v2228_v53 = vsub.f32 %v1868_v58, %v4685_v42 }
  0xde   : > { %6902 = vst [vmem:[#allocation43_spill] sm:$0xff] %v5127_v22  ;;  %6907 = vst [vmem:[#allocation48_spill] sm:$0xff] %v5141_v60  ;;  %v2229_v11 = vsub.f32 %v5145_v37, %v4670_v38  ;;  %v2794_v34 = vsub.f32 1.0, %v2506_v56  ;;  %v2511_v60 = vand.u32 2147483647, %v2223_v20  ;;  %v2231_v9 = vsub.f32 %v5145_v37, %v4674_v39 }
  0xdf   : > { %4017 = vmatmul.mubr.msk.f32.gmra.mxu0 %vm477_vm0, %v445_v47  ;;  %v2230_v23 = vsub.f32 %v5145_v37, %v4678_v40  ;;  %v5162_v41 = vmax.f32 %v2791_v44, 0.0  ;;  %v5164_v58 = vmax.f32 %v2790_v2, 0.0  ;;  %v2510_v28 = vand.u32 2147483647, %v2222_v5  ;;  %v1878_v5 = vpop.permute.xlu1 %1877 }
  0xe0   : > { %4089 = vmatmul.mubr.msk.f32.gmra.mxu1 %vm477_vm0, %v445_v47  ;;  %1004 = vmatprep.mubr.f32.mxu0 %v6873_v13  ;;  %v2509_v47 = vand.u32 2147483647, %v2221_v59  ;;  %v447_v59 = vld [vmem:[%s4452_s28 + $0x150] sm:$0xff]  ;;  %v2232_v56 = vsub.f32 %v5145_v37, %v4685_v42  ;;  %v5169_v20 = vmax.f32 %v2792_v0, 0.0  ;;  %v5171_v31 = vmax.f32 %v2793_v19, 0.0 }
  0xe1   : > { %1501 = vmatprep.mubr.f32.mxu1 %v6873_v13  ;;  %6908 = vst [vmem:[#allocation49_spill] sm:$0xff] %v5162_v41  ;;  %6909 = vst [vmem:[#allocation50_spill] sm:$0xff] %v5164_v58  ;;  %v2512_v52 = vand.u32 2147483647, %v2224_v3  ;;  %v2796_v8 = vsub.f32 1.0, %v5147_v43  ;;  %v5175_v2 = vmax.f32 %v2795_v25, 0.0 }
  0xe2   : > { %6910 = vst [vmem:[#allocation51_spill] sm:$0xff] %v5169_v20  ;;  %6911 = vst [vmem:[#allocation52_spill] sm:$0xff] %v5171_v31  ;;  %v2797_v22 = vsub.f32 1.0, %v2509_v47  ;;  %v2515_v44 = vand.u32 2147483647, %v2227_v27  ;;  %v5177_v37 = vmax.f32 %v2794_v34, 0.0  ;;  %v2233_v27 = vsub.f32 %v1878_v5, %v4670_v38 }
  0xe3   : > { %4018 = vmatmul.mubr.msk.f32.gmra.mxu0 %vm477_vm0, %v446_v46  ;;  %v2514_v41 = vand.u32 2147483647, %v2226_v24  ;;  %6912 = vst [vmem:[#allocation53_spill] sm:$0xff] %v5175_v2  ;;  %v2799_v58 = vsub.f32 1.0, %v2511_v60  ;;  %v2516_v0 = vand.u32 2147483647, %v2228_v53  ;;  %v5184_v24 = vpop.permute.xlu0 %1882  ;;  %v2235_v60 = vsub.f32 %v1878_v5, %v4674_v39 }
  0xe4   : > { %4090 = vmatmul.mubr.msk.f32.gmra.mxu1 %vm477_vm0, %v446_v46  ;;  %1010 = vmatprep.mubr.f32.mxu0 %v6873_v13  ;;  %v2513_v46 = vand.u32 2147483647, %v2225_v33  ;;  %6913 = vst [vmem:[#allocation54_spill] sm:$0xff] %v5177_v37  ;;  %v448_v3 = vld [vmem:[%s4452_s28 + $0x158] sm:$0xff]  ;;  %v2798_v33 = vsub.f32 1.0, %v2510_v28  ;;  %v2800_v25 = vsub.f32 1.0, %v2512_v52  ;;  %v2234_v53 = vsub.f32 %v1878_v5, %v4678_v40 }
  0xe5   : > { %1507 = vmatprep.mubr.f32.mxu1 %v6873_v13  ;;  %v2517_v19 = vand.u32 2147483647, %v2229_v11  ;;  %v2519_v43 = vand.u32 2147483647, %v2231_v9  ;;  %v2803_v34 = vsub.f32 1.0, %v2515_v44  ;;  %v2236_v37 = vsub.f32 %v1878_v5, %v4685_v42 }
  0xe6   : > { %v2801_v47 = vsub.f32 1.0, %v2513_v46  ;;  %v2237_v28 = vsub.f32 %v5184_v24, %v4670_v38  ;;  %v2804_v11 = vsub.f32 1.0, %v2516_v0  ;;  %v2518_v9 = vand.u32 2147483647, %v2230_v23 }
  0xe7   : > { %4019 = vmatmul.mubr.msk.f32.gmra.mxu0 %vm477_vm0, %v447_v59  ;;  %v2239_v2 = vsub.f32 %v5184_v24, %v4674_v39  ;;  %v2238_v52 = vsub.f32 %v5184_v24, %v4678_v40  ;;  %v2805_v46 = vsub.f32 1.0, %v2517_v19  ;;  %v2807_v44 = vsub.f32 1.0, %v2519_v43  ;;  %v1888_v43 = vpop.permute.xlu1 %1887 }
  0xe8   : > { %4091 = vmatmul.mubr.msk.f32.gmra.mxu1 %vm477_vm0, %v447_v59  ;;  %1016 = vmatprep.mubr.f32.mxu0 %v6873_v13  ;;  %v2802_v59 = vsub.f32 1.0, %v2514_v41  ;;  %v449_v41 = vld [vmem:[%s4452_s28 + $0x160] sm:$0xff]  ;;  %v2520_v5 = vand.u32 2147483647, %v2232_v56  ;;  %v2240_v31 = vsub.f32 %v5184_v24, %v4685_v42  ;;  %v5202_v23 = vmax.f32 %v2796_v8, 0.0 }
  0xe9   : > { %1513 = vmatprep.mubr.f32.mxu1 %v6873_v13  ;;  %v5204_v0 = vmax.f32 %v2797_v22, 0.0  ;;  %v5206_v20 = vmax.f32 %v2799_v58, 0.0  ;;  %v2521_v49 = vand.u32 2147483647, %v2233_v27  ;;  %v5210_v1 = vmax.f32 %v2800_v25, 0.0  ;;  %v450_v58 = vld [vmem:[%s4452_s28 + $0x168] sm:$0xff] }
  0xea   : > { %6914 = vst [vmem:[#allocation55_spill] sm:$0xff] %v5202_v23  ;;  %v5212_v19 = vmax.f32 %v2801_v47, 0.0  ;;  %v5214_v56 = vmax.f32 %v2803_v34, 0.0  ;;  %v5217_v24 = vmax.f32 %v2802_v59, 0.0  ;;  %v5219_v8 = vmax.f32 %v2804_v11, 0.0  ;;  %v5230_v34 = vpop.permute.xlu0 %1892 }
  0xeb   : > { %4020 = vmatmul.mubr.msk.f32.gmra.mxu0 %vm477_vm0, %v448_v3  ;;  %6915 = vst [vmem:[#allocation56_spill] sm:$0xff] %v5204_v0  ;;  %6916 = vst [vmem:[#allocation57_spill] sm:$0xff] %v5206_v20  ;;  %v2806_v22 = vsub.f32 1.0, %v2518_v9  ;;  %v2523_v0 = vand.u32 2147483647, %v2235_v60  ;;  %v5226_v27 = vmax.f32 %v2807_v44, 0.0  ;;  %v2241_v47 = vsub.f32 %v1888_v43, %v4670_v38 }
  0xec   : > { %4092 = vmatmul.mubr.msk.f32.gmra.mxu1 %vm477_vm0, %v448_v3  ;;  %1022 = vmatprep.mubr.f32.mxu0 %v6873_v13  ;;  %v5208_v3 = vmax.f32 %v2798_v33, 0.0  ;;  %6918 = vst [vmem:[#allocation59_spill] sm:$0xff] %v5210_v1  ;;  %6919 = vst [vmem:[#allocation60_spill] sm:$0xff] %v5212_v19  ;;  %v5224_v33 = vmax.f32 %v2805_v46, 0.0  ;;  %v2808_v25 = vsub.f32 1.0, %v2520_v5  ;;  %v2809_v59 = vsub.f32 1.0, %v2521_v49 }
  0xed   : > { %1519 = vmatprep.mubr.f32.mxu1 %v6873_v13  ;;  %6920 = vst [vmem:[#allocation61_spill] sm:$0xff] %v5214_v56  ;;  %6921 = vst [vmem:[#allocation62_spill] sm:$0xff] %v5217_v24  ;;  %v2522_v11 = vand.u32 2147483647, %v2234_v53  ;;  %v2243_v60 = vsub.f32 %v1888_v43, %v4674_v39  ;;  %v2242_v9 = vsub.f32 %v1888_v43, %v4678_v40  ;;  %v2811_v5 = vsub.f32 1.0, %v2523_v0 }
  0xee   : > { %6917 = vst [vmem:[#allocation58_spill] sm:$0xff] %v5208_v3  ;;  %6922 = vst [vmem:[#allocation63_spill] sm:$0xff] %v5219_v8  ;;  %v2525_v8 = vand.u32 2147483647, %v2237_v28  ;;  %v2244_v46 = vsub.f32 %v1888_v43, %v4685_v42  ;;  %v2245_v44 = vsub.f32 %v5230_v34, %v4670_v38  ;;  %v2246_v49 = vsub.f32 %v5230_v34, %v4678_v40 }
  0xef   : > { %4021 = vmatmul.mubr.msk.f32.gmra.mxu0 %vm477_vm0, %v449_v41  ;;  %6923 = vst [vmem:[#allocation64_spill] sm:$0xff] %v5224_v33  ;;  %6924 = vst [vmem:[#allocation65_spill] sm:$0xff] %v5226_v27  ;;  %v2527_v27 = vand.u32 2147483647, %v2239_v2  ;;  %v2247_v33 = vsub.f32 %v5230_v34, %v4674_v39  ;;  %v5245_v53 = vmax.f32 %v2806_v22, 0.0  ;;  %v2248_v24 = vsub.f32 %v5230_v34, %v4685_v42 }
  0xf0   : > { %4093 = vmatmul.mubr.msk.f32.gmra.mxu1 %vm477_vm0, %v449_v41  ;;  %1028 = vmatprep.mubr.f32.mxu0 %v6873_v13  ;;  %v2524_v41 = vand.u32 2147483647, %v2236_v37  ;;  %v451_v37 = vld [vmem:[%s4452_s28 + $0x170] sm:$0xff]  ;;  %v2526_v28 = vand.u32 2147483647, %v2238_v52  ;;  %v5250_v2 = vmax.f32 %v2808_v25, 0.0  ;;  %v5255_v52 = vpop.permute.xlu1 %1897 }
  0xf1   : > { %1525 = vmatprep.mubr.f32.mxu1 %v6873_v13  ;;  %6925 = vst [vmem:[#allocation66_spill] sm:$0xff] %v5245_v53  ;;  %v2528_v43 = vand.u32 2147483647, %v2240_v31  ;;  %v5252_v0 = vmax.f32 %v2809_v59, 0.0  ;;  %v2810_v56 = vsub.f32 1.0, %v2522_v11  ;;  %v2813_v1 = vsub.f32 1.0, %v2525_v8 }
  0xf2   : > { %6926 = vst [vmem:[#allocation67_spill] sm:$0xff] %v5250_v2  ;;  %v2529_v19 = vand.u32 2147483647, %v2241_v47  ;;  %v2531_v3 = vand.u32 2147483647, %v2243_v60  ;;  %v5257_v31 = vmax.f32 %v2811_v5, 0.0  ;;  %v2249_v8 = vsub.f32 %v5255_v52, %v4670_v38  ;;  %v5265_v60 = vpop.permute.xlu0 %1902 }
  0xf3   : > { %4022 = vmatmul.mubr.msk.f32.gmra.mxu0 %vm477_vm0, %v450_v58  ;;  %6927 = vst [vmem:[#allocation68_spill] sm:$0xff] %v5252_v0  ;;  %v2530_v20 = vand.u32 2147483647, %v2242_v9  ;;  %v2815_v22 = vsub.f32 1.0, %v2527_v27  ;;  %v2532_v34 = vand.u32 2147483647, %v2244_v46  ;;  %v2250_v46 = vsub.f32 %v5255_v52, %v4678_v40 }
  0xf4   : > { %4094 = vmatmul.mubr.msk.f32.gmra.mxu1 %vm477_vm0, %v450_v58  ;;  %1034 = vmatprep.mubr.f32.mxu0 %v6873_v13  ;;  %v2812_v58 = vsub.f32 1.0, %v2524_v41  ;;  %6928 = vst [vmem:[#allocation69_spill] sm:$0xff] %v5257_v31  ;;  %v2533_v53 = vand.u32 2147483647, %v2245_v44  ;;  %v452_v25 = vld [vmem:[%s4452_s28 + $0x178] sm:$0xff]  ;;  %v2814_v59 = vsub.f32 1.0, %v2526_v28  ;;  %v2251_v41 = vsub.f32 %v5255_v52, %v4674_v39 }
  0xf5   : > { %1531 = vmatprep.mubr.f32.mxu1 %v6873_v13  ;;  %v2816_v47 = vsub.f32 1.0, %v2528_v43  ;;  %v2535_v11 = vand.u32 2147483647, %v2247_v33  ;;  %v2817_v9 = vsub.f32 1.0, %v2529_v19  ;;  %v2534_v27 = vand.u32 2147483647, %v2246_v49 }
  0xf6   : > { %v2819_v44 = vsub.f32 1.0, %v2531_v3  ;;  %v2818_v5 = vsub.f32 1.0, %v2530_v20  ;;  %v2252_v33 = vsub.f32 %v5255_v52, %v4685_v42  ;;  %v2820_v28 = vsub.f32 1.0, %v2532_v34  ;;  %v453_v20 = vld [vmem:[%s4452_s28 + $0x180] sm:$0xff] }
  0xf7   : > { %4023 = vmatmul.mubr.msk.f32.gmra.mxu0 %vm477_vm0, %v451_v37  ;;  %v2821_v43 = vsub.f32 1.0, %v2533_v53  ;;  %v2255_v19 = vsub.f32 %v5265_v60, %v4674_v39  ;;  %v2254_v49 = vsub.f32 %v5265_v60, %v4678_v40  ;;  %v5283_v3 = vmax.f32 %v2810_v56, 0.0 }
  0xf8   : > { %4095 = vmatmul.mubr.msk.f32.gmra.mxu1 %vm477_vm0, %v451_v37  ;;  %1040 = vmatprep.mubr.f32.mxu0 %v6873_v13  ;;  %v2253_v37 = vsub.f32 %v5265_v60, %v4670_v38  ;;  %v2823_v52 = vsub.f32 1.0, %v2535_v11  ;;  %v2536_v31 = vand.u32 2147483647, %v2248_v24  ;;  %v2256_v0 = vsub.f32 %v5265_v60, %v4685_v42 }
  0xf9   : > { %1537 = vmatprep.mubr.f32.mxu1 %v6873_v13  ;;  %v5288_v53 = vmax.f32 %v2812_v58, 0.0  ;;  %v5290_v34 = vmax.f32 %v2813_v1, 0.0  ;;  %v5292_v2 = vmax.f32 %v2815_v22, 0.0  ;;  %v5294_v23 = vmax.f32 %v2814_v59, 0.0 }
  0xfa   : > { %v5296_v55 = vmax.f32 %v2816_v47, 0.0  ;;  %v5298_v56 = vmax.f32 %v2817_v9, 0.0  ;;  %v2537_v24 = vand.u32 2147483647, %v2249_v8  ;;  %v5301_v60 = vmax.f32 %v2819_v44, 0.0  ;;  %v454_v47 = vld [vmem:[%s4452_s28 + $0x188] sm:$0xff]  ;;  %v5313_v8 = vpop.permute.xlu1 %1907 }
  0xfb   : > { %4024 = vmatmul.mubr.msk.f32.gmra.mxu0 %vm477_vm0, %v452_v25  ;;  %v5303_v58 = vmax.f32 %v2818_v5, 0.0  ;;  %v5305_v1 = vmax.f32 %v2820_v28, 0.0  ;;  %v5307_v22 = vmax.f32 %v2821_v43, 0.0  ;;  %v5315_v9 = vmax.f32 %v2823_v52, 0.0  ;;  %v5326_v52 = vpop.permute.xlu0 %1912 }
  0xfc   : > { %4096 = vmatmul.mubr.msk.f32.gmra.mxu1 %vm477_vm0, %v452_v25  ;;  %1046 = vmatprep.mubr.f32.mxu0 %v6873_v13  ;;  %v2822_v25 = vsub.f32 1.0, %v2534_v27  ;;  %6929 = vst [vmem:[#allocation70_spill] sm:$0xff] %v5301_v60  ;;  %v2824_v44 = vsub.f32 1.0, %v2536_v31  ;;  %v2539_v60 = vand.u32 2147483647, %v2251_v41  ;;  %v2825_v31 = vsub.f32 1.0, %v2537_v24 }
  0xfd   : > { %1543 = vmatprep.mubr.f32.mxu1 %v6873_v13  ;;  %6930 = vst [vmem:[#allocation71_spill] sm:$0xff] %v5303_v58  ;;  %6931 = vst [vmem:[#allocation72_spill] sm:$0xff] %v5305_v1  ;;  %v455_v41 = vld [vmem:[%s4452_s28 + $0x190] sm:$0xff] }
  0xfe   : > { %6932 = vst [vmem:[#allocation73_spill] sm:$0xff] %v5307_v22  ;;  %6933 = vst [vmem:[#allocation74_spill] sm:$0xff] %v5315_v9  ;;  %v5319_v43 = vmax.f32 %v2822_v25, 0.0 }
  0xff   : > { %v760_v11 = vpop.f32.mrf.mxu0  ;;  %4025 = vmatmul.mubr.msk.f32.gmra.mxu0 %vm477_vm0, %v453_v20 }
 0x100   : > { %v3293_v27 = vmul.f32 %v4774_v36, %v760_v11  ;;  %v1257_v59 = vpop.f32.mrf.mxu1  ;;  %4097 = vmatmul.mubr.msk.f32.gmra.mxu1 %vm477_vm0, %v453_v20  ;;  %1052 = vmatprep.mubr.f32.mxu0 %v6873_v13  ;;  %6934 = vst [vmem:[#allocation75_spill] sm:$0xff] %v5319_v43  ;;  %v5321_v36 = vand.u32 2147483647, %v2250_v46  ;;  %v2257_v20 = vsub.f32 %v5313_v8, %v4670_v38 }
 0x101   : > { %v3295_v5 = vmul.f32 %v4782_v7, %v1257_v59  ;;  %v762_v28 = vpop.f32.mrf.mxu0  ;;  %1549 = vmatprep.mubr.f32.mxu1 %v6873_v13  ;;  %v2540_v59 = vand.u32 2147483647, %v2252_v33  ;;  %v2827_v7 = vsub.f32 1.0, %v2539_v60 }
 0x102   : > { %v3294_v11 = vmul.f32 %v4784_v12, %v762_v28  ;;  %v1259_v22 = vpop.f32.mrf.mxu1  ;;  %v5346_v12 = vmax.f32 %v2824_v44, 0.0  ;;  %v2543_v28 = vand.u32 2147483647, %v2255_v19  ;;  %v2826_v60 = vsub.f32 1.0, %v5321_v36 }
 0x103   : > { %v3296_v25 = vmul.f32 %v4786_v4, %v1259_v22  ;;  %v766_v46 = vpop.f32.mrf.mxu0  ;;  %4026 = vmatmul.mubr.msk.f32.gmra.mxu0 %vm477_vm0, %v454_v47  ;;  %v2541_v4 = vand.u32 2147483647, %v2253_v37  ;;  %v2544_v37 = vand.u32 2147483647, %v2256_v0  ;;  %v2828_v44 = vsub.f32 1.0, %v2540_v59  ;;  %v5367_v59 = vpop.permute.xlu1 %1917 }
 0x104   : > { %v3297_v24 = vmul.f32 %v4795_v48, %v766_v46  ;;  %v1263_v43 = vpop.f32.mrf.mxu1  ;;  %4098 = vmatmul.mubr.msk.f32.gmra.mxu1 %vm477_vm0, %v454_v47  ;;  %1058 = vmatprep.mubr.f32.mxu0 %v6873_v13  ;;  %v2542_v48 = vand.u32 2147483647, %v2254_v49  ;;  %v5362_v0 = vmax.f32 %v2827_v7, 0.0  ;;  %v2831_v36 = vsub.f32 1.0, %v2543_v28 }
 0x105   : > { %v3299_v33 = vmul.f32 %v4807_v32, %v1263_v43  ;;  %v768_v9 = vpop.f32.mrf.mxu0  ;;  %1555 = vmatprep.mubr.f32.mxu1 %v6873_v13  ;;  %v5354_v43 = vmax.f32 %v2825_v31, 0.0  ;;  %v2262_v7 = vsub.f32 %v5326_v52, %v4678_v40  ;;  %v5375_v28 = vand.u32 2147483647, %v2257_v20 }
 0x106   : > { %v3301_v46 = vadd.f32 %v3297_v24, %v3293_v27  ;;  %v3298_v47 = vmul.f32 %v4834_v10, %v768_v9  ;;  %v1265_v1 = vpop.f32.mrf.mxu1  ;;  %v456_v10 = vld [vmem:[%s4452_s28 + $0x198] sm:$0xff]  ;;  %v2829_v9 = vsub.f32 1.0, %v2541_v4  ;;  %v2267_v4 = vsub.f32 %v5367_v59, %v4674_v39 }
 0x107   : > { %v5350_v58 = vadd.f32 %v3299_v33, %v3295_v5  ;;  %v3300_v22 = vmul.f32 %v4839_v14, %v1265_v1  ;;  %v772_v32 = vpop.f32.mrf.mxu0  ;;  %4027 = vmatmul.mubr.msk.f32.gmra.mxu0 %vm477_vm0, %v455_v41 }
 0x108   : > { %v5356_v19 = vadd.f32 %v3298_v47, %v3294_v11  ;;  %v3305_v49 = vmul.f32 %v4792_v45, %v772_v32  ;;  %v1269_v27 = vpop.f32.mrf.mxu1  ;;  %4099 = vmatmul.mubr.msk.f32.gmra.mxu1 %vm477_vm0, %v455_v41  ;;  %1064 = vmatprep.mubr.f32.mxu0 %v6873_v13  ;;  %v2830_v11 = vsub.f32 1.0, %v2542_v48  ;;  %v2832_v41 = vsub.f32 1.0, %v2544_v37  ;;  %v457_v48 = vld [vmem:[%s4452_s28 + $0x1a0] sm:$0xff] }
 0x109   : > { %v3304_v14 = vadd.f32 %v3300_v22, %v3296_v25  ;;  %v3307_v1 = vmul.f32 %v4798_v50, %v1269_v27  ;;  %v774_v5 = vpop.f32.mrf.mxu0  ;;  %1561 = vmatprep.mubr.f32.mxu1 %v6873_v13  ;;  %v2264_v25 = vsub.f32 %v5326_v52, %v4685_v42  ;;  %v5387_v47 = vmax.f32 %v2828_v44, 0.0 }
 0x10a   : > { %v3306_v31 = vmul.f32 %v4841_v15, %v774_v5  ;;  %v1271_v45 = vpop.f32.mrf.mxu1  ;;  %v2265_v15 = vsub.f32 %v5367_v59, %v4670_v38  ;;  %v5389_v20 = vmax.f32 %v2829_v9, 0.0  ;;  %v5393_v27 = vmax.f32 %v2831_v36, 0.0 }
 0x10b   : > { %v3308_v50 = vmul.f32 %v4843_v16, %v1271_v45  ;;  %v778_v24 = vpop.f32.mrf.mxu0  ;;  %4028 = vmatmul.mubr.msk.f32.gmra.mxu0 %vm477_vm0, %v456_v10  ;;  %v5385_v16 = vmax.f32 %v2826_v60, 0.0  ;;  %v5400_v45 = vmax.f32 %v2832_v41, 0.0 }
 0x10c   : > { %v3309_v22 = vmul.f32 %v4845_v18, %v778_v24  ;;  %v1275_v33 = vpop.f32.mrf.mxu1  ;;  %4100 = vmatmul.mubr.msk.f32.gmra.mxu1 %vm477_vm0, %v456_v10  ;;  %1070 = vmatprep.mubr.f32.mxu0 %v6873_v13  ;;  %v5395_v18 = vmax.f32 %v2830_v11, 0.0  ;;  %v2833_v11 = vsub.f32 1.0, %v5375_v28 }
 0x10d   : > { %v3311_v37 = vmul.f32 %v4849_v21, %v1275_v33  ;;  %v780_v32 = vpop.f32.mrf.mxu0  ;;  %1567 = vmatprep.mubr.f32.mxu1 %v6873_v13  ;;  %v6935_v21 = vsub.f32 %v5313_v8, %v4674_v39 }
 0x10e   : > { %v3313_v5 = vadd.f32 %v3309_v22, %v3305_v49  ;;  %v3310_v60 = vmul.f32 %v4851_v29, %v780_v32  ;;  %v1277_v44 = vpop.f32.mrf.mxu1  ;;  %v6936_v49 = vsub.f32 %v5313_v8, %v4678_v40 }
 0x10f   : > { %v2547_v9 = vand.u32 2147483647, %v6935_v21  ;;  %v3315_v24 = vadd.f32 %v3311_v37, %v3307_v1  ;;  %v3312_v36 = vmul.f32 %v4856_v35, %v1277_v44  ;;  %v784_v33 = vpop.f32.mrf.mxu0  ;;  %4029 = vmatmul.mubr.msk.f32.gmra.mxu0 %vm477_vm0, %v457_v48  ;;  %v458_v35 = vld [vmem:[%s4452_s28 + $0x1a8] sm:$0xff]  ;;  %v6937_v1 = vsub.f32 %v5313_v8, %v4685_v42 }
 0x110   : > { %v5411_v29 = vand.u32 2147483647, %v6936_v49  ;;  %v5413_v22 = vadd.f32 %v3313_v5, %v3301_v46  ;;  %v3314_v41 = vadd.f32 %v3310_v60, %v3306_v31  ;;  %v3317_v32 = vmul.f32 %v4875_v57, %v784_v33  ;;  %v1281_v10 = vpop.f32.mrf.mxu1  ;;  %4101 = vmatmul.mubr.msk.f32.gmra.mxu1 %vm477_vm0, %v457_v48  ;;  %1076 = vmatprep.mubr.f32.mxu0 %v6873_v13 }
 0x111   : > { %v2548_v28 = vand.u32 2147483647, %v6937_v1  ;;  %v5423_v37 = vadd.f32 %v3315_v24, %v5350_v58  ;;  %v3316_v44 = vadd.f32 %v3312_v36, %v3308_v50  ;;  %v3319_v46 = vmul.f32 %v4880_v61, %v1281_v10  ;;  %v786_v5 = vpop.f32.mrf.mxu0  ;;  %1573 = vmatprep.mubr.f32.mxu1 %v6873_v13 }
 0x112   : > { %v6938_v57 = vsub.f32 %v5326_v52, %v4670_v38  ;;  %v5431_v48 = vadd.f32 %v3314_v41, %v5356_v19  ;;  %v3318_v8 = vmul.f32 %v4882_v62, %v786_v5  ;;  %v1283_v60 = vpop.f32.mrf.mxu1  ;;  %v2835_v21 = vsub.f32 1.0, %v2547_v9 }
 0x113   : > { %v6939_v58 = vsub.f32 %v5326_v52, %v4674_v39  ;;  %v5437_v61 = vadd.f32 %v3316_v44, %v3304_v14  ;;  %v3320_v10 = vmul.f32 %v4884_v63, %v1283_v60  ;;  %v790_v24 = vpop.f32.mrf.mxu0  ;;  %4030 = vmatmul.mubr.msk.f32.gmra.mxu0 %vm477_vm0, %v458_v35  ;;  %v2550_v36 = vand.u32 2147483647, %v2262_v7  ;;  %v459_v52 = vld [vmem:[%s4452_s28 + $0x1b0] sm:$0xff] }
 0x114   : > { %v2549_v31 = vand.u32 2147483647, %v6938_v57  ;;  %v2268_v19 = vsub.f32 %v5367_v59, %v4685_v42  ;;  %v3321_v33 = vmul.f32 %v4886_v26, %v790_v24  ;;  %v1287_v62 = vpop.f32.mrf.mxu1  ;;  %4102 = vmatmul.mubr.msk.f32.gmra.mxu1 %vm477_vm0, %v458_v35  ;;  %1082 = vmatprep.mubr.f32.mxu0 %v6873_v13  ;;  %v2834_v14 = vsub.f32 1.0, %v5411_v29 }
 0x115   : > { %v2551_v50 = vand.u32 2147483647, %v6939_v58  ;;  %v2552_v9 = vand.u32 2147483647, %v2264_v25  ;;  %v2553_v49 = vand.u32 2147483647, %v2265_v15  ;;  %v3323_v63 = vmul.f32 %v4889_v6, %v1287_v62  ;;  %v792_v41 = vpop.f32.mrf.mxu0  ;;  %1579 = vmatprep.mubr.f32.mxu1 %v6873_v13 }
 0x116   : > { %v5450_v7 = vmax.f32 %v2833_v11, 0.0  ;;  %v2836_v1 = vsub.f32 1.0, %v2548_v28  ;;  %v2555_v26 = vand.u32 2147483647, %v2267_v4  ;;  %v5455_v35 = vadd.f32 %v3321_v33, %v3317_v32  ;;  %v1289_v29 = vpop.f32.mrf.mxu1 }
 0x117   : > { %v3322_v44 = vmul.f32 %v4891_v30, %v792_v41  ;;  %v5458_v25 = vmax.f32 %v2835_v21, 0.0  ;;  %v2837_v15 = vsub.f32 1.0, %v2549_v31  ;;  %v5460_v6 = vadd.f32 %v3323_v63, %v3319_v46  ;;  %v796_v11 = vpop.f32.mrf.mxu0  ;;  %4031 = vmatmul.mubr.msk.f32.gmra.mxu0 %vm477_vm0, %v459_v52  ;;  %v460_v30 = vld [vmem:[%s4452_s28 + $0x1b8] sm:$0xff] }
 0x118   : > { %v3324_v5 = vmul.f32 %v4896_v17, %v1289_v29  ;;  %v2839_v28 = vsub.f32 1.0, %v2551_v50  ;;  %v2838_v57 = vsub.f32 1.0, %v2550_v36  ;;  %v3329_v4 = vmul.f32 %v4915_v51, %v796_v11  ;;  %v1293_v32 = vpop.f32.mrf.mxu1  ;;  %4103 = vmatmul.mubr.msk.f32.gmra.mxu1 %vm477_vm0, %v459_v52  ;;  %1088 = vmatprep.mubr.f32.mxu0 %v6873_v13  ;;  %v5474_v50 = vpop.permute.xlu0 %1922  ;;  %v6942_v36 = vld [vmem:[#allocation2_spill] sm:$0xff]  ;;  %v6949_v29 = vld [vmem:[#allocation4_spill] sm:$0xff] }
 0x119   : > { %6940 = vst [vmem:[#allocation76_spill] sm:$0xff] %v5458_v25  ;;  %v5464_v60 = vadd.f32 %v3322_v44, %v3318_v8  ;;  %v2840_v31 = vsub.f32 1.0, %v2552_v9  ;;  %v2841_v46 = vsub.f32 1.0, %v2553_v49  ;;  %v3331_v17 = vmul.f32 %v4920_v54, %v1293_v32  ;;  %v798_v58 = vpop.f32.mrf.mxu0  ;;  %1585 = vmatprep.mubr.f32.mxu1 %v6873_v13  ;;  %v6945_v9 = vld [vmem:[#allocation3_spill] sm:$0xff] }
 0x11a   : > { %v5470_v21 = vadd.f32 %v3324_v5, %v3320_v10  ;;  %v2843_v8 = vsub.f32 1.0, %v2555_v26  ;;  %v6941_v51 = vsub.f32 %v5367_v59, %v4678_v40  ;;  %v3330_v33 = vmul.f32 %v6942_v36, %v798_v58  ;;  %v1295_v62 = vpop.f32.mrf.mxu1  ;;  %v6952_v58 = vld [vmem:[#allocation5_spill] sm:$0xff] }
 0x11b   : > { %v5482_v52 = vmax.f32 %v2834_v14, 0.0  ;;  %v5484_v10 = vmax.f32 %v2836_v1, 0.0  ;;  %v2269_v54 = vsub.f32 %v5474_v50, %v4670_v38  ;;  %v3332_v49 = vmul.f32 %v6945_v9, %v1295_v62  ;;  %v802_v63 = vpop.f32.mrf.mxu0  ;;  %4032 = vmatmul.mubr.msk.f32.gmra.mxu0 %vm477_vm0, %v460_v30  ;;  %v461_v1 = vld [vmem:[%s4452_s28 + $0x1c0] sm:$0xff] }
 0x11c   : > { %v5479_v24 = vand.u32 2147483647, %v6941_v51  ;;  %v5490_v41 = vmax.f32 %v2837_v15, 0.0  ;;  %v5492_v26 = vmax.f32 %v2839_v28, 0.0  ;;  %v5494_v44 = vmax.f32 %v2838_v57, 0.0  ;;  %v1299_v14 = vpop.f32.mrf.mxu1  ;;  %4104 = vmatmul.mubr.msk.f32.gmra.mxu1 %vm477_vm0, %v460_v30  ;;  %1094 = vmatprep.mubr.f32.mxu0 %v6873_v13 }
 0x11d   : > { %6943 = vst [vmem:[#allocation2_spill] sm:$0xff] %v5482_v52  ;;  %6944 = vst [vmem:[#allocation77_spill] sm:$0xff] %v5484_v10  ;;  %v3333_v5 = vmul.f32 %v6949_v29, %v802_v63  ;;  %v5500_v11 = vmax.f32 %v2840_v31, 0.0  ;;  %v5502_v32 = vmax.f32 %v2841_v46, 0.0  ;;  %v2271_v15 = vsub.f32 %v5474_v50, %v4674_v39  ;;  %v804_v51 = vpop.f32.mrf.mxu0  ;;  %1591 = vmatprep.mubr.f32.mxu1 %v6873_v13  ;;  %v6954_v46 = vld [vmem:[#allocation6_spill] sm:$0xff]  ;;  %v5517_v63 = vpop.permute.xlu1 %1927 }
 0x11e   : > { %6946 = vst [vmem:[#allocation3_spill] sm:$0xff] %v5490_v41  ;;  %6947 = vst [vmem:[#allocation78_spill] sm:$0xff] %v5492_v26  ;;  %v3335_v28 = vmul.f32 %v6952_v58, %v1299_v14  ;;  %v5508_v57 = vmax.f32 %v2843_v8, 0.0  ;;  %v5514_v30 = vand.u32 2147483647, %v2268_v19  ;;  %v3334_v62 = vmul.f32 %v6954_v46, %v804_v51  ;;  %v1301_v9 = vpop.f32.mrf.mxu1  ;;  %v6955_v58 = vld [vmem:[#allocation7_spill] sm:$0xff] }
 0x11f   : > { %6948 = vst [vmem:[#allocation79_spill] sm:$0xff] %v5494_v44  ;;  %6950 = vst [vmem:[#allocation4_spill] sm:$0xff] %v5500_v11  ;;  %v3337_v31 = vadd.f32 %v3333_v5, %v3329_v4  ;;  %v5519_v29 = vand.u32 2147483647, %v2269_v54  ;;  %v2270_v8 = vsub.f32 %v5474_v50, %v4678_v40  ;;  %v3336_v36 = vmul.f32 %v6955_v58, %v1301_v9  ;;  %v6956_v54 = vld [vmem:[#allocation8_spill] sm:$0xff]  ;;  %v469_v52 = vld [vmem:[%s4452_s28 + $0x200] sm:$0xff] }
 0x120   : > { %6951 = vst [vmem:[#allocation80_spill] sm:$0xff] %v5502_v32  ;;  %6953 = vst [vmem:[#allocation5_spill] sm:$0xff] %v5508_v57  ;;  %v3339_v14 = vadd.f32 %v3335_v28, %v3331_v17  ;;  %v808_v57 = vpop.f32.mrf.mxu0  ;;  %4033 = vmatmul.mubr.msk.f32.gmra.mxu0 %vm477_vm0, %v461_v1  ;;  %v2272_v59 = vsub.f32 %v5474_v50, %v4685_v42  ;;  %v2273_v19 = vsub.f32 %v5517_v63, %v4670_v38  ;;  %v1305_v46 = vpop.f32.mrf.mxu1  ;;  %v462_v17 = vld [vmem:[%s4452_s28 + $0x1c8] sm:$0xff]  ;;  %v6957_v50 = vld [vmem:[#allocation9_spill] sm:$0xff] }
 0x121   : > { %v3729_v4 = vadd.f32 %v3337_v31, %v5455_v35  ;;  %v3338_v5 = vadd.f32 %v3334_v62, %v3330_v33  ;;  %v3341_v51 = vmul.f32 %v6956_v54, %v808_v57  ;;  %4105 = vmatmul.mubr.msk.f32.gmra.mxu1 %vm477_vm0, %v461_v1  ;;  %1100 = vmatprep.mubr.f32.mxu0 %v6873_v13  ;;  %v5534_v28 = vand.u32 2147483647, %v2271_v15  ;;  %v6958_v57 = vld [vmem:[#allocation10_spill] sm:$0xff] }
 0x122   : > { %v3731_v9 = vadd.f32 %v3339_v14, %v5460_v6  ;;  %v3340_v58 = vadd.f32 %v3336_v36, %v3332_v49  ;;  %v3343_v32 = vmul.f32 %v6957_v50, %v1305_v46  ;;  %v810_v11 = vpop.f32.mrf.mxu0  ;;  %1597 = vmatprep.mubr.f32.mxu1 %v6873_v13  ;;  %v2844_v35 = vsub.f32 1.0, %v5514_v30  ;;  %v1307_v15 = vpop.f32.mrf.mxu1  ;;  %v6959_v36 = vld [vmem:[#allocation11_spill] sm:$0xff]  ;;  %v6961_v46 = vld [vmem:[#allocation13_spill] sm:$0xff] }
 0x123   : > { %v5541_v33 = vadd.f32 %v3729_v4, %v5413_v22  ;;  %v3730_v1 = vadd.f32 %v3338_v5, %v5464_v60  ;;  %v3342_v31 = vmul.f32 %v6958_v57, %v810_v11  ;;  %v2558_v62 = vand.u32 2147483647, %v2270_v8  ;;  %v6960_v60 = vld [vmem:[#allocation12_spill] sm:$0xff] }
 0x124   : > { %v5546_v6 = vadd.f32 %v3731_v9, %v5423_v37  ;;  %v3732_v49 = vadd.f32 %v3340_v58, %v5470_v21  ;;  %v3344_v14 = vmul.f32 %v6959_v36, %v1307_v15  ;;  %v814_v54 = vpop.f32.mrf.mxu0  ;;  %4034 = vmatmul.mubr.msk.f32.gmra.mxu0 %vm477_vm0, %v462_v17  ;;  %v2275_v22 = vsub.f32 %v5517_v63, %v4674_v39  ;;  %v1311_v4 = vpop.f32.mrf.mxu1  ;;  %v463_v37 = vld [vmem:[%s4452_s28 + $0x1d0] sm:$0xff] }
 0x125   : > { %v5554_v30 = vadd.f32 %v3730_v1, %v5431_v48  ;;  %v3345_v11 = vmul.f32 %v6960_v60, %v814_v54  ;;  %4106 = vmatmul.mubr.msk.f32.gmra.mxu1 %vm477_vm0, %v462_v17  ;;  %1106 = vmatprep.mubr.f32.mxu0 %v6873_v13  ;;  %v2560_v21 = vand.u32 2147483647, %v2272_v59  ;;  %v2561_v8 = vand.u32 2147483647, %v2273_v19  ;;  %v6962_v17 = vld [vmem:[#allocation14_spill] sm:$0xff] }
 0x126   : > { %v5561_v5 = vadd.f32 %v3732_v49, %v5437_v61  ;;  %v3347_v9 = vmul.f32 %v6961_v46, %v1311_v4  ;;  %v816_v58 = vpop.f32.mrf.mxu0  ;;  %1603 = vmatprep.mubr.f32.mxu1 %v6873_v13  ;;  %v2845_v48 = vsub.f32 1.0, %v5519_v29  ;;  %v2274_v50 = vsub.f32 %v5517_v63, %v4678_v40  ;;  %v1313_v59 = vpop.f32.mrf.mxu1  ;;  %v6963_v49 = vld [vmem:[#allocation15_spill] sm:$0xff] }
 0x127   : > { %v5568_v1 = vadd.f32 %v3345_v11, %v3341_v51  ;;  %v3346_v57 = vmul.f32 %v6962_v17, %v816_v58  ;;  %v2847_v19 = vsub.f32 1.0, %v5534_v28  ;;  %v2846_v61 = vsub.f32 1.0, %v2558_v62  ;;  %v6964_v11 = vld [vmem:[#allocation16_spill] sm:$0xff]  ;;  %v5586_v28 = vpop.permute.xlu0 %1932 }
 0x128   : > { %v5572_v15 = vadd.f32 %v3347_v9, %v3343_v32  ;;  %v3348_v36 = vmul.f32 %v6963_v49, %v1313_v59  ;;  %v820_v54 = vpop.f32.mrf.mxu0  ;;  %4035 = vmatmul.mubr.msk.f32.gmra.mxu0 %vm477_vm0, %v463_v37  ;;  %v5576_v29 = vand.u32 2147483647, %v2275_v22  ;;  %v2276_v51 = vsub.f32 %v5517_v63, %v4685_v42  ;;  %v1317_v46 = vpop.f32.mrf.mxu1  ;;  %v464_v32 = vld [vmem:[%s4452_s28 + $0x1d8] sm:$0xff] }
 0x129   : > { %v5580_v60 = vadd.f32 %v3346_v57, %v3342_v31  ;;  %v3353_v4 = vmul.f32 %v6964_v11, %v820_v54  ;;  %4107 = vmatmul.mubr.msk.f32.gmra.mxu1 %vm477_vm0, %v463_v37  ;;  %1112 = vmatprep.mubr.f32.mxu0 %v6873_v13  ;;  %v2848_v62 = vsub.f32 1.0, %v2560_v21  ;;  %v2849_v9 = vsub.f32 1.0, %v2561_v8  ;;  %v6965_v22 = vld [vmem:[#allocation17_spill] sm:$0xff]  ;;  %v6966_v57 = vld [vmem:[#allocation18_spill] sm:$0xff]  ;;  %v6971_v8 = vld [vmem:[#allocation19_spill] sm:$0xff] }
 0x12a   : > { %v3352_v58 = vadd.f32 %v3348_v36, %v3344_v14  ;;  %v3355_v17 = vmul.f32 %v6965_v22, %v1317_v46  ;;  %v822_v59 = vpop.f32.mrf.mxu0  ;;  %1609 = vmatprep.mubr.f32.mxu1 %v6873_v13  ;;  %v2562_v63 = vand.u32 2147483647, %v2274_v50  ;;  %v2277_v31 = vsub.f32 %v5586_v28, %v4670_v38  ;;  %v1319_v49 = vpop.f32.mrf.mxu1 }
 0x12b   : > { %v3354_v37 = vmul.f32 %v6966_v57, %v822_v59  ;;  %v6967_v54 = vsub.f32 1.0, %v5479_v24  ;;  %v5597_v21 = vmax.f32 %v2844_v35, 0.0  ;;  %v5599_v14 = vmax.f32 %v2845_v48, 0.0  ;;  %v6974_v57 = vld [vmem:[#allocation20_spill] sm:$0xff]  ;;  %v465_v35 = vld [vmem:[%s4452_s28 + $0x1e0] sm:$0xff] }
 0x12c   : > { %v3356_v36 = vmul.f32 %v6971_v8, %v1319_v49  ;;  %v826_v46 = vpop.f32.mrf.mxu0  ;;  %4036 = vmatmul.mubr.msk.f32.gmra.mxu0 %vm477_vm0, %v464_v32  ;;  %v5603_v50 = vmax.f32 %v2847_v19, 0.0  ;;  %v5605_v22 = vmax.f32 %v2846_v61, 0.0  ;;  %v2851_v59 = vsub.f32 1.0, %v5576_v29  ;;  %v1323_v24 = vpop.f32.mrf.mxu1 }
 0x12d   : > { %v5595_v11 = vmax.f32 %v6967_v54, 0.0  ;;  %6969 = vst [vmem:[#allocation7_spill] sm:$0xff] %v5597_v21  ;;  %6970 = vst [vmem:[#allocation8_spill] sm:$0xff] %v5599_v14  ;;  %v3357_v44 = vmul.f32 %v6974_v57, %v826_v46  ;;  %4108 = vmatmul.mubr.msk.f32.gmra.mxu1 %vm477_vm0, %v464_v32  ;;  %1118 = vmatprep.mubr.f32.mxu0 %v6873_v13  ;;  %v5612_v48 = vmax.f32 %v2848_v62, 0.0  ;;  %v5614_v49 = vmax.f32 %v2849_v9, 0.0  ;;  %v6977_v54 = vld [vmem:[#allocation21_spill] sm:$0xff]  ;;  %v5625_v9 = vpop.permute.xlu1 %1937 }
 0x12e   : > { %6972 = vst [vmem:[#allocation9_spill] sm:$0xff] %v5603_v50  ;;  %6973 = vst [vmem:[#allocation10_spill] sm:$0xff] %v5605_v22  ;;  %v2279_v19 = vsub.f32 %v5586_v28, %v4674_v39  ;;  %v3359_v61 = vmul.f32 %v6977_v54, %v1323_v24  ;;  %v828_v8 = vpop.f32.mrf.mxu0  ;;  %1615 = vmatprep.mubr.f32.mxu1 %v6873_v13  ;;  %v2850_v29 = vsub.f32 1.0, %v2562_v63  ;;  %v5620_v46 = vand.u32 2147483647, %v2276_v51  ;;  %v6978_v22 = vld [vmem:[#allocation22_spill] sm:$0xff]  ;;  %v1325_v62 = vpop.f32.mrf.mxu1 }
 0x12f   : > { %6968 = vst [vmem:[#allocation6_spill] sm:$0xff] %v5595_v11  ;;  %6975 = vst [vmem:[#allocation11_spill] sm:$0xff] %v5612_v48  ;;  %v5622_v57 = vand.u32 2147483647, %v2277_v31  ;;  %v3361_v32 = vadd.f32 %v3357_v44, %v3353_v4  ;;  %v3358_v50 = vmul.f32 %v6978_v22, %v828_v8  ;;  %v2280_v24 = vsub.f32 %v5586_v28, %v4685_v42  ;;  %v6979_v48 = vld [vmem:[#allocation23_spill] sm:$0xff]  ;;  %v6980_v8 = vld [vmem:[#allocation24_spill] sm:$0xff] }
 0x130   : > { %6976 = vst [vmem:[#allocation12_spill] sm:$0xff] %v5614_v49  ;;  %v2278_v49 = vsub.f32 %v5586_v28, %v4678_v40  ;;  %v3363_v54 = vadd.f32 %v3359_v61, %v3355_v17  ;;  %v3360_v63 = vmul.f32 %v6979_v48, %v1325_v62  ;;  %v832_v51 = vpop.f32.mrf.mxu0  ;;  %4037 = vmatmul.mubr.msk.f32.gmra.mxu0 %vm477_vm0, %v465_v35  ;;  %v1329_v21 = vpop.f32.mrf.mxu1  ;;  %v466_v28 = vld [vmem:[%s4452_s28 + $0x1e8] sm:$0xff]  ;;  %v5644_v17 = vand.u32 2147483647, %v2279_v19  ;;  %v6981_v62 = vld [vmem:[#allocation25_spill] sm:$0xff] }
 0x131   : > { %v2281_v44 = vsub.f32 %v5625_v9, %v4670_v38  ;;  %v2283_v4 = vsub.f32 %v5625_v9, %v4674_v39  ;;  %v5638_v31 = vadd.f32 %v3361_v32, %v5568_v1  ;;  %v3362_v22 = vadd.f32 %v3358_v50, %v3354_v37  ;;  %4109 = vmatmul.mubr.msk.f32.gmra.mxu1 %vm477_vm0, %v465_v35  ;;  %v6982_v50 = vld [vmem:[#allocation26_spill] sm:$0xff] }
 0x132   : > { %v3365_v14 = vmul.f32 %v6980_v8, %v832_v51  ;;  %1124 = vmatprep.mubr.f32.mxu0 %v6873_v13  ;;  %v5647_v48 = vadd.f32 %v3363_v54, %v5572_v15  ;;  %v3364_v61 = vadd.f32 %v3360_v63, %v3356_v36  ;;  %v3367_v11 = vmul.f32 %v6981_v62, %v1329_v21  ;;  %v834_v26 = vpop.f32.mrf.mxu0  ;;  %v1331_v19 = vpop.f32.mrf.mxu1  ;;  %v6984_v21 = vld [vmem:[#allocation27_spill] sm:$0xff] }
 0x133   : > { %1621 = vmatprep.mubr.f32.mxu1 %v6873_v13  ;;  %v2282_v1 = vsub.f32 %v5625_v9, %v4678_v40  ;;  %v5654_v37 = vadd.f32 %v3362_v22, %v5580_v60  ;;  %v3366_v35 = vmul.f32 %v6982_v50, %v834_v26  ;;  %v5657_v32 = vmax.f32 %v2851_v59, 0.0  ;;  %v6986_v60 = vld [vmem:[#allocation28_spill] sm:$0xff] }
 0x134   : > { %v5659_v15 = vand.u32 2147483647, %v2278_v49  ;;  %v5661_v36 = vadd.f32 %v3364_v61, %v3352_v58  ;;  %v3368_v54 = vmul.f32 %v6984_v21, %v1331_v19  ;;  %v838_v63 = vpop.f32.mrf.mxu0  ;;  %4038 = vmatmul.mubr.msk.f32.gmra.mxu0 %vm477_vm0, %v466_v28  ;;  %v5665_v51 = vmax.f32 %v2850_v29, 0.0  ;;  %v1335_v62 = vpop.f32.mrf.mxu1  ;;  %v467_v26 = vld [vmem:[%s4452_s28 + $0x1f0] sm:$0xff]  ;;  %v6987_v61 = vld [vmem:[#allocation29_spill] sm:$0xff] }
 0x135   : > { %6983 = vst [vmem:[#allocation13_spill] sm:$0xff] %v5657_v32  ;;  %v5667_v8 = vand.u32 2147483647, %v2280_v24  ;;  %v3369_v22 = vmul.f32 %v6986_v60, %v838_v63  ;;  %4110 = vmatmul.mubr.msk.f32.gmra.mxu1 %vm477_vm0, %v466_v28  ;;  %1130 = vmatprep.mubr.f32.mxu0 %v6873_v13  ;;  %v2852_v58 = vsub.f32 1.0, %v5620_v46  ;;  %v2853_v59 = vsub.f32 1.0, %v5622_v57  ;;  %v6988_v28 = vld [vmem:[#allocation30_spill] sm:$0xff]  ;;  %v5681_v32 = vpop.permute.xlu0 %1942 }
 0x136   : > { %6985 = vst [vmem:[#allocation14_spill] sm:$0xff] %v5665_v51  ;;  %v2569_v49 = vand.u32 2147483647, %v2281_v44  ;;  %v3371_v50 = vmul.f32 %v6987_v61, %v1335_v62  ;;  %v840_v19 = vpop.f32.mrf.mxu0  ;;  %1627 = vmatprep.mubr.f32.mxu1 %v6873_v13  ;;  %v2855_v29 = vsub.f32 1.0, %v5644_v17  ;;  %v2571_v24 = vand.u32 2147483647, %v2283_v4  ;;  %v1337_v51 = vpop.f32.mrf.mxu1 }
 0x137   : > { %v2570_v21 = vand.u32 2147483647, %v2282_v1  ;;  %v5678_v63 = vadd.f32 %v3369_v22, %v3365_v14  ;;  %v3370_v60 = vmul.f32 %v6988_v28, %v840_v19  ;;  %v2854_v46 = vsub.f32 1.0, %v5659_v15  ;;  %v6989_v62 = vld [vmem:[#allocation31_spill] sm:$0xff]  ;;  %v6990_v22 = vld [vmem:[#allocation32_spill] sm:$0xff] }
 0x138   : > { %v2284_v57 = vsub.f32 %v5625_v9, %v4685_v42  ;;  %v5686_v44 = vadd.f32 %v3371_v50, %v3367_v11  ;;  %v3372_v61 = vmul.f32 %v6989_v62, %v1337_v51  ;;  %v844_v17 = vpop.f32.mrf.mxu0  ;;  %4039 = vmatmul.mubr.msk.f32.gmra.mxu0 %vm477_vm0, %v467_v26  ;;  %v2856_v14 = vsub.f32 1.0, %v5667_v8  ;;  %v1341_v15 = vpop.f32.mrf.mxu1  ;;  %v468_v11 = vld [vmem:[%s4452_s28 + $0x1f8] sm:$0xff] }
 0x139   : > { %v2285_v4 = vsub.f32 %v5681_v32, %v4670_v38  ;;  %v5693_v1 = vadd.f32 %v3370_v60, %v3366_v35  ;;  %v3377_v19 = vmul.f32 %v6990_v22, %v844_v17  ;;  %4111 = vmatmul.mubr.msk.f32.gmra.mxu1 %vm477_vm0, %v467_v26  ;;  %1136 = vmatprep.mubr.f32.mxu0 %v6873_v13  ;;  %v2857_v9 = vsub.f32 1.0, %v2569_v49  ;;  %v6991_v8 = vld [vmem:[#allocation33_spill] sm:$0xff]  ;;  %v6992_v17 = vld [vmem:[#allocation34_spill] sm:$0xff] }
 0x13a   : > { %v2287_v51 = vsub.f32 %v5681_v32, %v4674_v39  ;;  %v5701_v50 = vadd.f32 %v3372_v61, %v3368_v54  ;;  %v3379_v28 = vmul.f32 %v6991_v8, %v1341_v15  ;;  %v846_v62 = vpop.f32.mrf.mxu0  ;;  %1633 = vmatprep.mubr.f32.mxu1 %v6873_v13  ;;  %v2859_v35 = vsub.f32 1.0, %v2571_v24  ;;  %v1343_v26 = vpop.f32.mrf.mxu1  ;;  %v6993_v61 = vld [vmem:[#allocation35_spill] sm:$0xff] }
 0x13b   : > { %v2858_v60 = vsub.f32 1.0, %v2570_v21  ;;  %v3378_v22 = vmul.f32 %v6992_v17, %v846_v62  ;;  %v5706_v41 = vand.u32 2147483647, %v2284_v57  ;;  %v2286_v49 = vsub.f32 %v5681_v32, %v4678_v40  ;;  %v6996_v62 = vld [vmem:[#allocation36_spill] sm:$0xff] }
 0x13c   : > { %v2288_v54 = vsub.f32 %v5681_v32, %v4685_v42  ;;  %v3380_v10 = vmul.f32 %v6993_v61, %v1343_v26  ;;  %v850_v15 = vpop.f32.mrf.mxu0  ;;  %4040 = vmatmul.mubr.msk.f32.gmra.mxu0 %vm477_vm0, %v468_v11  ;;  %v5714_v8 = vmax.f32 %v2852_v58, 0.0  ;;  %v5716_v24 = vmax.f32 %v2853_v59, 0.0  ;;  %v1347_v17 = vpop.f32.mrf.mxu1  ;;  %v6999_v58 = vld [vmem:[#allocation37_spill] sm:$0xff] }
 0x13d   : > { %v5718_v21 = vand.u32 2147483647, %v2285_v4  ;;  %v3381_v57 = vmul.f32 %v6996_v62, %v850_v15  ;;  %4112 = vmatmul.mubr.msk.f32.gmra.mxu1 %vm477_vm0, %v468_v11  ;;  %1142 = vmatprep.mubr.f32.mxu0 %v6873_v13  ;;  %v5724_v32 = vmax.f32 %v2855_v29, 0.0  ;;  %v5726_v26 = vmax.f32 %v2854_v46, 0.0  ;;  %v5739_v46 = vpop.permute.xlu1 %1947 }
 0x13e   : > { %6994 = vst [vmem:[#allocation15_spill] sm:$0xff] %v5714_v8  ;;  %6995 = vst [vmem:[#allocation16_spill] sm:$0xff] %v5716_v24  ;;  %v5728_v61 = vand.u32 2147483647, %v2287_v51  ;;  %v3383_v8 = vmul.f32 %v6999_v58, %v1347_v17  ;;  %v852_v59 = vpop.f32.mrf.mxu0  ;;  %1639 = vmatprep.mubr.f32.mxu1 %v6873_v13  ;;  %v5732_v4 = vmax.f32 %v2856_v14, 0.0  ;;  %v5734_v15 = vmax.f32 %v2857_v9, 0.0  ;;  %v1349_v29 = vpop.f32.mrf.mxu1 }
 0x13f   : > { %6997 = vst [vmem:[#allocation17_spill] sm:$0xff] %v5724_v32  ;;  %6998 = vst [vmem:[#allocation18_spill] sm:$0xff] %v5726_v26  ;;  %v5736_v62 = vmax.f32 %v2859_v35, 0.0  ;;  %v3385_v11 = vadd.f32 %v3381_v57, %v3377_v19  ;;  %v7002_v24 = vld [vmem:[#allocation38_spill] sm:$0xff]  ;;  %v5741_v51 = vmax.f32 %v2858_v60, 0.0  ;;  %v7004_v26 = vld [vmem:[#allocation39_spill] sm:$0xff]  ;;  %v2289_v19 = vsub.f32 %v5739_v46, %v4670_v38 }
 0x140   : > { %7000 = vst [vmem:[#allocation19_spill] sm:$0xff] %v5734_v15  ;;  %v3382_v25 = vmul.f32 %v7002_v24, %v852_v59  ;;  %v3387_v58 = vadd.f32 %v3383_v8, %v3379_v28  ;;  %v3384_v32 = vmul.f32 %v7004_v26, %v1349_v29  ;;  %v856_v14 = vpop.f32.mrf.mxu0  ;;  %4041 = vmatmul.mubr.msk.f32.gmra.mxu0 %vm477_vm0, %v469_v52  ;;  %v7005_v57 = vld [vmem:[#allocation40_spill] sm:$0xff]  ;;  %v1353_v60 = vpop.f32.mrf.mxu1  ;;  %v470_v28 = vld [vmem:[%s4452_s28 + $0x208] sm:$0xff]  ;;  %v2863_v8 = vsub.f32 1.0, %v5728_v61  ;;  %v7006_v9 = vld [vmem:[#allocation41_spill] sm:$0xff] }
 0x141   : > { %7001 = vst [vmem:[#allocation20_spill] sm:$0xff] %v5736_v62  ;;  %7003 = vst [vmem:[#allocation21_spill] sm:$0xff] %v5741_v51  ;;  %v3737_v35 = vadd.f32 %v3385_v11, %v5678_v63  ;;  %v3389_v59 = vmul.f32 %v7005_v57, %v856_v14  ;;  %4113 = vmatmul.mubr.msk.f32.gmra.mxu1 %vm477_vm0, %v469_v52  ;;  %1148 = vmatprep.mubr.f32.mxu0 %v6873_v13  ;;  %v5763_v57 = vand.u32 2147483647, %v2286_v49  ;;  %v7025_v61 = vld [vmem:[#allocation53_spill] sm:$0xff] }
 0x142   : > { %v3386_v24 = vadd.f32 %v3382_v25, %v3378_v22  ;;  %v3739_v26 = vadd.f32 %v3387_v58, %v5686_v44  ;;  %v3388_v29 = vadd.f32 %v3384_v32, %v3380_v10  ;;  %v3391_v17 = vmul.f32 %v7006_v9, %v1353_v60  ;;  %v858_v51 = vpop.f32.mrf.mxu0  ;;  %1645 = vmatprep.mubr.f32.mxu1 %v6873_v13  ;;  %v7007_v22 = vld [vmem:[#allocation42_spill] sm:$0xff]  ;;  %v1355_v14 = vpop.f32.mrf.mxu1  ;;  %v7008_v32 = vld [vmem:[#allocation43_spill] sm:$0xff] }
 0x143   : > { %v2291_v25 = vsub.f32 %v5739_v46, %v4674_v39  ;;  %v3801_v63 = vadd.f32 %v3737_v35, %v5638_v31  ;;  %v3390_v11 = vmul.f32 %v7007_v22, %v858_v51  ;;  %v3392_v58 = vmul.f32 %v7008_v32, %v1355_v14  ;;  %v7009_v35 = vld [vmem:[#allocation44_spill] sm:$0xff] }
 0x144   : > { %v3738_v52 = vadd.f32 %v3386_v24, %v5693_v1  ;;  %v3803_v10 = vadd.f32 %v3739_v26, %v5647_v48  ;;  %v3740_v44 = vadd.f32 %v3388_v29, %v5701_v50  ;;  %v862_v9 = vpop.f32.mrf.mxu0  ;;  %4042 = vmatmul.mubr.msk.f32.gmra.mxu0 %vm477_vm0, %v470_v28  ;;  %v2576_v60 = vand.u32 2147483647, %v2288_v54  ;;  %v1359_v24 = vpop.f32.mrf.mxu1  ;;  %v471_v48 = vld [vmem:[%s4452_s28 + $0x210] sm:$0xff]  ;;  %v7010_v54 = vld [vmem:[#allocation45_spill] sm:$0xff] }
 0x145   : > { %v5770_v31 = vadd.f32 %v3801_v63, %v5541_v33  ;;  %v3393_v51 = vmul.f32 %v7009_v35, %v862_v9  ;;  %4114 = vmatmul.mubr.msk.f32.gmra.mxu1 %vm477_vm0, %v470_v28  ;;  %1154 = vmatprep.mubr.f32.mxu0 %v6873_v13  ;;  %v2577_v50 = vand.u32 2147483647, %v2289_v19  ;;  %v3395_v29 = vmul.f32 %v7010_v54, %v1359_v24  ;;  %v7014_v24 = vld [vmem:[#allocation49_spill] sm:$0xff]  ;;  %v5808_v54 = vpop.permute.xlu0 %1952 }
 0x146   : > { %v3802_v1 = vadd.f32 %v3738_v52, %v5654_v37  ;;  %v5778_v49 = vadd.f32 %v3803_v10, %v5546_v6  ;;  %v3804_v26 = vadd.f32 %v3740_v44, %v5661_v36  ;;  %v864_v33 = vpop.f32.mrf.mxu0  ;;  %1651 = vmatprep.mubr.f32.mxu1 %v6873_v13  ;;  %v2579_v37 = vand.u32 2147483647, %v2291_v25  ;;  %v7011_v52 = vld [vmem:[#allocation46_spill] sm:$0xff]  ;;  %v1361_v14 = vpop.f32.mrf.mxu1  ;;  %v7012_v10 = vld [vmem:[#allocation47_spill] sm:$0xff]  ;;  %v7013_v25 = vld [vmem:[#allocation48_spill] sm:$0xff] }
 0x147   : > { %v3397_v28 = vadd.f32 %v3393_v51, %v3389_v59  ;;  %v3394_v22 = vmul.f32 %v7011_v52, %v864_v33  ;;  %v2290_v6 = vsub.f32 %v5739_v46, %v4678_v40  ;;  %v5792_v36 = vadd.f32 %v3395_v29, %v3391_v17  ;;  %v7015_v33 = vld [vmem:[#allocation50_spill] sm:$0xff] }
 0x148   : > { %v5784_v63 = vadd.f32 %v3802_v1, %v5554_v30  ;;  %v5790_v19 = vadd.f32 %v3804_v26, %v5561_v5  ;;  %v3396_v44 = vmul.f32 %v7012_v10, %v1361_v14  ;;  %v868_v32 = vpop.f32.mrf.mxu0  ;;  %4043 = vmatmul.mubr.msk.f32.gmra.mxu0 %vm477_vm0, %v471_v48  ;;  %v2292_v30 = vsub.f32 %v5739_v46, %v4685_v42  ;;  %v1365_v1 = vpop.f32.mrf.mxu1  ;;  %v472_v5 = vld [vmem:[%s4452_s28 + $0x218] sm:$0xff] }
 0x149   : > { %v5798_v59 = vadd.f32 %v3394_v22, %v3390_v11  ;;  %v3401_v9 = vmul.f32 %v7013_v25, %v868_v32  ;;  %4115 = vmatmul.mubr.msk.f32.gmra.mxu1 %vm477_vm0, %v471_v48  ;;  %1160 = vmatprep.mubr.f32.mxu0 %v6873_v13  ;;  %v2862_v17 = vsub.f32 1.0, %v5763_v57  ;;  %v2864_v35 = vsub.f32 1.0, %v2576_v60  ;;  %v7018_v60 = vld [vmem:[#allocation51_spill] sm:$0xff] }
 0x14a   : > { %v5805_v51 = vadd.f32 %v3396_v44, %v3392_v58  ;;  %v3403_v26 = vmul.f32 %v7014_v24, %v1365_v1  ;;  %v870_v46 = vpop.f32.mrf.mxu0  ;;  %1657 = vmatprep.mubr.f32.mxu1 %v6873_v13  ;;  %v2865_v11 = vsub.f32 1.0, %v2577_v50  ;;  %v2867_v29 = vsub.f32 1.0, %v2579_v37  ;;  %v1367_v52 = vpop.f32.mrf.mxu1  ;;  %v473_v24 = vld [vmem:[%s4452_s28 + $0x220] sm:$0xff] }
 0x14b   : > { %v3402_v48 = vmul.f32 %v7015_v33, %v870_v46  ;;  %v7016_v22 = vsub.f32 1.0, %v5706_v41  ;;  %v5816_v57 = vand.u32 2147483647, %v2290_v6  ;;  %v2293_v58 = vsub.f32 %v5808_v54, %v4670_v38  ;;  %v7022_v6 = vld [vmem:[#allocation52_spill] sm:$0xff] }
 0x14c   : > { %v3404_v10 = vmul.f32 %v7018_v60, %v1367_v52  ;;  %v874_v44 = vpop.f32.mrf.mxu0  ;;  %4044 = vmatmul.mubr.msk.f32.gmra.mxu0 %vm477_vm0, %v472_v5  ;;  %v7019_v50 = vsub.f32 1.0, %v5718_v21  ;;  %v5828_v32 = vmax.f32 %v2863_v8, 0.0  ;;  %v5830_v41 = vand.u32 2147483647, %v2292_v30  ;;  %v1371_v1 = vpop.f32.mrf.mxu1 }
 0x14d   : > { %v5814_v14 = vmax.f32 %v7016_v22, 0.0  ;;  %v3405_v25 = vmul.f32 %v7022_v6, %v874_v44  ;;  %4116 = vmatmul.mubr.msk.f32.gmra.mxu1 %vm477_vm0, %v472_v5  ;;  %1166 = vmatprep.mubr.f32.mxu0 %v6873_v13  ;;  %v5836_v46 = vmax.f32 %v2862_v17, 0.0  ;;  %v5838_v33 = vmax.f32 %v2864_v35, 0.0  ;;  %v7028_v17 = vld [vmem:[#allocation54_spill] sm:$0xff] }
 0x14e   : > { %v5824_v37 = vmax.f32 %v7019_v50, 0.0  ;;  %7021 = vst [vmem:[#allocation24_spill] sm:$0xff] %v5828_v32  ;;  %v2295_v21 = vsub.f32 %v5808_v54, %v4674_v39  ;;  %v3407_v8 = vmul.f32 %v7025_v61, %v1371_v1  ;;  %v876_v52 = vpop.f32.mrf.mxu0  ;;  %1663 = vmatprep.mubr.f32.mxu1 %v6873_v13  ;;  %v5844_v30 = vmax.f32 %v2865_v11, 0.0  ;;  %v1373_v35 = vpop.f32.mrf.mxu1  ;;  %v7029_v61 = vld [vmem:[#allocation55_spill] sm:$0xff]  ;;  %v7037_v32 = vld [vmem:[#allocation62_spill] sm:$0xff] }
 0x14f   : > { %7017 = vst [vmem:[#allocation22_spill] sm:$0xff] %v5814_v14  ;;  %7023 = vst [vmem:[#allocation25_spill] sm:$0xff] %v5836_v46  ;;  %v5846_v22 = vmax.f32 %v2867_v29, 0.0  ;;  %v2294_v5 = vsub.f32 %v5808_v54, %v4678_v40  ;;  %v3409_v60 = vadd.f32 %v3405_v25, %v3401_v9  ;;  %v3406_v44 = vmul.f32 %v7028_v17, %v876_v52  ;;  %v7030_v52 = vld [vmem:[#allocation56_spill] sm:$0xff]  ;;  %v7038_v14 = vld [vmem:[#allocation63_spill] sm:$0xff] }
 0x150   : > { %7020 = vst [vmem:[#allocation23_spill] sm:$0xff] %v5824_v37  ;;  %7024 = vst [vmem:[#allocation26_spill] sm:$0xff] %v5838_v33  ;;  %v2866_v50 = vsub.f32 1.0, %v5816_v57  ;;  %v5852_v6 = vand.u32 2147483647, %v2293_v58  ;;  %v3411_v1 = vadd.f32 %v3407_v8, %v3403_v26  ;;  %v3408_v33 = vmul.f32 %v7029_v61, %v1373_v35  ;;  %v880_v46 = vpop.f32.mrf.mxu0  ;;  %4045 = vmatmul.mubr.msk.f32.gmra.mxu0 %vm477_vm0, %v473_v24  ;;  %v474_v26 = vld [vmem:[%s4452_s28 + $0x228] sm:$0xff]  ;;  %v1958_v58 = vpop.permute.xlu1 %1957 }
 0x151   : > { %7026 = vst [vmem:[#allocation27_spill] sm:$0xff] %v5844_v30  ;;  %7027 = vst [vmem:[#allocation28_spill] sm:$0xff] %v5846_v22  ;;  %v2296_v29 = vsub.f32 %v5808_v54, %v4685_v42  ;;  %v5859_v9 = vadd.f32 %v3409_v60, %v3397_v28  ;;  %v3410_v25 = vadd.f32 %v3406_v44, %v3402_v48  ;;  %v1377_v22 = vpop.f32.mrf.mxu1  ;;  %4117 = vmatmul.mubr.msk.f32.gmra.mxu1 %vm477_vm0, %v473_v24  ;;  %v7031_v61 = vld [vmem:[#allocation57_spill] sm:$0xff]  ;;  %v7032_v24 = vld [vmem:[#allocation58_spill] sm:$0xff] }
 0x152   : > { %v3413_v17 = vmul.f32 %v7030_v52, %v880_v46  ;;  %1172 = vmatprep.mubr.f32.mxu0 %v6873_v13  ;;  %v5865_v57 = vand.u32 2147483647, %v2295_v21  ;;  %v5868_v8 = vadd.f32 %v3411_v1, %v5792_v36  ;;  %v3412_v35 = vadd.f32 %v3408_v33, %v3404_v10  ;;  %v882_v28 = vpop.f32.mrf.mxu0  ;;  %1669 = vmatprep.mubr.f32.mxu1 %v6873_v13  ;;  %v7033_v10 = vld [vmem:[#allocation59_spill] sm:$0xff] }
 0x153   : > { %v3415_v54 = vmul.f32 %v7031_v61, %v1377_v22  ;;  %v2582_v48 = vand.u32 2147483647, %v2294_v5  ;;  %v5873_v46 = vadd.f32 %v3410_v25, %v5798_v59  ;;  %v3414_v60 = vmul.f32 %v7032_v24, %v882_v28  ;;  %v1379_v44 = vpop.f32.mrf.mxu1  ;;  %v7034_v59 = vld [vmem:[#allocation60_spill] sm:$0xff] }
 0x154   : > { %v2297_v21 = vsub.f32 %v1958_v58, %v4670_v38  ;;  %v2299_v52 = vsub.f32 %v1958_v58, %v4674_v39  ;;  %v5879_v36 = vadd.f32 %v3412_v35, %v5805_v51  ;;  %v3416_v33 = vmul.f32 %v7033_v10, %v1379_v44  ;;  %v886_v22 = vpop.f32.mrf.mxu0  ;;  %4046 = vmatmul.mubr.msk.f32.gmra.mxu0 %vm477_vm0, %v474_v26  ;;  %v475_v28 = vld [vmem:[%s4452_s28 + $0x230] sm:$0xff]  ;;  %v7036_v44 = vld [vmem:[#allocation61_spill] sm:$0xff] }
 0x155   : > { %v2584_v5 = vand.u32 2147483647, %v2296_v29  ;;  %v2298_v1 = vsub.f32 %v1958_v58, %v4678_v40  ;;  %v3417_v25 = vmul.f32 %v7034_v59, %v886_v22  ;;  %v1383_v61 = vpop.f32.mrf.mxu1  ;;  %4118 = vmatmul.mubr.msk.f32.gmra.mxu1 %vm477_vm0, %v474_v26  ;;  %1178 = vmatprep.mubr.f32.mxu0 %v6873_v13  ;;  %v5888_v24 = vmax.f32 %v2866_v50, 0.0  ;;  %v5894_v59 = vpop.permute.xlu0 %1962 }
 0x156   : > { %v2585_v51 = vand.u32 2147483647, %v2297_v21  ;;  %v2300_v35 = vsub.f32 %v1958_v58, %v4685_v42  ;;  %v3419_v10 = vmul.f32 %v7036_v44, %v1383_v61  ;;  %v888_v11 = vpop.f32.mrf.mxu0  ;;  %1675 = vmatprep.mubr.f32.mxu1 %v6873_v13  ;;  %v2869_v29 = vsub.f32 1.0, %v5852_v6 }
 0x157   : > { %7035 = vst [vmem:[#allocation29_spill] sm:$0xff] %v5888_v24  ;;  %v2587_v30 = vand.u32 2147483647, %v2299_v52  ;;  %v2586_v22 = vand.u32 2147483647, %v2298_v1  ;;  %v3421_v26 = vadd.f32 %v3417_v25, %v3413_v17  ;;  %v3418_v37 = vmul.f32 %v7037_v32, %v888_v11  ;;  %v1385_v50 = vpop.f32.mrf.mxu1  ;;  %v7039_v1 = vld [vmem:[#allocation64_spill] sm:$0xff] }
 0x158   : > { %v2871_v21 = vsub.f32 1.0, %v5865_v57  ;;  %v2870_v24 = vsub.f32 1.0, %v2582_v48  ;;  %v3423_v58 = vadd.f32 %v3419_v10, %v3415_v54  ;;  %v3420_v61 = vmul.f32 %v7038_v14, %v1385_v50  ;;  %v892_v44 = vpop.f32.mrf.mxu0  ;;  %4047 = vmatmul.mubr.msk.f32.gmra.mxu0 %vm477_vm0, %v475_v28  ;;  %v476_v32 = vld [vmem:[%s4452_s28 + $0x238] sm:$0xff]  ;;  %s3974_s28 = sshll.u32 %s7175_s13, 3 }
 0x159   : > { %v2872_v62 = vsub.f32 1.0, %v2584_v5  ;;  %v2301_v6 = vsub.f32 %v5894_v59, %v4670_v38  ;;  %v3422_v52 = vadd.f32 %v3418_v37, %v3414_v60  ;;  %v3425_v17 = vmul.f32 %v7039_v1, %v892_v44  ;;  %v1389_v25 = vpop.f32.mrf.mxu1  ;;  %4119 = vmatmul.mubr.msk.f32.gmra.mxu1 %vm477_vm0, %v475_v28  ;;  %1184 = vmatprep.mubr.f32.mxu0 %v6873_v13  ;;  %v7040_v54 = vld [vmem:[#allocation65_spill] sm:$0xff]  ;;  %v7041_v37 = vld [vmem:[#allocation66_spill] sm:$0xff]  ;;  %s214_s13 = sadd.s32 %s3974_s28, %s7171_s19 }
 0x15a   : > { %v2873_v11 = vsub.f32 1.0, %v2585_v51  ;;  %v5906_v57 = vand.u32 2147483647, %v2300_v35  ;;  %v3424_v14 = vadd.f32 %v3420_v61, %v3416_v33  ;;  %v3427_v48 = vmul.f32 %v7040_v54, %v1389_v25  ;;  %v894_v10 = vpop.f32.mrf.mxu0  ;;  %1681 = vmatprep.mubr.f32.mxu1 %v6873_v13  ;;  %v7043_v33 = vld [vmem:[#allocation67_spill] sm:$0xff]  ;;  %v7046_v25 = vld [vmem:[#allocation68_spill] sm:$0xff]  ;;  %s3975_s24 = sshll.u32 %s214_s13, 3 }
 0x15b   : > { %v2875_v5 = vsub.f32 1.0, %v2587_v30  ;;  %v2874_v50 = vsub.f32 1.0, %v2586_v22  ;;  %v3426_v60 = vmul.f32 %v7041_v37, %v894_v10  ;;  %v1391_v44 = vpop.f32.mrf.mxu1  ;;  %v7042_v1 = vsub.f32 1.0, %v5830_v41  ;;  %s216_s26 = scalar_lea.vmem %s6846_s3, %s3975_s24 }
 0x15c   : > { %v5915_v15 = vmax.f32 %v2869_v29, 0.0  ;;  %v2303_v51 = vsub.f32 %v5894_v59, %v4674_v39  ;;  %v3428_v35 = vmul.f32 %v7043_v33, %v1391_v44  ;;  %v898_v61 = vpop.f32.mrf.mxu0  ;;  %4048 = vmatmul.mubr.msk.f32.gmra.mxu0 %vm477_vm0, %v476_v32  ;;  %v5921_v13 = vmax.f32 %v2871_v21, 0.0  ;;  %v7048_v44 = vld [vmem:[#allocation69_spill] sm:$0xff] }
 0x15d   : > { %v5913_v28 = vmax.f32 %v7042_v1, 0.0  ;;  %v5923_v30 = vmax.f32 %v2870_v24, 0.0  ;;  %v5925_v22 = vmax.f32 %v2872_v62, 0.0  ;;  %v3429_v41 = vmul.f32 %v7046_v25, %v898_v61  ;;  %v1395_v54 = vpop.f32.mrf.mxu1  ;;  %4120 = vmatmul.mubr.msk.f32.gmra.mxu1 %vm477_vm0, %v476_v32  ;;  %v1968_v61 = vpop.permute.xlu1 %1967 }
 0x15e   : > { %v5929_v29 = vmax.f32 %v2873_v11, 0.0  ;;  %v5932_v37 = vand.u32 2147483647, %v2301_v6  ;;  %v3431_v1 = vmul.f32 %v7048_v44, %v1395_v54  ;;  %v900_v33 = vpop.f32.mrf.mxu0  ;;  %v5935_v21 = vmax.f32 %v2875_v5, 0.0 }
 0x15f   : > { %7044 = vst [vmem:[#allocation30_spill] sm:$0xff] %v5923_v30  ;;  %7045 = vst [vmem:[#allocation31_spill] sm:$0xff] %v5925_v22  ;;  %v5937_v24 = vmax.f32 %v2874_v50, 0.0  ;;  %v2302_v62 = vsub.f32 %v5894_v59, %v4678_v40  ;;  %v3433_v25 = vadd.f32 %v3429_v41, %v3425_v17  ;;  %v3430_v32 = vmul.f32 %v5283_v3, %v900_v33  ;;  %v1397_v11 = vpop.f32.mrf.mxu1 }
 0x160   : > { %7047 = vst [vmem:[#allocation32_spill] sm:$0xff] %v5929_v29  ;;  %7049 = vst [vmem:[#allocation33_spill] sm:$0xff] %v5935_v21  ;;  %v5942_v29 = vand.u32 2147483647, %v2303_v51  ;;  %v2304_v6 = vsub.f32 %v5894_v59, %v4685_v42  ;;  %v3435_v10 = vadd.f32 %v3431_v1, %v3427_v48  ;;  %v3432_v54 = vmul.f32 %v5288_v53, %v1397_v11  ;;  %v904_v5 = vpop.f32.mrf.mxu0 }
 0x161   : > { %7050 = vst [vmem:[#allocation34_spill] sm:$0xff] %v5937_v24  ;;  %v2305_v50 = vsub.f32 %v1968_v61, %v4670_v38  ;;  %v2307_v44 = vsub.f32 %v1968_v61, %v4674_v39  ;;  %v3745_v24 = vadd.f32 %v3433_v25, %v3421_v26  ;;  %v3434_v21 = vadd.f32 %v3430_v32, %v3426_v60  ;;  %v1401_v41 = vpop.f32.mrf.mxu1 }
 0x162   : > { %v3437_v17 = vmul.f32 %v5290_v34, %v904_v5  ;;  %v2877_v3 = vsub.f32 1.0, %v5932_v37  ;;  %v3747_v51 = vadd.f32 %v3435_v10, %v3423_v58  ;;  %v3436_v33 = vadd.f32 %v3432_v54, %v3428_v35  ;;  %v906_v59 = vpop.f32.mrf.mxu0  ;;  %v5960_v10 = vpop.permute.xlu0 %1972 }
 0x163   : > { %v3439_v22 = vmul.f32 %v5292_v2, %v1401_v41  ;;  %v2590_v48 = vand.u32 2147483647, %v2302_v62  ;;  %v5953_v53 = vadd.f32 %v3745_v24, %v5859_v9  ;;  %v3746_v1 = vadd.f32 %v3434_v21, %v3422_v52  ;;  %v1403_v30 = vpop.f32.mrf.mxu1 }
 0x164   : > { %v3438_v11 = vmul.f32 %v5294_v23, %v906_v59  ;;  %v2592_v26 = vand.u32 2147483647, %v2304_v6  ;;  %v5957_v60 = vadd.f32 %v3747_v51, %v5868_v8  ;;  %v3748_v34 = vadd.f32 %v3436_v33, %v3424_v14  ;;  %v910_v58 = vpop.f32.mrf.mxu0  ;;  %v7051_v8 = vld [vmem:[#allocation70_spill] sm:$0xff]  ;;  %v7054_v59 = vld [vmem:[#allocation73_spill] sm:$0xff] }
 0x165   : > { %v3440_v37 = vmul.f32 %v5296_v55, %v1403_v30  ;;  %v2593_v35 = vand.u32 2147483647, %v2305_v50  ;;  %v5963_v2 = vadd.f32 %v3746_v1, %v5873_v46  ;;  %v3441_v9 = vmul.f32 %v5298_v56, %v910_v58  ;;  %v1407_v52 = vpop.f32.mrf.mxu1  ;;  %v7052_v46 = vld [vmem:[#allocation71_spill] sm:$0xff]  ;;  %v7053_v50 = vld [vmem:[#allocation72_spill] sm:$0xff] }
 0x166   : > { %v2595_v21 = vand.u32 2147483647, %v2307_v44  ;;  %v2306_v23 = vsub.f32 %v1968_v61, %v4678_v40  ;;  %v5968_v24 = vadd.f32 %v3748_v34, %v5879_v36  ;;  %v3443_v14 = vmul.f32 %v7051_v8, %v1407_v52  ;;  %v912_v62 = vpop.f32.mrf.mxu0 }
 0x167   : > { %v2308_v55 = vsub.f32 %v1968_v61, %v4685_v42  ;;  %v2309_v30 = vsub.f32 %v5960_v10, %v4670_v38  ;;  %v3445_v25 = vadd.f32 %v3441_v9, %v3437_v17  ;;  %v3442_v32 = vmul.f32 %v7052_v46, %v912_v62  ;;  %v1409_v6 = vpop.f32.mrf.mxu1  ;;  %v7055_v17 = vld [vmem:[#allocation74_spill] sm:$0xff] }
 0x168   : > { %v2879_v56 = vsub.f32 1.0, %v5942_v29  ;;  %v2594_v54 = vand.u32 2147483647, %v2306_v23  ;;  %v3447_v5 = vadd.f32 %v3443_v14, %v3439_v22  ;;  %v3444_v44 = vmul.f32 %v7053_v50, %v1409_v6  ;;  %v916_v36 = vpop.f32.mrf.mxu0  ;;  %v7056_v29 = vld [vmem:[#allocation75_spill] sm:$0xff] }
 0x169   : > { %v2878_v41 = vsub.f32 1.0, %v2590_v48  ;;  %v2880_v51 = vsub.f32 1.0, %v2592_v26  ;;  %v3446_v33 = vadd.f32 %v3442_v32, %v3438_v11  ;;  %v3449_v1 = vmul.f32 %v7054_v59, %v916_v36  ;;  %v1413_v61 = vpop.f32.mrf.mxu1 }
 0x16a   : > { %v2881_v34 = vsub.f32 1.0, %v2593_v35  ;;  %v2883_v58 = vsub.f32 1.0, %v2595_v21  ;;  %v3448_v52 = vadd.f32 %v3444_v44, %v3440_v37  ;;  %v3451_v9 = vmul.f32 %v7055_v17, %v1413_v61  ;;  %v918_v8 = vpop.f32.mrf.mxu0 }
 0x16b   : > { %v2596_v62 = vand.u32 2147483647, %v2308_v55  ;;  %v2597_v46 = vand.u32 2147483647, %v2309_v30  ;;  %v3450_v23 = vmul.f32 %v7056_v29, %v918_v8  ;;  %v1415_v22 = vpop.f32.mrf.mxu1  ;;  %v7057_v14 = vsub.f32 1.0, %v5906_v57 }
 0x16c   : > { %v5984_v48 = vmax.f32 %v2877_v3, 0.0  ;;  %v2882_v11 = vsub.f32 1.0, %v2594_v54  ;;  %v3452_v26 = vmul.f32 %v5346_v12, %v1415_v22  ;;  %v922_v35 = vpop.f32.mrf.mxu0  ;;  %v5987_v21 = vmax.f32 %v2879_v56, 0.0 }
 0x16d   : > { %v5982_v6 = vmax.f32 %v7057_v14, 0.0  ;;  %v5989_v37 = vmax.f32 %v2878_v41, 0.0  ;;  %v2311_v55 = vsub.f32 %v5960_v10, %v4674_v39  ;;  %v3453_v30 = vmul.f32 %v5354_v43, %v922_v35  ;;  %v1419_v32 = vpop.f32.mrf.mxu1  ;;  %v1978_v41 = vpop.permute.xlu1 %1977 }
 0x16e   : > { %v5994_v50 = vmax.f32 %v2880_v51, 0.0  ;;  %v5996_v57 = vmax.f32 %v2881_v34, 0.0  ;;  %v5998_v3 = vmax.f32 %v2883_v58, 0.0  ;;  %v3455_v54 = vmul.f32 %v5362_v0, %v1419_v32  ;;  %v924_v12 = vpop.f32.mrf.mxu0 }
 0x16f   : > { %v2884_v44 = vsub.f32 1.0, %v2596_v62  ;;  %v2885_v56 = vsub.f32 1.0, %v2597_v46  ;;  %v2310_v36 = vsub.f32 %v5960_v10, %v4678_v40  ;;  %v3457_v59 = vadd.f32 %v3453_v30, %v3449_v1  ;;  %v1421_v43 = vpop.f32.mrf.mxu1 }
 0x170   : > { %7058 = vst [vmem:[#allocation35_spill] sm:$0xff] %v5996_v57  ;;  %7059 = vst [vmem:[#allocation36_spill] sm:$0xff] %v5998_v3  ;;  %v3454_v61 = vmul.f32 %v5385_v16, %v924_v12  ;;  %v6004_v17 = vmax.f32 %v2882_v11, 0.0  ;;  %v2312_v51 = vsub.f32 %v5960_v10, %v4685_v42  ;;  %v3459_v34 = vadd.f32 %v3455_v54, %v3451_v9  ;;  %v928_v0 = vpop.f32.mrf.mxu0  ;;  %v1983_v12 = vpop.permute.xlu0 %1982 }
 0x171   : > { %v3456_v58 = vmul.f32 %v5387_v47, %v1421_v43  ;;  %v2599_v8 = vand.u32 2147483647, %v2311_v55  ;;  %v2313_v62 = vsub.f32 %v1978_v41, %v4670_v38  ;;  %v6010_v46 = vadd.f32 %v3457_v59, %v3445_v25  ;;  %v1425_v22 = vpop.f32.mrf.mxu1 }
 0x172   : > { %7060 = vst [vmem:[#allocation37_spill] sm:$0xff] %v6004_v17  ;;  %v3458_v29 = vadd.f32 %v3454_v61, %v3450_v23  ;;  %v3461_v1 = vmul.f32 %v5389_v20, %v928_v0  ;;  %v2315_v16 = vsub.f32 %v1978_v41, %v4674_v39  ;;  %v6014_v14 = vadd.f32 %v3459_v34, %v3447_v5  ;;  %v930_v9 = vpop.f32.mrf.mxu0 }
 0x173   : > { %v3460_v11 = vadd.f32 %v3456_v58, %v3452_v26  ;;  %v3463_v10 = vmul.f32 %v5393_v27, %v1425_v22  ;;  %v2598_v35 = vand.u32 2147483647, %v2310_v36  ;;  %v3462_v55 = vmul.f32 %v5395_v18, %v930_v9  ;;  %v1427_v30 = vpop.f32.mrf.mxu1  ;;  %v7064_v58 = vld [vmem:[#allocation2_spill] sm:$0xff] }
 0x174   : > { %v6017_v47 = vadd.f32 %v3458_v29, %v3446_v33  ;;  %v6020_v25 = vmax.f32 %v2884_v44, 0.0  ;;  %v2600_v23 = vand.u32 2147483647, %v2312_v51  ;;  %v3464_v20 = vmul.f32 %v5400_v45, %v1427_v30  ;;  %v934_v54 = vpop.f32.mrf.mxu0  ;;  %v7063_v44 = vld [vmem:[#allocation76_spill] sm:$0xff] }
 0x175   : > { %v6022_v32 = vadd.f32 %v3460_v11, %v3448_v52  ;;  %v2601_v5 = vand.u32 2147483647, %v2313_v62  ;;  %v2314_v26 = vsub.f32 %v1978_v41, %v4678_v40  ;;  %v3465_v27 = vmul.f32 %v5450_v7, %v934_v54  ;;  %v1431_v36 = vpop.f32.mrf.mxu1  ;;  %v7066_v54 = vld [vmem:[#allocation3_spill] sm:$0xff] }
 0x176   : > { %7061 = vst [vmem:[#allocation38_spill] sm:$0xff] %v6020_v25  ;;  %v6027_v33 = vmax.f32 %v2885_v56, 0.0  ;;  %v2603_v59 = vand.u32 2147483647, %v2315_v16  ;;  %v2316_v18 = vsub.f32 %v1978_v41, %v4685_v42  ;;  %v3467_v61 = vmul.f32 %v7063_v44, %v1431_v36  ;;  %v936_v43 = vpop.f32.mrf.mxu0  ;;  %v7065_v56 = vld [vmem:[#allocation77_spill] sm:$0xff] }
 0x177   : > { %v2887_v52 = vsub.f32 1.0, %v2599_v8  ;;  %v2886_v51 = vsub.f32 1.0, %v2598_v35  ;;  %v2317_v45 = vsub.f32 %v1983_v12, %v4670_v38  ;;  %v3469_v34 = vadd.f32 %v3465_v27, %v3461_v1  ;;  %v1433_v62 = vpop.f32.mrf.mxu1  ;;  %v7067_v27 = vld [vmem:[#allocation78_spill] sm:$0xff] }
 0x178   : > { %7062 = vst [vmem:[#allocation39_spill] sm:$0xff] %v6027_v33  ;;  %v3466_v0 = vmul.f32 %v7064_v58, %v936_v43  ;;  %v2888_v29 = vsub.f32 1.0, %v2600_v23  ;;  %v2319_v7 = vsub.f32 %v1983_v12, %v4674_v39  ;;  %v3471_v22 = vadd.f32 %v3467_v61, %v3463_v10  ;;  %v940_v16 = vpop.f32.mrf.mxu0  ;;  %v7068_v61 = vld [vmem:[#allocation79_spill] sm:$0xff]  ;;  %v7080_v33 = vld [vmem:[#allocation9_spill] sm:$0xff] }
 0x179   : > { %v3468_v11 = vmul.f32 %v7065_v56, %v1433_v62  ;;  %v2889_v9 = vsub.f32 1.0, %v2601_v5  ;;  %v6035_v41 = vand.u32 2147483647, %v2314_v26  ;;  %v3473_v8 = vmul.f32 %v7066_v54, %v940_v16  ;;  %v1437_v35 = vpop.f32.mrf.mxu1  ;;  %v6057_v16 = vpop.permute.xlu1 %1987  ;;  %v7074_v54 = vld [vmem:[#allocation80_spill] sm:$0xff] }
 0x17a   : > { %v3470_v30 = vadd.f32 %v3466_v0, %v3462_v55  ;;  %v2891_v36 = vsub.f32 1.0, %v2603_v59  ;;  %v6038_v44 = vand.u32 2147483647, %v2316_v18  ;;  %v3475_v43 = vmul.f32 %v7067_v27, %v1437_v35  ;;  %v942_v23 = vpop.f32.mrf.mxu0  ;;  %v7071_v59 = vld [vmem:[#allocation4_spill] sm:$0xff] }
 0x17b   : > { %v3472_v1 = vadd.f32 %v3468_v11, %v3464_v20  ;;  %v6041_v58 = vand.u32 2147483647, %v2317_v45  ;;  %v2318_v10 = vsub.f32 %v1983_v12, %v4678_v40  ;;  %v3474_v62 = vmul.f32 %v7068_v61, %v942_v23  ;;  %v1439_v5 = vpop.f32.mrf.mxu1  ;;  %v7076_v23 = vld [vmem:[#allocation5_spill] sm:$0xff] }
 0x17c   : > { %v6045_v26 = vmax.f32 %v2887_v52, 0.0  ;;  %v6047_v55 = vmax.f32 %v2886_v51, 0.0  ;;  %v6049_v0 = vand.u32 2147483647, %v2319_v7  ;;  %v3476_v18 = vmul.f32 %v7071_v59, %v1439_v5  ;;  %v946_v56 = vpop.f32.mrf.mxu0 }
 0x17d   : > { %v6052_v20 = vmax.f32 %v2888_v29, 0.0  ;;  %v6054_v11 = vmax.f32 %v2889_v9, 0.0  ;;  %v2320_v45 = vsub.f32 %v1983_v12, %v4685_v42  ;;  %v3477_v35 = vmul.f32 %v7074_v54, %v946_v56  ;;  %v1443_v27 = vpop.f32.mrf.mxu1 }
 0x17e   : > { %7069 = vst [vmem:[#allocation40_spill] sm:$0xff] %v6045_v26  ;;  %7070 = vst [vmem:[#allocation41_spill] sm:$0xff] %v6047_v55  ;;  %v6060_v52 = vmax.f32 %v2891_v36, 0.0  ;;  %v6063_v7 = vand.u32 2147483647, %v2318_v10  ;;  %v3479_v61 = vmul.f32 %v7076_v23, %v1443_v27  ;;  %v948_v5 = vpop.f32.mrf.mxu0  ;;  %v2321_v12 = vsub.f32 %v6057_v16, %v4670_v38 }
 0x17f   : > { %7072 = vst [vmem:[#allocation42_spill] sm:$0xff] %v6052_v20  ;;  %7073 = vst [vmem:[#allocation43_spill] sm:$0xff] %v6054_v11  ;;  %v3481_v59 = vadd.f32 %v3477_v35, %v3473_v8  ;;  %v7077_v11 = vld [vmem:[#allocation6_spill] sm:$0xff]  ;;  %v1445_v54 = vpop.f32.mrf.mxu1  ;;  %v2323_v10 = vsub.f32 %v6057_v16, %v4674_v39  ;;  %v6075_v20 = vand.u32 2147483647, %v2320_v45  ;;  %v2322_v9 = vsub.f32 %v6057_v16, %v4678_v40  ;;  %v7079_v8 = vld [vmem:[#allocation8_spill] sm:$0xff] }
 0x180   : > { %7075 = vst [vmem:[#allocation44_spill] sm:$0xff] %v6060_v52  ;;  %v3478_v56 = vmul.f32 %v7077_v11, %v948_v5  ;;  %v3483_v51 = vadd.f32 %v3479_v61, %v3475_v43  ;;  %v7078_v52 = vld [vmem:[#allocation7_spill] sm:$0xff]  ;;  %v952_v23 = vpop.f32.mrf.mxu0  ;;  %v2894_v5 = vsub.f32 1.0, %v6063_v7  ;;  %v2609_v61 = vand.u32 2147483647, %v2321_v12  ;;  %v7084_v12 = vld [vmem:[#allocation13_spill] sm:$0xff] }
 0x181   : > { %v3480_v27 = vmul.f32 %v7078_v52, %v1445_v54  ;;  %v3753_v29 = vadd.f32 %v3481_v59, %v3469_v34  ;;  %v3485_v35 = vmul.f32 %v7079_v8, %v952_v23  ;;  %v1449_v11 = vpop.f32.mrf.mxu1  ;;  %v7081_v54 = vld [vmem:[#allocation10_spill] sm:$0xff]  ;;  %v2611_v57 = vand.u32 2147483647, %v2323_v10  ;;  %v7082_v59 = vld [vmem:[#allocation11_spill] sm:$0xff] }
 0x182   : > { %v3482_v55 = vadd.f32 %v3478_v56, %v3474_v62  ;;  %v3755_v36 = vadd.f32 %v3483_v51, %v3471_v22  ;;  %v3487_v25 = vmul.f32 %v7080_v33, %v1449_v11  ;;  %v954_v43 = vpop.f32.mrf.mxu0  ;;  %v2896_v22 = vsub.f32 1.0, %v6075_v20  ;;  %v7083_v51 = vld [vmem:[#allocation12_spill] sm:$0xff] }
 0x183   : > { %v3484_v26 = vadd.f32 %v3480_v27, %v3476_v18  ;;  %v3809_v52 = vadd.f32 %v3753_v29, %v6010_v46  ;;  %v3486_v17 = vmul.f32 %v7081_v54, %v954_v43  ;;  %v1451_v3 = vpop.f32.mrf.mxu1 }
 0x184   : > { %v3754_v45 = vadd.f32 %v3482_v55, %v3470_v30  ;;  %v3811_v34 = vadd.f32 %v3755_v36, %v6014_v14  ;;  %v3488_v56 = vmul.f32 %v7082_v59, %v1451_v3  ;;  %v958_v23 = vpop.f32.mrf.mxu0  ;;  %v2610_v30 = vand.u32 2147483647, %v2322_v9  ;;  %v7086_v36 = vld [vmem:[#allocation14_spill] sm:$0xff] }
 0x185   : > { %v3756_v62 = vadd.f32 %v3484_v26, %v3472_v1  ;;  %v3837_v18 = vadd.f32 %v3809_v52, %v5953_v53  ;;  %v3489_v7 = vmul.f32 %v7083_v51, %v958_v23  ;;  %v1455_v46 = vpop.f32.mrf.mxu1  ;;  %v2897_v26 = vsub.f32 1.0, %v2609_v61  ;;  %v7090_v61 = vld [vmem:[#allocation16_spill] sm:$0xff]  ;;  %v7093_v59 = vld [vmem:[#allocation18_spill] sm:$0xff] }
 0x186   : > { %v3810_v33 = vadd.f32 %v3754_v45, %v6017_v47  ;;  %v3839_v55 = vadd.f32 %v3811_v34, %v5957_v60  ;;  %v3491_v14 = vmul.f32 %v7084_v12, %v1455_v46  ;;  %v960_v1 = vpop.f32.mrf.mxu0  ;;  %v7097_v46 = vsub.f32 1.0, %v6049_v0 }
 0x187   : > { %v3812_v29 = vadd.f32 %v3756_v62, %v6022_v32  ;;  %v6094_v3 = vadd.f32 %v3837_v18, %v5770_v31  ;;  %v3493_v53 = vadd.f32 %v3489_v7, %v3485_v35  ;;  %v3490_v47 = vmul.f32 %v7086_v36, %v960_v1  ;;  %v1457_v10 = vpop.f32.mrf.mxu1  ;;  %v7088_v32 = vld [vmem:[#allocation15_spill] sm:$0xff] }
 0x188   : > { %v3838_v20 = vadd.f32 %v3810_v33, %v5963_v2  ;;  %v6099_v27 = vadd.f32 %v3839_v55, %v5778_v49  ;;  %v3495_v9 = vadd.f32 %v3491_v14, %v3487_v25  ;;  %v3492_v8 = vmul.f32 %v7088_v32, %v1457_v10  ;;  %v964_v11 = vpop.f32.mrf.mxu0  ;;  %v7092_v49 = vld [vmem:[#allocation17_spill] sm:$0xff]  ;;  %v1993_v25 = vpop.permute.xlu0 %1992 }
 0x189   : > { %7085 = vst [vmem:[#allocation45_spill] sm:$0xff] %v6094_v3  ;;  %v3840_v60 = vadd.f32 %v3812_v29, %v5968_v24  ;;  %v3494_v31 = vadd.f32 %v3490_v47, %v3486_v17  ;;  %v3497_v52 = vmul.f32 %v7090_v61, %v964_v11  ;;  %v1461_v2 = vpop.f32.mrf.mxu1  ;;  %v2899_v35 = vsub.f32 1.0, %v2611_v57  ;;  %v7098_v29 = vld [vmem:[#allocation19_spill] sm:$0xff]  ;;  %v7100_v32 = vld [vmem:[#allocation21_spill] sm:$0xff]  ;;  %v7101_v61 = vld [vmem:[#allocation22_spill] sm:$0xff] }
 0x18a   : > { %7087 = vst [vmem:[#allocation46_spill] sm:$0xff] %v6099_v27  ;;  %v6104_v43 = vadd.f32 %v3838_v20, %v5784_v63  ;;  %v3496_v54 = vadd.f32 %v3492_v8, %v3488_v56  ;;  %v3499_v34 = vmul.f32 %v7092_v49, %v1461_v2  ;;  %v966_v62 = vpop.f32.mrf.mxu0  ;;  %v2898_v24 = vsub.f32 1.0, %v2610_v30  ;;  %v7099_v20 = vld [vmem:[#allocation20_spill] sm:$0xff] }
 0x18b   : > { %v6108_v45 = vadd.f32 %v3840_v60, %v5790_v19  ;;  %v3498_v23 = vmul.f32 %v7093_v59, %v966_v62  ;;  %v1463_v18 = vpop.f32.mrf.mxu1  ;;  %v7094_v63 = vsub.f32 1.0, %v6035_v41  ;;  %v7095_v17 = vsub.f32 1.0, %v6038_v44 }
 0x18c   : > { %7089 = vst [vmem:[#allocation47_spill] sm:$0xff] %v6104_v43  ;;  %v7096_v19 = vsub.f32 1.0, %v6041_v58  ;;  %v3500_v56 = vmul.f32 %v5732_v4, %v1463_v18  ;;  %v970_v7 = vpop.f32.mrf.mxu0  ;;  %v6127_v30 = vmax.f32 %v7097_v46, 0.0  ;;  %v2324_v41 = vsub.f32 %v6057_v16, %v4685_v42  ;;  %v1998_v4 = vpop.permute.xlu1 %1997  ;;  %v7102_v18 = vld [vmem:[#allocation23_spill] sm:$0xff]  ;;  %v7103_v46 = vld [vmem:[#allocation24_spill] sm:$0xff] }
 0x18d   : > { %7091 = vst [vmem:[#allocation48_spill] sm:$0xff] %v6108_v45  ;;  %v6114_v33 = vmax.f32 %v7094_v63, 0.0  ;;  %v6118_v51 = vmax.f32 %v7095_v17, 0.0  ;;  %v2325_v55 = vsub.f32 %v1993_v25, %v4670_v38  ;;  %v3501_v44 = vmul.f32 %v7098_v29, %v970_v7  ;;  %v1467_v12 = vpop.f32.mrf.mxu1 }
 0x18e   : > { %v6122_v57 = vmax.f32 %v7096_v19, 0.0  ;;  %v6133_v14 = vmax.f32 %v2894_v5, 0.0  ;;  %v6135_v58 = vmax.f32 %v2896_v22, 0.0  ;;  %v6137_v1 = vmax.f32 %v2897_v26, 0.0  ;;  %v972_v0 = vpop.f32.mrf.mxu0 }
 0x18f   : > { %v3503_v36 = vmul.f32 %v7099_v20, %v1467_v12  ;;  %v6140_v47 = vmax.f32 %v2899_v35, 0.0  ;;  %v6142_v10 = vmax.f32 %v2898_v24, 0.0  ;;  %v2327_v16 = vsub.f32 %v1993_v25, %v4674_v39  ;;  %v1469_v11 = vpop.f32.mrf.mxu1  ;;  %v7104_v12 = vld [vmem:[#allocation25_spill] sm:$0xff] }
 0x190   : > { %v3505_v60 = vadd.f32 %v3501_v44, %v3497_v52  ;;  %v3502_v8 = vmul.f32 %v7100_v32, %v972_v0  ;;  %v2326_v5 = vsub.f32 %v1993_v25, %v4678_v40  ;;  %v2328_v22 = vsub.f32 %v1993_v25, %v4685_v42  ;;  %v976_v49 = vpop.f32.mrf.mxu0  ;;  %v7105_v0 = vld [vmem:[#allocation26_spill] sm:$0xff] }
 0x191   : > { %v3507_v26 = vadd.f32 %v3503_v36, %v3499_v34  ;;  %v3504_v2 = vmul.f32 %v7101_v61, %v1469_v11  ;;  %v2612_v62 = vand.u32 2147483647, %v2324_v41  ;;  %v2613_v59 = vand.u32 2147483647, %v2325_v55  ;;  %v1473_v17 = vpop.f32.mrf.mxu1 }
 0x192   : > { %v6149_v35 = vadd.f32 %v3505_v60, %v3493_v53  ;;  %v3506_v24 = vadd.f32 %v3502_v8, %v3498_v23  ;;  %v3509_v63 = vmul.f32 %v7102_v18, %v976_v49  ;;  %v2329_v52 = vsub.f32 %v1998_v4, %v4670_v38  ;;  %v978_v25 = vpop.f32.mrf.mxu0  ;;  %v6159_v23 = vpop.permute.xlu1 %2007  ;;  %v7106_v8 = vld [vmem:[#allocation27_spill] sm:$0xff] }
 0x193   : > { %v6153_v19 = vadd.f32 %v3507_v26, %v3495_v9  ;;  %v3508_v7 = vadd.f32 %v3504_v2, %v3500_v56  ;;  %v3511_v29 = vmul.f32 %v7103_v46, %v1473_v17  ;;  %v2615_v34 = vand.u32 2147483647, %v2327_v16  ;;  %v1475_v55 = vpop.f32.mrf.mxu1 }
 0x194   : > { %v6156_v44 = vadd.f32 %v3506_v24, %v3494_v31  ;;  %v3510_v41 = vmul.f32 %v7104_v12, %v978_v25  ;;  %v2614_v53 = vand.u32 2147483647, %v2326_v5  ;;  %v2616_v20 = vand.u32 2147483647, %v2328_v22  ;;  %v982_v9 = vpop.f32.mrf.mxu0  ;;  %v6168_v5 = vpop.permute.xlu0 %2002  ;;  %v7107_v22 = vld [vmem:[#allocation28_spill] sm:$0xff] }
 0x195   : > { %v6161_v36 = vadd.f32 %v3508_v7, %v3496_v54  ;;  %v3512_v60 = vmul.f32 %v7105_v0, %v1475_v55  ;;  %v2331_v56 = vsub.f32 %v1998_v4, %v4674_v39  ;;  %v2330_v32 = vsub.f32 %v1998_v4, %v4678_v40  ;;  %v1479_v31 = vpop.f32.mrf.mxu1  ;;  %v7108_v7 = vld [vmem:[#allocation29_spill] sm:$0xff] }
 0x196   : > { %v3513_v16 = vmul.f32 %v7106_v8, %v982_v9  ;;  %v2900_v11 = vsub.f32 1.0, %v2612_v62  ;;  %v2617_v26 = vand.u32 2147483647, %v2329_v52  ;;  %v2332_v61 = vsub.f32 %v1998_v4, %v4685_v42  ;;  %v984_v54 = vpop.f32.mrf.mxu0 }
 0x197   : > { %v3515_v2 = vmul.f32 %v7107_v22, %v1479_v31  ;;  %v2901_v49 = vsub.f32 1.0, %v2613_v59  ;;  %v2619_v24 = vand.u32 2147483647, %v2331_v56  ;;  %v2618_v18 = vand.u32 2147483647, %v2330_v32  ;;  %v1481_v25 = vpop.f32.mrf.mxu1 }
 0x198   : > { %v3517_v17 = vadd.f32 %v3513_v16, %v3509_v63  ;;  %v3514_v46 = vmul.f32 %v7108_v7, %v984_v54  ;;  %v2903_v12 = vsub.f32 1.0, %v2615_v34  ;;  %v2333_v55 = vsub.f32 %v6168_v5, %v4670_v38  ;;  %v988_v4 = vpop.f32.mrf.mxu0  ;;  %v6178_v63 = vpop.permute.xlu1 %2017 }
 0x199   : > { %v3519_v62 = vadd.f32 %v3515_v2, %v3511_v29  ;;  %v3516_v52 = vmul.f32 %v5913_v28, %v1481_v25  ;;  %v2902_v0 = vsub.f32 1.0, %v2614_v53  ;;  %v2904_v9 = vsub.f32 1.0, %v2616_v20  ;;  %v1485_v59 = vpop.f32.mrf.mxu1  ;;  %v7109_v2 = vld [vmem:[#allocation30_spill] sm:$0xff]  ;;  %v7110_v20 = vld [vmem:[#allocation31_spill] sm:$0xff] }
 0x19a   : > { %v3518_v8 = vadd.f32 %v3514_v46, %v3510_v41  ;;  %v3521_v31 = vmul.f32 %v5915_v15, %v988_v4  ;;  %v2905_v56 = vsub.f32 1.0, %v2617_v26  ;;  %v6176_v32 = vand.u32 2147483647, %v2332_v61  ;;  %v990_v22 = vpop.f32.mrf.mxu0 }
 0x19b   : > { %v3520_v16 = vadd.f32 %v3516_v52, %v3512_v60  ;;  %v3523_v34 = vmul.f32 %v5921_v13, %v1485_v59  ;;  %v2907_v54 = vsub.f32 1.0, %v2619_v24  ;;  %v2906_v29 = vsub.f32 1.0, %v2618_v18  ;;  %v1487_v7 = vpop.f32.mrf.mxu1  ;;  %v7111_v24 = vld [vmem:[#allocation32_spill] sm:$0xff] }
 0x19c   : > { %v3522_v28 = vmul.f32 %v7109_v2, %v990_v22  ;;  %v6182_v53 = vmax.f32 %v2900_v11, 0.0  ;;  %v6184_v41 = vmax.f32 %v2901_v49, 0.0  ;;  %v6186_v15 = vand.u32 2147483647, %v2333_v55  ;;  %v994_v61 = vpop.f32.mrf.mxu0  ;;  %v7112_v55 = vld [vmem:[#allocation33_spill] sm:$0xff] }
 0x19d   : > { %v3524_v26 = vmul.f32 %v7110_v20, %v1487_v7  ;;  %v6189_v46 = vmax.f32 %v2903_v12, 0.0  ;;  %v6191_v60 = vmax.f32 %v2902_v0, 0.0  ;;  %v2335_v13 = vsub.f32 %v6168_v5, %v4674_v39  ;;  %v1491_v25 = vpop.f32.mrf.mxu1  ;;  %v7113_v7 = vld [vmem:[#allocation34_spill] sm:$0xff] }
 0x19e   : > { %v3525_v18 = vmul.f32 %v7111_v24, %v994_v61  ;;  %v6196_v52 = vmax.f32 %v2904_v9, 0.0  ;;  %v6198_v11 = vmax.f32 %v2905_v56, 0.0  ;;  %v3527_v4 = vmul.f32 %v7112_v55, %v1491_v25  ;;  %v996_v59 = vpop.f32.mrf.mxu0  ;;  %v6212_v24 = vpop.permute.xlu1 %2027 }
 0x19f   : > { %v6202_v22 = vmax.f32 %v2907_v54, 0.0  ;;  %v6204_v12 = vmax.f32 %v2906_v29, 0.0  ;;  %v2334_v0 = vsub.f32 %v6168_v5, %v4678_v40  ;;  %v3526_v20 = vmul.f32 %v7113_v7, %v996_v59  ;;  %v1493_v61 = vpop.f32.mrf.mxu1 }
 0x1a0   : > { %v3529_v2 = vadd.f32 %v3525_v18, %v3521_v31  ;;  %v2909_v9 = vsub.f32 1.0, %v6186_v15  ;;  %v2336_v56 = vsub.f32 %v6168_v5, %v4685_v42  ;;  %v3531_v25 = vadd.f32 %v3527_v4, %v3523_v34  ;;  %v1000_v55 = vpop.f32.mrf.mxu0 }
 0x1a1   : > { %v3528_v54 = vmul.f32 %v5982_v6, %v1493_v61  ;;  %v2623_v29 = vand.u32 2147483647, %v2335_v13  ;;  %v2337_v49 = vsub.f32 %v6159_v23, %v4670_v38  ;;  %v3530_v31 = vadd.f32 %v3526_v20, %v3522_v28  ;;  %v1497_v59 = vpop.f32.mrf.mxu1 }
 0x1a2   : > { %v3761_v45 = vadd.f32 %v3529_v2, %v3517_v17  ;;  %v3533_v18 = vmul.f32 %v5984_v48, %v1000_v55  ;;  %v2339_v15 = vsub.f32 %v6159_v23, %v4674_v39  ;;  %v3763_v7 = vadd.f32 %v3531_v25, %v3519_v62  ;;  %v1002_v34 = vpop.f32.mrf.mxu0  ;;  %v6229_v25 = vpop.permute.xlu0 %2012 }
 0x1a3   : > { %v3532_v5 = vadd.f32 %v3528_v54, %v3524_v26  ;;  %v3535_v43 = vmul.f32 %v5987_v21, %v1497_v59  ;;  %v2622_v4 = vand.u32 2147483647, %v2334_v0  ;;  %v3762_v13 = vadd.f32 %v3530_v31, %v3518_v8  ;;  %v1499_v17 = vpop.f32.mrf.mxu1  ;;  %v7118_v31 = vld [vmem:[#allocation37_spill] sm:$0xff] }
 0x1a4   : > { %v6222_v6 = vadd.f32 %v3761_v45, %v6149_v35  ;;  %v3534_v61 = vmul.f32 %v5989_v37, %v1002_v34  ;;  %v2624_v28 = vand.u32 2147483647, %v2336_v56  ;;  %v6226_v48 = vadd.f32 %v3763_v7, %v6153_v19  ;;  %v1006_v62 = vpop.f32.mrf.mxu0  ;;  %v7114_v45 = vld [vmem:[#allocation35_spill] sm:$0xff]  ;;  %v6237_v56 = vpop.permute.xlu1 %2037 }
 0x1a5   : > { %v3764_v2 = vadd.f32 %v3532_v5, %v3520_v16  ;;  %v3536_v20 = vmul.f32 %v5994_v50, %v1499_v17  ;;  %v2625_v26 = vand.u32 2147483647, %v2337_v49  ;;  %v6232_v21 = vadd.f32 %v3762_v13, %v6156_v44  ;;  %v1503_v8 = vpop.f32.mrf.mxu1  ;;  %7115 = vst [vmem:[#allocation49_spill] sm:$0xff] %v6237_v56  ;;  %v7117_v50 = vld [vmem:[#allocation36_spill] sm:$0xff]  ;;  %v7119_v13 = vld [vmem:[#allocation38_spill] sm:$0xff] }
 0x1a6   : > { %v3537_v35 = vmul.f32 %v7114_v45, %v1006_v62  ;;  %v2627_v0 = vand.u32 2147483647, %v2339_v15  ;;  %v2338_v37 = vsub.f32 %v6159_v23, %v4678_v40  ;;  %v3539_v16 = vmul.f32 %v7117_v50, %v1503_v8  ;;  %v1008_v49 = vpop.f32.mrf.mxu0  ;;  %v7120_v8 = vld [vmem:[#allocation39_spill] sm:$0xff] }
 0x1a7   : > { %v6240_v19 = vadd.f32 %v3764_v2, %v6161_v36  ;;  %v2340_v54 = vsub.f32 %v6159_v23, %v4685_v42  ;;  %v2341_v44 = vsub.f32 %v6229_v25, %v4670_v38  ;;  %v3538_v59 = vmul.f32 %v7118_v31, %v1008_v49  ;;  %v1505_v15 = vpop.f32.mrf.mxu1 }
 0x1a8   : > { %v3541_v55 = vadd.f32 %v3537_v35, %v3533_v18  ;;  %v2911_v7 = vsub.f32 1.0, %v2623_v29  ;;  %v2910_v5 = vsub.f32 1.0, %v2622_v4  ;;  %v3543_v34 = vadd.f32 %v3539_v16, %v3535_v43  ;;  %v1012_v36 = vpop.f32.mrf.mxu0  ;;  %v7122_v43 = vld [vmem:[#allocation41_spill] sm:$0xff] }
 0x1a9   : > { %7116 = vst [vmem:[#allocation50_spill] sm:$0xff] %v6240_v19  ;;  %v3540_v17 = vmul.f32 %v7119_v13, %v1505_v15  ;;  %v2912_v2 = vsub.f32 1.0, %v2624_v28  ;;  %v2913_v62 = vsub.f32 1.0, %v2625_v26  ;;  %v3542_v45 = vadd.f32 %v3538_v59, %v3534_v61  ;;  %v1509_v27 = vpop.f32.mrf.mxu1  ;;  %v7121_v19 = vld [vmem:[#allocation40_spill] sm:$0xff]  ;;  %v7126_v59 = vld [vmem:[#allocation43_spill] sm:$0xff] }
 0x1aa   : > { %v3545_v50 = vmul.f32 %v7120_v8, %v1012_v36  ;;  %v2915_v23 = vsub.f32 1.0, %v2627_v0  ;;  %v2626_v3 = vand.u32 2147483647, %v2338_v37  ;;  %v3547_v18 = vmul.f32 %v7121_v19, %v1509_v27  ;;  %v1014_v35 = vpop.f32.mrf.mxu0  ;;  %v7125_v27 = vld [vmem:[#allocation42_spill] sm:$0xff]  ;;  %v6278_v36 = vpop.permute.xlu0 %2022  ;;  %v7127_v8 = vld [vmem:[#allocation44_spill] sm:$0xff] }
 0x1ab   : > { %v3544_v56 = vadd.f32 %v3540_v17, %v3536_v20  ;;  %v6251_v49 = vand.u32 2147483647, %v2340_v54  ;;  %v6253_v29 = vand.u32 2147483647, %v2341_v44  ;;  %v3546_v4 = vmul.f32 %v7122_v43, %v1014_v35  ;;  %v1511_v16 = vpop.f32.mrf.mxu1  ;;  %v6264_v20 = vpop.permute.xlu1 %2047 }
 0x1ac   : > { %v7123_v28 = vsub.f32 1.0, %v6176_v32  ;;  %v6260_v61 = vmax.f32 %v2909_v9, 0.0  ;;  %v2343_v0 = vsub.f32 %v6229_v25, %v4674_v39  ;;  %7124 = vst [vmem:[#allocation51_spill] sm:$0xff] %v6264_v20  ;;  %v3548_v37 = vmul.f32 %v7125_v27, %v1511_v16  ;;  %v1018_v19 = vpop.f32.mrf.mxu0 }
 0x1ad   : > { %v6267_v54 = vmax.f32 %v2911_v7, 0.0  ;;  %v6269_v44 = vmax.f32 %v2910_v5, 0.0  ;;  %v6271_v31 = vmax.f32 %v2912_v2, 0.0  ;;  %v3549_v32 = vmul.f32 %v7126_v59, %v1018_v19  ;;  %v1515_v15 = vpop.f32.mrf.mxu1 }
 0x1ae   : > { %v6258_v26 = vmax.f32 %v7123_v28, 0.0  ;;  %v6274_v13 = vmax.f32 %v2913_v62, 0.0  ;;  %v6276_v9 = vmax.f32 %v2915_v23, 0.0  ;;  %v2914_v17 = vsub.f32 1.0, %v2626_v3  ;;  %v1020_v43 = vpop.f32.mrf.mxu0 }
 0x1af   : > { %v3551_v35 = vmul.f32 %v7127_v8, %v1515_v15  ;;  %v2342_v2 = vsub.f32 %v6229_v25, %v4678_v40  ;;  %v3553_v16 = vadd.f32 %v3549_v32, %v3545_v50  ;;  %v3550_v28 = vmul.f32 %v6114_v33, %v1020_v43  ;;  %v1517_v62 = vpop.f32.mrf.mxu1 }
 0x1b0   : > { %v6286_v27 = vand.u32 2147483647, %v2343_v0  ;;  %v2344_v3 = vsub.f32 %v6229_v25, %v4685_v42  ;;  %v3552_v19 = vmul.f32 %v6118_v51, %v1517_v62  ;;  %v1024_v59 = vpop.f32.mrf.mxu0  ;;  %v2345_v15 = vsub.f32 %v6178_v63, %v4670_v38  ;;  %v6300_v25 = vpop.permute.xlu1 %2057 }
 0x1b1   : > { %v3555_v23 = vadd.f32 %v3551_v35, %v3547_v18  ;;  %v2347_v8 = vsub.f32 %v6178_v63, %v4674_v39  ;;  %v6295_v5 = vadd.f32 %v3553_v16, %v3541_v55  ;;  %v3554_v50 = vadd.f32 %v3550_v28, %v3546_v4  ;;  %v1521_v0 = vpop.f32.mrf.mxu1  ;;  %7128 = vst [vmem:[#allocation52_spill] sm:$0xff] %v6300_v25  ;;  %v6310_v28 = vpop.permute.xlu0 %2032 }
 0x1b2   : > { %v3557_v33 = vmul.f32 %v6122_v57, %v1024_v59  ;;  %v2346_v32 = vsub.f32 %v6178_v63, %v4678_v40  ;;  %v3556_v51 = vadd.f32 %v3552_v19, %v3548_v37  ;;  %v3559_v35 = vmul.f32 %v6127_v30, %v1521_v0  ;;  %v1026_v43 = vpop.f32.mrf.mxu0 }
 0x1b3   : > { %v6302_v18 = vadd.f32 %v3555_v23, %v3543_v34  ;;  %v2630_v62 = vand.u32 2147483647, %v2342_v2  ;;  %v6305_v7 = vadd.f32 %v3554_v50, %v3542_v45  ;;  %v3558_v55 = vmul.f32 %v6133_v14, %v1026_v43  ;;  %v1523_v4 = vpop.f32.mrf.mxu1 }
 0x1b4   : > { %v6308_v16 = vmax.f32 %v2914_v17, 0.0  ;;  %v2632_v57 = vand.u32 2147483647, %v2344_v3  ;;  %v6312_v59 = vadd.f32 %v3556_v51, %v3544_v56  ;;  %v3560_v34 = vmul.f32 %v6135_v58, %v1523_v4  ;;  %v1030_v23 = vpop.f32.mrf.mxu0 }
 0x1b5   : > { %v2633_v37 = vand.u32 2147483647, %v2345_v15  ;;  %v2348_v30 = vsub.f32 %v6178_v63, %v4685_v42  ;;  %v3561_v45 = vmul.f32 %v6137_v1, %v1030_v23  ;;  %v1527_v2 = vpop.f32.mrf.mxu1  ;;  %v2635_v19 = vand.u32 2147483647, %v2347_v8  ;;  %v6325_v8 = vpop.permute.xlu1 %2067 }
 0x1b6   : > { %v2634_v14 = vand.u32 2147483647, %v2346_v32  ;;  %v2349_v17 = vsub.f32 %v6278_v36, %v4670_v38  ;;  %v3563_v3 = vmul.f32 %v6140_v47, %v1527_v2  ;;  %v1032_v50 = vpop.f32.mrf.mxu0  ;;  %v2919_v56 = vsub.f32 1.0, %v6286_v27  ;;  %7129 = vst [vmem:[#allocation53_spill] sm:$0xff] %v6325_v8 }
 0x1b7   : > { %v2918_v0 = vsub.f32 1.0, %v2630_v62  ;;  %v2636_v58 = vand.u32 2147483647, %v2348_v30  ;;  %v3565_v51 = vadd.f32 %v3561_v45, %v3557_v33  ;;  %v3562_v15 = vmul.f32 %v6142_v10, %v1032_v50  ;;  %v1529_v43 = vpop.f32.mrf.mxu1  ;;  %v6329_v10 = vpop.permute.xlu0 %2042 }
 0x1b8   : > { %v2637_v63 = vand.u32 2147483647, %v2349_v17  ;;  %v2351_v1 = vsub.f32 %v6278_v36, %v4674_v39  ;;  %v3567_v32 = vadd.f32 %v3563_v3, %v3559_v35  ;;  %v3564_v4 = vmul.f32 %v6182_v53, %v1529_v43  ;;  %v1036_v23 = vpop.f32.mrf.mxu0 }
 0x1b9   : > { %v2920_v47 = vsub.f32 1.0, %v2632_v57  ;;  %v2921_v2 = vsub.f32 1.0, %v2633_v37  ;;  %v3566_v25 = vadd.f32 %v3562_v15, %v3558_v55  ;;  %v3569_v27 = vmul.f32 %v6184_v41, %v1036_v23  ;;  %v1533_v62 = vpop.f32.mrf.mxu1 }
 0x1ba   : > { %v2923_v33 = vsub.f32 1.0, %v2635_v19  ;;  %v2922_v30 = vsub.f32 1.0, %v2634_v14  ;;  %v3568_v45 = vadd.f32 %v3564_v4, %v3560_v34  ;;  %v3571_v17 = vmul.f32 %v6189_v46, %v1533_v62  ;;  %v1038_v50 = vpop.f32.mrf.mxu0 }
 0x1bb   : > { %v2924_v20 = vsub.f32 1.0, %v2636_v58  ;;  %v2925_v8 = vsub.f32 1.0, %v2637_v63  ;;  %v3570_v35 = vmul.f32 %v6191_v60, %v1038_v50  ;;  %v1535_v53 = vpop.f32.mrf.mxu1  ;;  %v7130_v57 = vsub.f32 1.0, %v6251_v49  ;;  %v6357_v63 = vpop.permute.xlu1 %2077 }
 0x1bc   : > { %v7131_v41 = vsub.f32 1.0, %v6253_v29  ;;  %v6341_v19 = vand.u32 2147483647, %v2351_v1  ;;  %v3572_v34 = vmul.f32 %v6196_v52, %v1535_v53  ;;  %v1042_v14 = vpop.f32.mrf.mxu0  ;;  %v6344_v46 = vmax.f32 %v2919_v56, 0.0 }
 0x1bd   : > { %v6335_v37 = vmax.f32 %v7130_v57, 0.0  ;;  %v6346_v3 = vmax.f32 %v2918_v0, 0.0  ;;  %v2350_v60 = vsub.f32 %v6278_v36, %v4678_v40  ;;  %v3573_v49 = vmul.f32 %v6198_v11, %v1042_v14  ;;  %v1539_v58 = vpop.f32.mrf.mxu1 }
 0x1be   : > { %v6339_v55 = vmax.f32 %v7131_v41, 0.0  ;;  %v6351_v15 = vmax.f32 %v2920_v47, 0.0  ;;  %v6353_v29 = vmax.f32 %v2921_v2, 0.0  ;;  %v6355_v43 = vmax.f32 %v2923_v33, 0.0  ;;  %v1044_v56 = vpop.f32.mrf.mxu0  ;;  %v6370_v33 = vpop.permute.xlu0 %2052 }
 0x1bf   : > { %v3575_v52 = vmul.f32 %v6202_v22, %v1539_v58  ;;  %v6360_v1 = vmax.f32 %v2922_v30, 0.0  ;;  %v6362_v0 = vmax.f32 %v2924_v20, 0.0  ;;  %v6364_v4 = vmax.f32 %v2925_v8, 0.0  ;;  %v1541_v47 = vpop.f32.mrf.mxu1 }
 0x1c0   : > { %v3577_v23 = vadd.f32 %v3573_v49, %v3569_v27  ;;  %v3574_v11 = vmul.f32 %v6204_v12, %v1044_v56  ;;  %v2927_v2 = vsub.f32 1.0, %v6341_v19  ;;  %v2352_v62 = vsub.f32 %v6278_v36, %v4685_v42  ;;  %v1048_v30 = vpop.f32.mrf.mxu0 }
 0x1c1   : > { %v3579_v50 = vadd.f32 %v3575_v52, %v3571_v17  ;;  %v3576_v22 = vmul.f32 %v6258_v26, %v1541_v47  ;;  %v6373_v53 = vand.u32 2147483647, %v2350_v60  ;;  %v2353_v20 = vsub.f32 %v6212_v24, %v4670_v38  ;;  %v1545_v57 = vpop.f32.mrf.mxu1 }
 0x1c2   : > { %v3769_v8 = vadd.f32 %v3577_v23, %v3565_v51  ;;  %v3578_v27 = vadd.f32 %v3574_v11, %v3570_v35  ;;  %v3581_v12 = vmul.f32 %v6260_v61, %v1048_v30  ;;  %v2355_v41 = vsub.f32 %v6212_v24, %v4674_v39  ;;  %v1050_v14 = vpop.f32.mrf.mxu0  ;;  %v6385_v61 = vpop.permute.xlu1 %2087 }
 0x1c3   : > { %v3771_v36 = vadd.f32 %v3579_v50, %v3567_v32  ;;  %v3580_v19 = vadd.f32 %v3576_v22, %v3572_v34  ;;  %v3583_v17 = vmul.f32 %v6267_v54, %v1545_v57  ;;  %v2354_v26 = vsub.f32 %v6212_v24, %v4678_v40  ;;  %v1547_v35 = vpop.f32.mrf.mxu1  ;;  %v6394_v47 = vpop.permute.xlu0 %2062 }
 0x1c4   : > { %v3817_v60 = vadd.f32 %v3769_v8, %v6295_v5  ;;  %v3770_v49 = vadd.f32 %v3578_v27, %v3566_v25  ;;  %v3582_v51 = vmul.f32 %v6269_v44, %v1050_v14  ;;  %v2640_v58 = vand.u32 2147483647, %v2352_v62  ;;  %v1054_v34 = vpop.f32.mrf.mxu0 }
 0x1c5   : > { %v3819_v52 = vadd.f32 %v3771_v36, %v6302_v18  ;;  %v3772_v56 = vadd.f32 %v3580_v19, %v3568_v45  ;;  %v3584_v32 = vmul.f32 %v6271_v31, %v1547_v35  ;;  %v2641_v54 = vand.u32 2147483647, %v2353_v20  ;;  %v1551_v25 = vpop.f32.mrf.mxu1  ;;  %v7132_v20 = vld [vmem:[#allocation50_spill] sm:$0xff] }
 0x1c6   : > { %v6390_v23 = vadd.f32 %v3817_v60, %v6222_v6  ;;  %v3818_v11 = vadd.f32 %v3770_v49, %v6305_v7  ;;  %v3585_v5 = vmul.f32 %v6274_v13, %v1054_v34  ;;  %v2643_v44 = vand.u32 2147483647, %v2355_v41  ;;  %v1056_v45 = vpop.f32.mrf.mxu0 }
 0x1c7   : > { %v6397_v62 = vadd.f32 %v3819_v52, %v6226_v48  ;;  %v3820_v18 = vadd.f32 %v3772_v56, %v6312_v59  ;;  %v3587_v31 = vmul.f32 %v6276_v9, %v1551_v25  ;;  %v2642_v50 = vand.u32 2147483647, %v2354_v26  ;;  %v1553_v13 = vpop.f32.mrf.mxu1 }
 0x1c8   : > { %v6402_v6 = vadd.f32 %v3818_v11, %v6232_v21  ;;  %v3589_v22 = vadd.f32 %v3585_v5, %v3581_v12  ;;  %v3586_v7 = vmul.f32 %v6308_v16, %v1056_v45  ;;  %v2356_v30 = vsub.f32 %v6212_v24, %v4685_v42  ;;  %v1060_v27 = vpop.f32.mrf.mxu0  ;;  %v6413_v16 = vpop.permute.xlu1 %2097 }
 0x1c9   : > { %v6408_v8 = vadd.f32 %v3820_v18, %v7132_v20  ;;  %v3591_v48 = vadd.f32 %v3587_v31, %v3583_v17  ;;  %v3588_v59 = vmul.f32 %v6335_v37, %v1553_v13  ;;  %v2926_v9 = vsub.f32 1.0, %v6373_v53  ;;  %v1557_v41 = vpop.f32.mrf.mxu1  ;;  %7133 = vst [vmem:[#allocation54_spill] sm:$0xff] %v6413_v16 }
 0x1ca   : > { %v3590_v57 = vadd.f32 %v3586_v7, %v3582_v51  ;;  %v3593_v21 = vmul.f32 %v6339_v55, %v1060_v27  ;;  %v2928_v12 = vsub.f32 1.0, %v2640_v58  ;;  %v2929_v36 = vsub.f32 1.0, %v2641_v54  ;;  %v1062_v14 = vpop.f32.mrf.mxu0  ;;  %v6419_v55 = vpop.permute.xlu0 %2072 }
 0x1cb   : > { %v3592_v19 = vadd.f32 %v3588_v59, %v3584_v32  ;;  %v3595_v24 = vmul.f32 %v6344_v46, %v1557_v41  ;;  %v2931_v26 = vsub.f32 1.0, %v2643_v44  ;;  %v2930_v60 = vsub.f32 1.0, %v2642_v50  ;;  %v1559_v37 = vpop.f32.mrf.mxu1  ;;  %v7134_v44 = vld [vmem:[#allocation49_spill] sm:$0xff] }
 0x1cc   : > { %v3594_v17 = vmul.f32 %v6346_v3, %v1062_v14  ;;  %v3215_v49 = vmax.f32 %v2927_v2, 0.0  ;;  %v2644_v35 = vand.u32 2147483647, %v2356_v30  ;;  %v2357_v53 = vsub.f32 %v6310_v28, %v4670_v38  ;;  %v1066_v58 = vpop.f32.mrf.mxu0  ;;  %v6433_v13 = vpop.permute.xlu1 %2107 }
 0x1cd   : > { %v3596_v51 = vmul.f32 %v6351_v15, %v1559_v37  ;;  %v3214_v52 = vmax.f32 %v2926_v9, 0.0  ;;  %v2359_v46 = vsub.f32 %v6310_v28, %v4674_v39  ;;  %v2358_v56 = vsub.f32 %v6310_v28, %v4678_v40  ;;  %v1563_v32 = vpop.f32.mrf.mxu1  ;;  %7135 = vst [vmem:[#allocation55_spill] sm:$0xff] %v6433_v13 }
 0x1ce   : > { %v3597_v3 = vmul.f32 %v6353_v29, %v1066_v58  ;;  %v3216_v2 = vmax.f32 %v2928_v12, 0.0  ;;  %v3217_v34 = vmax.f32 %v2929_v36, 0.0  ;;  %v2360_v54 = vsub.f32 %v6310_v28, %v4685_v42  ;;  %v1068_v5 = vpop.f32.mrf.mxu0  ;;  %v6439_v36 = vpop.permute.xlu0 %2082 }
 0x1cf   : > { %v3599_v11 = vmul.f32 %v6355_v43, %v1563_v32  ;;  %v3219_v15 = vmax.f32 %v2931_v26, 0.0  ;;  %v3218_v25 = vmax.f32 %v2930_v60, 0.0  ;;  %v2361_v18 = vsub.f32 %v7134_v44, %v4670_v38  ;;  %v1565_v50 = vpop.f32.mrf.mxu1 }
 0x1d0   : > { %v3601_v31 = vadd.f32 %v3597_v3, %v3593_v21  ;;  %v3598_v45 = vmul.f32 %v6360_v1, %v1068_v5  ;;  %v2932_v7 = vsub.f32 1.0, %v2644_v35  ;;  %v2645_v29 = vand.u32 2147483647, %v2357_v53  ;;  %v1072_v28 = vpop.f32.mrf.mxu0  ;;  %v6453_v3 = vpop.permute.xlu1 %2117 }
 0x1d1   : > { %v3603_v30 = vadd.f32 %v3599_v11, %v3595_v24  ;;  %v3600_v20 = vmul.f32 %v6362_v0, %v1565_v50  ;;  %v2647_v59 = vand.u32 2147483647, %v2359_v46  ;;  %v2646_v43 = vand.u32 2147483647, %v2358_v56  ;;  %v1569_v12 = vpop.f32.mrf.mxu1  ;;  %7136 = vst [vmem:[#allocation56_spill] sm:$0xff] %v6453_v3 }
 0x1d2   : > { %v6436_v27 = vadd.f32 %v3601_v31, %v3589_v22  ;;  %v3602_v9 = vadd.f32 %v3598_v45, %v3594_v17  ;;  %v3605_v41 = vmul.f32 %v6364_v4, %v1072_v28  ;;  %v2648_v21 = vand.u32 2147483647, %v2360_v54  ;;  %v1074_v60 = vpop.f32.mrf.mxu0 }
 0x1d3   : > { %v6441_v1 = vadd.f32 %v3603_v30, %v3591_v48  ;;  %v3604_v14 = vadd.f32 %v3600_v20, %v3596_v51  ;;  %v3607_v26 = vmul.f32 %v3215_v49, %v1569_v12  ;;  %v2649_v24 = vand.u32 2147483647, %v2361_v18  ;;  %v1571_v35 = vpop.f32.mrf.mxu1 }
 0x1d4   : > { %v6443_v37 = vadd.f32 %v3602_v9, %v3590_v57  ;;  %v3606_v0 = vmul.f32 %v3214_v52, %v1074_v60  ;;  %v2363_v22 = vsub.f32 %v7134_v44, %v4674_v39  ;;  %v2362_v4 = vsub.f32 %v7134_v44, %v4678_v40  ;;  %v1078_v58 = vpop.f32.mrf.mxu0 }
 0x1d5   : > { %v6449_v17 = vadd.f32 %v3604_v14, %v3592_v19  ;;  %v3608_v53 = vmul.f32 %v3216_v2, %v1571_v35  ;;  %v2933_v48 = vsub.f32 1.0, %v2645_v29  ;;  %v2364_v49 = vsub.f32 %v7134_v44, %v4685_v42  ;;  %v1575_v46 = vpop.f32.mrf.mxu1  ;;  %v6455_v29 = vpop.permute.xlu0 %2092 }
 0x1d6   : > { %v3609_v51 = vmul.f32 %v3217_v34, %v1078_v58  ;;  %v3220_v57 = vmax.f32 %v2932_v7, 0.0  ;;  %v2651_v56 = vand.u32 2147483647, %v2363_v22  ;;  %v2650_v52 = vand.u32 2147483647, %v2362_v4  ;;  %v1080_v54 = vpop.f32.mrf.mxu0  ;;  %7137 = vst [vmem:[#allocation57_spill] sm:$0xff] %v6455_v29 }
 0x1d7   : > { %v3611_v32 = vmul.f32 %v3219_v15, %v1575_v46  ;;  %v2935_v11 = vsub.f32 1.0, %v2647_v59  ;;  %v2934_v5 = vsub.f32 1.0, %v2646_v43  ;;  %v2652_v18 = vand.u32 2147483647, %v2364_v49  ;;  %v1577_v2 = vpop.f32.mrf.mxu1 }
 0x1d8   : > { %v3613_v19 = vadd.f32 %v3609_v51, %v3605_v41  ;;  %v3610_v31 = vmul.f32 %v3218_v25, %v1080_v54  ;;  %v2936_v45 = vsub.f32 1.0, %v2648_v21  ;;  %v2937_v50 = vsub.f32 1.0, %v2649_v24  ;;  %v1084_v30 = vpop.f32.mrf.mxu0 }
 0x1d9   : > { %v3615_v44 = vadd.f32 %v3611_v32, %v3607_v26  ;;  %v3612_v34 = vmul.f32 %v3220_v57, %v1577_v2  ;;  %v2939_v7 = vsub.f32 1.0, %v2651_v56  ;;  %v2365_v20 = vsub.f32 %v6329_v10, %v4670_v38  ;;  %v1581_v25 = vpop.f32.mrf.mxu1  ;;  %v7138_v56 = vld [vmem:[#allocation51_spill] sm:$0xff]  ;;  %v6469_v32 = vpop.permute.xlu0 %2102 }
 0x1da   : > { %v3614_v59 = vadd.f32 %v3610_v31, %v3606_v0  ;;  %v2938_v43 = vsub.f32 1.0, %v2650_v52  ;;  %v3221_v41 = vmax.f32 %v2933_v48, 0.0  ;;  %v1086_v12 = vpop.f32.mrf.mxu0  ;;  %v2940_v21 = vsub.f32 1.0, %v2652_v18  ;;  %7139 = vst [vmem:[#allocation58_spill] sm:$0xff] %v6469_v32 }
 0x1db   : > { %v3616_v9 = vadd.f32 %v3612_v34, %v3608_v53  ;;  %v2367_v14 = vsub.f32 %v6329_v10, %v4674_v39  ;;  %v3223_v26 = vmax.f32 %v2935_v11, 0.0  ;;  %v3222_v60 = vmax.f32 %v2934_v5, 0.0  ;;  %v1583_v24 = vpop.f32.mrf.mxu1 }
 0x1dc   : > { %v3225_v35 = vmax.f32 %v2937_v50, 0.0  ;;  %v2366_v22 = vsub.f32 %v6329_v10, %v4678_v40  ;;  %v3617_v4 = vmul.f32 %v3221_v41, %v1084_v30  ;;  %v3224_v58 = vmax.f32 %v2936_v45, 0.0  ;;  %v1090_v49 = vpop.f32.mrf.mxu0 }
 0x1dd   : > { %v3227_v0 = vmax.f32 %v2939_v7, 0.0  ;;  %v2653_v51 = vand.u32 2147483647, %v2365_v20  ;;  %v3619_v46 = vmul.f32 %v3223_v26, %v1581_v25  ;;  %v1587_v48 = vpop.f32.mrf.mxu1  ;;  %v3226_v57 = vmax.f32 %v2938_v43, 0.0 }
 0x1de   : > { %v3621_v53 = vmul.f32 %v3225_v35, %v1090_v49  ;;  %v2369_v52 = vsub.f32 %v7138_v56, %v4670_v38  ;;  %v3618_v54 = vmul.f32 %v3222_v60, %v1086_v12  ;;  %v1092_v5 = vpop.f32.mrf.mxu0  ;;  %v3228_v18 = vmax.f32 %v2940_v21, 0.0 }
 0x1df   : > { %v3623_v11 = vmul.f32 %v3227_v0, %v1587_v48  ;;  %v2655_v31 = vand.u32 2147483647, %v2367_v14  ;;  %v3622_v50 = vmul.f32 %v3226_v57, %v1092_v5  ;;  %v1589_v45 = vpop.f32.mrf.mxu1  ;;  %v2654_v34 = vand.u32 2147483647, %v2366_v22  ;;  %v6482_v48 = vpop.permute.xlu0 %2112 }
 0x1e0   : > { %v3625_v2 = vadd.f32 %v3621_v53, %v3617_v4  ;;  %v2368_v30 = vsub.f32 %v6329_v10, %v4685_v42  ;;  %v3620_v7 = vmul.f32 %v3224_v58, %v1583_v24  ;;  %v3624_v25 = vmul.f32 %v3228_v18, %v1589_v45  ;;  %v1096_v43 = vpop.f32.mrf.mxu0 }
 0x1e1   : > { %v3627_v20 = vadd.f32 %v3623_v11, %v3619_v46  ;;  %v2371_v41 = vsub.f32 %v7138_v56, %v4674_v39  ;;  %v3626_v21 = vadd.f32 %v3622_v50, %v3618_v54  ;;  %v1593_v14 = vpop.f32.mrf.mxu1  ;;  %v2657_v60 = vand.u32 2147483647, %v2369_v52 }
 0x1e2   : > { %v3777_v26 = vadd.f32 %v3625_v2, %v3613_v19  ;;  %v3628_v4 = vadd.f32 %v3624_v25, %v3620_v7  ;;  %v2941_v22 = vsub.f32 1.0, %v2653_v51  ;;  %v1098_v49 = vpop.f32.mrf.mxu0  ;;  %v2370_v10 = vsub.f32 %v7138_v56, %v4678_v40 }
 0x1e3   : > { %v3779_v35 = vadd.f32 %v3627_v20, %v3615_v44  ;;  %v3778_v58 = vadd.f32 %v3626_v21, %v3614_v59  ;;  %v2943_v0 = vsub.f32 1.0, %v2655_v31  ;;  %v1595_v46 = vpop.f32.mrf.mxu1  ;;  %v2656_v53 = vand.u32 2147483647, %v2368_v30 }
 0x1e4   : > { %v6480_v24 = vadd.f32 %v3777_v26, %v6436_v27  ;;  %v3780_v57 = vadd.f32 %v3628_v4, %v3616_v9  ;;  %v2942_v44 = vsub.f32 1.0, %v2654_v34  ;;  %v1102_v52 = vpop.f32.mrf.mxu0  ;;  %v2659_v51 = vand.u32 2147483647, %v2371_v41 }
 0x1e5   : > { %v6485_v19 = vadd.f32 %v3779_v35, %v6441_v1  ;;  %v6490_v11 = vadd.f32 %v3778_v58, %v6443_v37  ;;  %v2945_v27 = vsub.f32 1.0, %v2657_v60  ;;  %v1599_v59 = vpop.f32.mrf.mxu1  ;;  %v2372_v5 = vsub.f32 %v7138_v56, %v4685_v42  ;;  %v7140_v35 = vld [vmem:[#allocation52_spill] sm:$0xff] }
 0x1e6   : > { %v6495_v18 = vadd.f32 %v3780_v57, %v6449_v17  ;;  %v1104_v1 = vpop.f32.mrf.mxu0  ;;  %v2658_v31 = vand.u32 2147483647, %v2370_v10  ;;  %v2373_v9 = vsub.f32 %v6370_v33, %v4670_v38  ;;  %v2375_v2 = vsub.f32 %v6370_v33, %v4674_v39 }
 0x1e7   : > { %v3229_v50 = vmax.f32 %v2941_v22, 0.0  ;;  %v3231_v45 = vmax.f32 %v2943_v0, 0.0  ;;  %v2944_v34 = vsub.f32 1.0, %v2656_v53  ;;  %v1601_v30 = vpop.f32.mrf.mxu1  ;;  %v3230_v7 = vmax.f32 %v2942_v44, 0.0 }
 0x1e8   : > { %v2947_v56 = vsub.f32 1.0, %v2659_v51  ;;  %v2660_v20 = vand.u32 2147483647, %v2372_v5  ;;  %v1108_v17 = vpop.f32.mrf.mxu0  ;;  %v2374_v25 = vsub.f32 %v6370_v33, %v4678_v40  ;;  %v3233_v41 = vmax.f32 %v2945_v27, 0.0 }
 0x1e9   : > { %v2661_v26 = vand.u32 2147483647, %v2373_v9  ;;  %v1605_v21 = vpop.f32.mrf.mxu1  ;;  %v2663_v60 = vand.u32 2147483647, %v2375_v2  ;;  %v2377_v4 = vsub.f32 %v7140_v35, %v4670_v38  ;;  %v3629_v10 = vmul.f32 %v3229_v50, %v1096_v43 }
 0x1ea   : > { %v2946_v58 = vsub.f32 1.0, %v2658_v31  ;;  %v6507_v22 = vpop.f32.mrf.mxu0  ;;  %v2376_v0 = vsub.f32 %v6370_v33, %v4685_v42  ;;  %v2379_v53 = vsub.f32 %v7140_v35, %v4674_v39  ;;  %v3631_v57 = vmul.f32 %v3231_v45, %v1593_v14 }
 0x1eb   : > { %v3232_v44 = vmax.f32 %v2944_v34, 0.0  ;;  %v3633_v51 = vmul.f32 %v3233_v41, %v1102_v52  ;;  %v6513_v27 = vpop.f32.mrf.mxu1  ;;  %v2665_v5 = vand.u32 2147483647, %v2377_v4  ;;  %v3235_v9 = vmax.f32 %v2947_v56, 0.0 }
 0x1ec   : > { %v2948_v2 = vsub.f32 1.0, %v2660_v20  ;;  %v2662_v54 = vand.u32 2147483647, %v2374_v25  ;;  %v1114_v28 = vpop.f32.mrf.mxu0  ;;  %v2667_v43 = vand.u32 2147483647, %v2379_v53  ;;  %v2949_v31 = vsub.f32 1.0, %v2661_v26 }
 0x1ed   : > { %v2951_v50 = vsub.f32 1.0, %v2663_v60  ;;  %v2953_v12 = vsub.f32 1.0, %v2665_v5  ;;  %v1611_v15 = vpop.f32.mrf.mxu1  ;;  %v2378_v33 = vsub.f32 %v7140_v35, %v4678_v40  ;;  %v3630_v37 = vmul.f32 %v3230_v7, %v1098_v49 }
 0x1ee   : > { %v3632_v3 = vmul.f32 %v3232_v44, %v1595_v46  ;;  %v3234_v14 = vmax.f32 %v2946_v58, 0.0  ;;  %v2664_v45 = vand.u32 2147483647, %v2376_v0  ;;  %v1116_v52 = vpop.f32.mrf.mxu0  ;;  %v3637_v34 = vadd.f32 %v3633_v51, %v3629_v10 }
 0x1ef   : > { %v3635_v41 = vmul.f32 %v3235_v9, %v1599_v59  ;;  %v2955_v4 = vsub.f32 1.0, %v2667_v43  ;;  %v2666_v56 = vand.u32 2147483647, %v2378_v33  ;;  %v1613_v20 = vpop.f32.mrf.mxu1  ;;  %v3236_v13 = vmax.f32 %v2948_v2, 0.0 }
 0x1f0   : > { %v3634_v25 = vmul.f32 %v3234_v14, %v1104_v1  ;;  %v2950_v53 = vsub.f32 1.0, %v2662_v54  ;;  %v2380_v26 = vsub.f32 %v7140_v35, %v4685_v42  ;;  %v6519_v60 = vpop.f32.mrf.mxu0  ;;  %v3237_v5 = vmax.f32 %v2949_v31, 0.0 }
 0x1f1   : > { %v3239_v32 = vmax.f32 %v2951_v50, 0.0  ;;  %v3241_v49 = vmax.f32 %v2953_v12, 0.0  ;;  %v2381_v46 = vsub.f32 %v6394_v47, %v4670_v38  ;;  %v6523_v7 = vpop.f32.mrf.mxu1  ;;  %v3636_v59 = vmul.f32 %v3236_v13, %v1601_v30 }
 0x1f2   : > { %v2952_v10 = vsub.f32 1.0, %v2664_v45  ;;  %v2668_v58 = vand.u32 2147483647, %v2380_v26  ;;  %v2383_v1 = vsub.f32 %v6394_v47, %v4674_v39  ;;  %v6527_v54 = vpop.f32.mrf.mxu0  ;;  %v3243_v35 = vmax.f32 %v2955_v4, 0.0 }
 0x1f3   : > { %v3645_v0 = vmul.f32 %v3241_v49, %v1114_v28  ;;  %v2954_v44 = vsub.f32 1.0, %v2666_v56  ;;  %v2382_v51 = vsub.f32 %v6394_v47, %v4678_v40  ;;  %v6531_v12 = vpop.f32.mrf.mxu1  ;;  %v3639_v9 = vadd.f32 %v3635_v41, %v3631_v57 }
 0x1f4   : > { %v6533_v2 = vadd.f32 %v3634_v25, %v3630_v37  ;;  %v3238_v43 = vmax.f32 %v2950_v53, 0.0  ;;  %v2384_v13 = vsub.f32 %v6394_v47, %v4685_v42  ;;  %v6537_v30 = vpop.f32.mrf.mxu0  ;;  %v3641_v31 = vmul.f32 %v3237_v5, %v1108_v17  ;;  %v7141_v47 = vld [vmem:[#allocation53_spill] sm:$0xff] }
 0x1f5   : > { %v3643_v50 = vmul.f32 %v3239_v32, %v1605_v21  ;;  %v3647_v33 = vmul.f32 %v3243_v35, %v1611_v15  ;;  %v2669_v28 = vand.u32 2147483647, %v2381_v46  ;;  %v6539_v14 = vpop.f32.mrf.mxu1  ;;  %v6541_v45 = vadd.f32 %v3636_v59, %v3632_v3 }
 0x1f6   : > { %v3240_v4 = vmax.f32 %v2952_v10, 0.0  ;;  %v2956_v56 = vsub.f32 1.0, %v2668_v58  ;;  %v2671_v26 = vand.u32 2147483647, %v2383_v1  ;;  %v6543_v57 = vpop.f32.mrf.mxu0  ;;  %v3649_v37 = vadd.f32 %v3645_v0, %v3641_v31 }
 0x1f7   : > { %v3242_v41 = vmax.f32 %v2954_v44, 0.0  ;;  %v2670_v25 = vand.u32 2147483647, %v2382_v51  ;;  %v2385_v53 = vsub.f32 %v7141_v47, %v4670_v38  ;;  %v6547_v49 = vpop.f32.mrf.mxu1  ;;  %v3642_v15 = vmul.f32 %v3238_v43, %v6507_v22 }
 0x1f8   : > { %v3644_v32 = vmul.f32 %v3240_v4, %v6513_v27  ;;  %v2672_v17 = vand.u32 2147483647, %v2384_v13  ;;  %v2387_v3 = vsub.f32 %v7141_v47, %v4674_v39  ;;  %v6553_v21 = vpop.f32.mrf.mxu0  ;;  %v3651_v5 = vadd.f32 %v3647_v33, %v3643_v50 }
 0x1f9   : > { %v3646_v46 = vmul.f32 %v3242_v41, %v1116_v52  ;;  %v2957_v59 = vsub.f32 1.0, %v2669_v28  ;;  %v2673_v10 = vand.u32 2147483647, %v2385_v53  ;;  %v6555_v58 = vpop.f32.mrf.mxu1  ;;  %v3244_v1 = vmax.f32 %v2956_v56, 0.0 }
 0x1fa   : > { %v2959_v0 = vsub.f32 1.0, %v2671_v26  ;;  %v2675_v35 = vand.u32 2147483647, %v2387_v3  ;;  %v2386_v22 = vsub.f32 %v7141_v47, %v4678_v40  ;;  %v6559_v44 = vpop.f32.mrf.mxu0  ;;  %v6561_v27 = vadd.f32 %v3649_v37, %v3637_v34 }
 0x1fb   : > { %v2958_v51 = vsub.f32 1.0, %v2670_v25  ;;  %v2388_v43 = vsub.f32 %v7141_v47, %v4685_v42  ;;  %v2389_v52 = vsub.f32 %v6419_v55, %v4670_v38  ;;  %v6567_v13 = vpop.f32.mrf.mxu1  ;;  %v3648_v31 = vmul.f32 %v3244_v1, %v1613_v20 }
 0x1fc   : > { %v2960_v50 = vsub.f32 1.0, %v2672_v17  ;;  %v2961_v33 = vsub.f32 1.0, %v2673_v10  ;;  %v2674_v28 = vand.u32 2147483647, %v2386_v22  ;;  %v6569_v4 = vpop.f32.mrf.mxu0  ;;  %v3650_v56 = vadd.f32 %v3646_v46, %v3642_v15 }
 0x1fd   : > { %v3245_v26 = vmax.f32 %v2957_v59, 0.0  ;;  %v2391_v34 = vsub.f32 %v6419_v55, %v4674_v39  ;;  %v2390_v37 = vsub.f32 %v6419_v55, %v4678_v40  ;;  %v6575_v41 = vpop.f32.mrf.mxu1  ;;  %v6577_v25 = vadd.f32 %v3651_v5, %v3639_v9 }
 0x1fe   : > { %v3247_v47 = vmax.f32 %v2959_v0, 0.0  ;;  %v2963_v53 = vsub.f32 1.0, %v2675_v35  ;;  %v2676_v20 = vand.u32 2147483647, %v2388_v43  ;;  %v6579_v17 = vpop.f32.mrf.mxu0  ;;  %v3246_v10 = vmax.f32 %v2958_v51, 0.0 }
 0x1ff   : > { %v3653_v3 = vmul.f32 %v3245_v26, %v6519_v60  ;;  %v2677_v15 = vand.u32 2147483647, %v2389_v52  ;;  %v2392_v46 = vsub.f32 %v6419_v55, %v4685_v42  ;;  %v6584_v59 = vpop.f32.mrf.mxu1  ;;  %v3652_v1 = vadd.f32 %v3648_v31, %v3644_v32 }
 0x200   : > { %v3248_v22 = vmax.f32 %v2960_v50, 0.0  ;;  %v3249_v16 = vmax.f32 %v2961_v33, 0.0  ;;  %v2962_v29 = vsub.f32 1.0, %v2674_v28  ;;  %v6586_v9 = vpop.f32.mrf.mxu0  ;;  %v6589_v5 = vadd.f32 %v3650_v56, %v6533_v2 }
 0x201   : > { %v3655_v0 = vmul.f32 %v3247_v47, %v6523_v7  ;;  %v2679_v35 = vand.u32 2147483647, %v2391_v34  ;;  %v2678_v60 = vand.u32 2147483647, %v2390_v37  ;;  %v6592_v51 = vpop.f32.mrf.mxu1  ;;  %v3654_v43 = vmul.f32 %v3246_v10, %v6527_v54 }
 0x202   : > { %v3657_v55 = vmul.f32 %v3249_v16, %v6537_v30  ;;  %v3251_v52 = vmax.f32 %v2963_v53, 0.0  ;;  %v2964_v32 = vsub.f32 1.0, %v2676_v20  ;;  %v6596_v31 = vpop.f32.mrf.mxu0  ;;  %v3656_v50 = vmul.f32 %v3248_v22, %v6531_v12 }
 0x203   : > { %v2965_v33 = vsub.f32 1.0, %v2677_v15  ;;  %v2680_v28 = vand.u32 2147483647, %v2392_v46  ;;  %v2393_v2 = vsub.f32 %v6357_v63, %v4670_v38  ;;  %v6601_v7 = vpop.f32.mrf.mxu1  ;;  %v6604_v56 = vadd.f32 %v3652_v1, %v6541_v45 }
 0x204   : > { %7142 = vst [vmem:[#allocation59_spill] sm:$0xff] %v6601_v7  ;;  %v3659_v54 = vmul.f32 %v3251_v52, %v6539_v14  ;;  %v3250_v26 = vmax.f32 %v2962_v29, 0.0  ;;  %v2395_v16 = vsub.f32 %v6357_v63, %v4674_v39  ;;  %v2967_v30 = vsub.f32 1.0, %v2679_v35  ;;  %v6611_v47 = vpop.f32.mrf.mxu0 }
 0x205   : > { %v2966_v34 = vsub.f32 1.0, %v2678_v60  ;;  %v2681_v37 = vand.u32 2147483647, %v2393_v2  ;;  %v2394_v12 = vsub.f32 %v6357_v63, %v4678_v40  ;;  %7143 = vst [vmem:[#allocation60_spill] sm:$0xff] %v6611_v47  ;;  %v3661_v53 = vadd.f32 %v3657_v55, %v3653_v3  ;;  %v6615_v15 = vpop.f32.mrf.mxu1 }
 0x206   : > { %v3252_v20 = vmax.f32 %v2964_v32, 0.0  ;;  %v2683_v10 = vand.u32 2147483647, %v2395_v16  ;;  %v2396_v45 = vsub.f32 %v6357_v63, %v4685_v42  ;;  %v3253_v29 = vmax.f32 %v2965_v33, 0.0  ;;  %v6618_v55 = vpop.f32.mrf.mxu0 }
 0x207   : > { %v2968_v14 = vsub.f32 1.0, %v2680_v28  ;;  %v2969_v46 = vsub.f32 1.0, %v2681_v37  ;;  %v2682_v1 = vand.u32 2147483647, %v2394_v12  ;;  %v3663_v22 = vadd.f32 %v3659_v54, %v3655_v0  ;;  %v6622_v28 = vpop.f32.mrf.mxu1 }
 0x208   : > { %v3658_v35 = vmul.f32 %v3250_v26, %v6543_v57  ;;  %v2971_v60 = vsub.f32 1.0, %v2683_v10  ;;  %v2684_v52 = vand.u32 2147483647, %v2396_v45  ;;  %v3255_v2 = vmax.f32 %v2967_v30, 0.0  ;;  %v6635_v10 = vpop.f32.mrf.mxu0 }
 0x209   : > { %v3254_v7 = vmax.f32 %v2966_v34, 0.0  ;;  %v3257_v47 = vmax.f32 %v2969_v46, 0.0  ;;  %v2970_v3 = vsub.f32 1.0, %v2682_v1  ;;  %v3660_v32 = vmul.f32 %v3252_v20, %v6547_v49 }
 0x20a   : > { %v3665_v63 = vmul.f32 %v3253_v29, %v6553_v21  ;;  %v3259_v16 = vmax.f32 %v2971_v60, 0.0  ;;  %v2972_v33 = vsub.f32 1.0, %v2684_v52  ;;  %v3667_v0 = vmul.f32 %v3255_v2, %v6555_v58 }
 0x20b   : > { %v3256_v54 = vmax.f32 %v2968_v14, 0.0  ;;  %v3669_v57 = vmul.f32 %v3257_v47, %v6569_v4  ;;  %v3258_v26 = vmax.f32 %v2970_v3, 0.0  ;;  %v3666_v30 = vmul.f32 %v3254_v7, %v6559_v44  ;;  %v6641_v47 = vpop.f32.mrf.mxu1 }
 0x20c   : > { %v3671_v34 = vmul.f32 %v3259_v16, %v6575_v41  ;;  %v3260_v37 = vmax.f32 %v2972_v33, 0.0  ;;  %v2397_v49 = vsub.f32 %v6439_v36, %v4670_v38  ;;  %v2399_v20 = vsub.f32 %v6439_v36, %v4674_v39 }
 0x20d   : > { %v3673_v12 = vadd.f32 %v3669_v57, %v3665_v63  ;;  %v3670_v21 = vmul.f32 %v3258_v26, %v6579_v17  ;;  %v2398_v58 = vsub.f32 %v6439_v36, %v4678_v40  ;;  %v3668_v4 = vmul.f32 %v3256_v54, %v6567_v13  ;;  %v6646_v63 = vpop.f32.mrf.mxu0 }
 0x20e   : > { %v3675_v44 = vadd.f32 %v3671_v34, %v3667_v0  ;;  %v3672_v41 = vmul.f32 %v3260_v37, %v6584_v59  ;;  %v2400_v7 = vsub.f32 %v6439_v36, %v4685_v42  ;;  %v3662_v45 = vadd.f32 %v3658_v35, %v3654_v43  ;;  %v6651_v35 = vpop.f32.mrf.mxu1 }
 0x20f   : > { %v3785_v17 = vadd.f32 %v3673_v12, %v3661_v53  ;;  %v3674_v29 = vadd.f32 %v3670_v21, %v3666_v30  ;;  %v2401_v14 = vsub.f32 %v6385_v61, %v4670_v38  ;;  %v3664_v46 = vadd.f32 %v3660_v32, %v3656_v50  ;;  %v6667_v30 = vpop.f32.mrf.mxu0 }
 0x210   : > { %v3787_v1 = vadd.f32 %v3675_v44, %v3663_v22  ;;  %v3676_v60 = vadd.f32 %v3672_v41, %v3668_v4  ;;  %v2685_v52 = vand.u32 2147483647, %v2397_v49  ;;  %v2687_v3 = vand.u32 2147483647, %v2399_v20  ;;  %v6673_v49 = vpop.f32.mrf.mxu1 }
 0x211   : > { %v3825_v13 = vadd.f32 %v3785_v17, %v6561_v27  ;;  %v3786_v2 = vadd.f32 %v3674_v29, %v3662_v45  ;;  %v2686_v59 = vand.u32 2147483647, %v2398_v58  ;;  %v2688_v43 = vand.u32 2147483647, %v2400_v7  ;;  %v6689_v7 = vpop.f32.mrf.mxu0  ;;  %v7145_v29 = vld [vmem:[#allocation54_spill] sm:$0xff] }
 0x212   : > { %v3827_v36 = vadd.f32 %v3787_v1, %v6577_v25  ;;  %v3788_v16 = vadd.f32 %v3676_v60, %v3664_v46  ;;  %v2403_v53 = vsub.f32 %v6385_v61, %v4674_v39  ;;  %v2689_v32 = vand.u32 2147483647, %v2401_v14  ;;  %v6694_v46 = vpop.f32.mrf.mxu1 }
 0x213   : > { %v3845_v50 = vadd.f32 %v3825_v13, %v6480_v24  ;;  %v3826_v22 = vadd.f32 %v3786_v2, %v6589_v5  ;;  %v2402_v27 = vsub.f32 %v6385_v61, %v4678_v40  ;;  %v2973_v25 = vsub.f32 1.0, %v2685_v52 }
 0x214   : > { %v3847_v33 = vadd.f32 %v3827_v36, %v6485_v19  ;;  %v3828_v0 = vadd.f32 %v3788_v16, %v6604_v56  ;;  %v2404_v54 = vsub.f32 %v6385_v61, %v4685_v42  ;;  %v2422_v57 = vsub.f32 %v6482_v48, %v4678_v40 }
 0x215   : > { %v6664_v26 = vadd.f32 %v3845_v50, %v6390_v23  ;;  %v3846_v24 = vadd.f32 %v3826_v22, %v6490_v11  ;;  %v2975_v5 = vsub.f32 1.0, %v2687_v3  ;;  %v2974_v56 = vsub.f32 1.0, %v2686_v59  ;;  %v6705_v50 = vpop.f32.mrf.mxu0 }
 0x216   : > { %v6670_v34 = vadd.f32 %v3847_v33, %v6397_v62  ;;  %v3848_v19 = vadd.f32 %v3828_v0, %v6495_v18  ;;  %v2691_v37 = vand.u32 2147483647, %v2403_v53  ;;  %v2976_v12 = vsub.f32 1.0, %v2688_v43  ;;  %v7144_v62 = vld [vmem:[#allocation57_spill] sm:$0xff] }
 0x217   : > { %v6676_v61 = vadd.f32 %v3846_v24, %v6402_v6  ;;  %v2977_v23 = vsub.f32 1.0, %v2689_v32  ;;  %v2690_v21 = vand.u32 2147483647, %v2402_v27  ;;  %v3261_v20 = vmax.f32 %v2973_v25, 0.0  ;;  %v7146_v32 = vld [vmem:[#allocation60_spill] sm:$0xff]  ;;  %v6711_v25 = vpop.f32.mrf.mxu1 }
 0x218   : > { %v6679_v11 = vadd.f32 %v3848_v19, %v6408_v8  ;;  %v2692_v58 = vand.u32 2147483647, %v2404_v54  ;;  %v2405_v4 = vsub.f32 %v7144_v62, %v4670_v38  ;;  %v2423_v18 = vsub.f32 %v6482_v48, %v4674_v39 }
 0x219   : > { %v2424_v44 = vsub.f32 %v6482_v48, %v4685_v42  ;;  %v3263_v41 = vmax.f32 %v2975_v5, 0.0  ;;  %v2407_v6 = vsub.f32 %v7144_v62, %v4674_v39  ;;  %v3677_v8 = vmul.f32 %v3261_v20, %v6586_v9 }
 0x21a   : > { %v3262_v45 = vmax.f32 %v2974_v56, 0.0  ;;  %v2979_v17 = vsub.f32 1.0, %v2691_v37  ;;  %v2409_v14 = vsub.f32 %v7145_v29, %v4670_v38  ;;  %v3264_v1 = vmax.f32 %v2976_v12, 0.0 }
 0x21b   : > { %v3265_v60 = vmax.f32 %v2977_v23, 0.0  ;;  %v2978_v52 = vsub.f32 1.0, %v2690_v21  ;;  %v2406_v13 = vsub.f32 %v7144_v62, %v4678_v40  ;;  %v2980_v2 = vsub.f32 1.0, %v2692_v58  ;;  %v7147_v23 = vld [vmem:[#allocation59_spill] sm:$0xff] }
 0x21c   : > { %v2693_v3 = vand.u32 2147483647, %v2405_v4  ;;  %v2408_v59 = vsub.f32 %v7144_v62, %v4685_v42  ;;  %v2697_v36 = vand.u32 2147483647, %v2409_v14  ;;  %v3679_v9 = vmul.f32 %v3263_v41, %v6592_v51  ;;  %v6717_v62 = vpop.f32.mrf.mxu0 }
 0x21d   : > { %v2695_v16 = vand.u32 2147483647, %v2407_v6  ;;  %v2411_v43 = vsub.f32 %v7145_v29, %v4674_v39  ;;  %v2410_v53 = vsub.f32 %v7145_v29, %v4678_v40  ;;  %v3678_v22 = vmul.f32 %v3262_v45, %v6596_v31  ;;  %v7148_v45 = vld [vmem:[#allocation58_spill] sm:$0xff] }
 0x21e   : > { %v3681_v27 = vmul.f32 %v3265_v60, %v7146_v32  ;;  %v3267_v33 = vmax.f32 %v2979_v17, 0.0  ;;  %v2412_v0 = vsub.f32 %v7145_v29, %v4685_v42  ;;  %v3266_v51 = vmax.f32 %v2978_v52, 0.0  ;;  %v6725_v29 = vpop.f32.mrf.mxu1 }
 0x21f   : > { %v2694_v54 = vand.u32 2147483647, %v2406_v13  ;;  %v2985_v24 = vsub.f32 1.0, %v2697_v36  ;;  %v2699_v5 = vand.u32 2147483647, %v2411_v43  ;;  %v3268_v19 = vmax.f32 %v2980_v2, 0.0  ;;  %v1174_v36 = vpop.f32.mrf.mxu0 }
 0x220   : > { %v2981_v56 = vsub.f32 1.0, %v2693_v3  ;;  %v2696_v37 = vand.u32 2147483647, %v2408_v59  ;;  %v2698_v12 = vand.u32 2147483647, %v2410_v53  ;;  %v6714_v21 = vmul.f32 %v3264_v1, %v7147_v23 }
 0x221   : > { %v3683_v31 = vmul.f32 %v3267_v33, %v6615_v15  ;;  %v2983_v20 = vsub.f32 1.0, %v2695_v16  ;;  %v2700_v58 = vand.u32 2147483647, %v2412_v0  ;;  %v3685_v4 = vadd.f32 %v3681_v27, %v3677_v8  ;;  %v6739_v27 = vpop.f32.mrf.mxu1 }
 0x222   : > { %v3682_v41 = vmul.f32 %v3266_v51, %v6618_v55  ;;  %v6721_v6 = vmul.f32 %v3268_v19, %v6622_v28  ;;  %v2413_v17 = vsub.f32 %v7148_v45, %v4670_v38  ;;  %v2982_v14 = vsub.f32 1.0, %v2694_v54 }
 0x223   : > { %v3273_v1 = vmax.f32 %v2985_v24, 0.0  ;;  %v2987_v60 = vsub.f32 1.0, %v2699_v5  ;;  %v2415_v15 = vsub.f32 %v7148_v45, %v4674_v39  ;;  %v3269_v52 = vmax.f32 %v2981_v56, 0.0  ;;  %v7149_v5 = vld [vmem:[#allocation55_spill] sm:$0xff] }
 0x224   : > { %v2984_v13 = vsub.f32 1.0, %v2696_v37  ;;  %v2986_v2 = vsub.f32 1.0, %v2698_v12  ;;  %v2414_v55 = vsub.f32 %v7148_v45, %v4678_v40  ;;  %v6731_v8 = vadd.f32 %v3683_v31, %v3679_v9  ;;  %v6746_v12 = vpop.f32.mrf.mxu0 }
 0x225   : > { %v3271_v28 = vmax.f32 %v2983_v20, 0.0  ;;  %v3693_v3 = vmul.f32 %v3273_v1, %v6667_v30  ;;  %v2988_v59 = vsub.f32 1.0, %v2700_v58  ;;  %v6734_v16 = vadd.f32 %v3682_v41, %v3678_v22  ;;  %v6749_v58 = vpop.f32.mrf.mxu1 }
 0x226   : > { %v3689_v43 = vmul.f32 %v3269_v52, %v6635_v10  ;;  %v2701_v53 = vand.u32 2147483647, %v2413_v17  ;;  %v2416_v32 = vsub.f32 %v7148_v45, %v4685_v42  ;;  %v3270_v0 = vmax.f32 %v2982_v14, 0.0 }
 0x227   : > { %v3691_v33 = vmul.f32 %v3271_v28, %v6641_v47  ;;  %v3275_v9 = vmax.f32 %v2987_v60, 0.0  ;;  %v2703_v51 = vand.u32 2147483647, %v2415_v15  ;;  %v3272_v54 = vmax.f32 %v2984_v13, 0.0 }
 0x228   : > { %v3274_v24 = vmax.f32 %v2986_v2, 0.0  ;;  %v2702_v30 = vand.u32 2147483647, %v2414_v55  ;;  %v2417_v22 = vsub.f32 %v7149_v5, %v4670_v38  ;;  %v3690_v19 = vmul.f32 %v3270_v0, %v6646_v63  ;;  %v1180_v2 = vpop.f32.mrf.mxu0  ;;  %v7151_v55 = vld [vmem:[#allocation45_spill] sm:$0xff] }
 0x229   : > { %v3697_v10 = vadd.f32 %v3693_v3, %v3689_v43  ;;  %v3695_v56 = vmul.f32 %v3275_v9, %v6673_v49  ;;  %v3276_v37 = vmax.f32 %v2988_v59, 0.0  ;;  %v2989_v47 = vsub.f32 1.0, %v2701_v53 }
 0x22a   : > { %v3694_v23 = vmul.f32 %v3274_v24, %v6689_v7  ;;  %v2704_v31 = vand.u32 2147483647, %v2416_v32  ;;  %v2705_v20 = vand.u32 2147483647, %v2417_v22  ;;  %v2991_v41 = vsub.f32 1.0, %v2703_v51  ;;  %v1677_v32 = vpop.f32.mrf.mxu1 }
 0x22b   : > { %v2419_v45 = vsub.f32 %v7149_v5, %v4674_v39  ;;  %v2418_v63 = vsub.f32 %v7149_v5, %v4678_v40  ;;  %v2420_v49 = vsub.f32 %v7149_v5, %v4685_v42  ;;  %v2990_v17 = vsub.f32 1.0, %v2702_v30 }
 0x22c   : > { %v2993_v14 = vsub.f32 1.0, %v2705_v20  ;;  %v7150_v7 = vsub.f32 %v6482_v48, %v4670_v38  ;;  %v2711_v60 = vand.u32 2147483647, %v2423_v18  ;;  %v6765_v28 = vadd.f32 %v6664_v26, %v7151_v55 }
 0x22d   : > { %v2707_v15 = vand.u32 2147483647, %v2419_v45  ;;  %v2706_v52 = vand.u32 2147483647, %v2418_v63  ;;  %v2708_v13 = vand.u32 2147483647, %v2420_v49  ;;  %v3692_v3 = vmul.f32 %v3272_v54, %v6651_v35  ;;  %v1182_v54 = vpop.f32.mrf.mxu0 }
 0x22e   : > { %v2709_v1 = vand.u32 2147483647, %v7150_v7  ;;  %v6768_v59 = vadd.f32 %v3697_v10, %v3685_v4  ;;  %v3696_v43 = vmul.f32 %v3276_v37, %v6694_v46  ;;  %v2992_v53 = vsub.f32 1.0, %v2704_v31  ;;  %v1679_v37 = vpop.f32.mrf.mxu1  ;;  %v7155_v49 = vld [vmem:[#allocation46_spill] sm:$0xff] }
 0x22f   : > { %v6771_v0 = vadd.f32 %v3695_v56, %v3691_v33  ;;  %v6773_v18 = vadd.f32 %v3694_v23, %v3690_v19  ;;  %v3277_v9 = vmax.f32 %v2989_v47, 0.0  ;;  %v3279_v24 = vmax.f32 %v2991_v41, 0.0 }
 0x230   : > { %v2997_v51 = vsub.f32 1.0, %v2709_v1  ;;  %v3278_v30 = vmax.f32 %v2990_v17, 0.0  ;;  %v3281_v5 = vmax.f32 %v2993_v14, 0.0  ;;  %v2999_v22 = vsub.f32 1.0, %v2711_v60  ;;  %v1186_v14 = vpop.f32.mrf.mxu0  ;;  %v1683_v1 = vpop.f32.mrf.mxu1 }
 0x231   : > { %v2995_v35 = vsub.f32 1.0, %v2707_v15  ;;  %v2994_v26 = vsub.f32 1.0, %v2706_v52  ;;  %v2996_v4 = vsub.f32 1.0, %v2708_v13  ;;  %v2710_v46 = vand.u32 2147483647, %v2422_v57  ;;  %v7152_v57 = vld [vmem:[#allocation56_spill] sm:$0xff] }
 0x232   : > { %v6779_v33 = vadd.f32 %v3696_v43, %v3692_v3  ;;  %v3701_v19 = vmul.f32 %v3277_v9, %v6705_v50  ;;  %v3703_v10 = vmul.f32 %v3279_v24, %v6711_v25  ;;  %v3280_v56 = vmax.f32 %v2992_v53, 0.0  ;;  %v7157_v52 = vld [vmem:[#allocation47_spill] sm:$0xff]  ;;  %v7159_v43 = vld [vmem:[#allocation48_spill] sm:$0xff] }
 0x233   : > { %v3702_v23 = vmul.f32 %v3278_v30, %v6717_v62  ;;  %v3705_v47 = vmul.f32 %v3281_v5, %v1174_v36  ;;  %v3285_v31 = vmax.f32 %v2997_v51, 0.0  ;;  %v2712_v20 = vand.u32 2147483647, %v2424_v44 }
 0x234   : > { %v3287_v41 = vmax.f32 %v2999_v22, 0.0  ;;  %v7153_v45 = vsub.f32 %v7152_v57, %v4670_v38  ;;  %v7154_v25 = vsub.f32 %v7152_v57, %v4674_v39  ;;  %v3859_v62 = vadd.f32 %v6670_v34, %v7155_v49 }
 0x235   : > { %v3283_v36 = vmax.f32 %v2995_v35, 0.0  ;;  %v3282_v17 = vmax.f32 %v2994_v26, 0.0  ;;  %v3284_v48 = vmax.f32 %v2996_v4, 0.0  ;;  %v2998_v44 = vsub.f32 1.0, %v2710_v46 }
 0x236   : > { %v2713_v50 = vand.u32 2147483647, %v7153_v45  ;;  %v2715_v63 = vand.u32 2147483647, %v7154_v25  ;;  %v7156_v38 = vsub.f32 %v7152_v57, %v4678_v40  ;;  %v3858_v39 = vadd.f32 %v6676_v61, %v7157_v52  ;;  %v1188_v61 = vpop.f32.mrf.mxu0 }
 0x237   : > { %v3709_v13 = vadd.f32 %v3705_v47, %v3701_v19  ;;  %v3000_v55 = vsub.f32 1.0, %v2712_v20  ;;  %v7158_v34 = vsub.f32 %v7152_v57, %v4685_v42  ;;  %v3860_v53 = vadd.f32 %v6679_v11, %v7159_v43  ;;  %v1685_v19 = vpop.f32.mrf.mxu1 }
 0x238   : > { %v3001_v7 = vsub.f32 1.0, %v2713_v50  ;;  %v3003_v60 = vsub.f32 1.0, %v2715_v63  ;;  %v2714_v15 = vand.u32 2147483647, %v7156_v38  ;;  %v3707_v9 = vmul.f32 %v3283_v36, %v6739_v27 }
 0x239   : > { %v2716_v3 = vand.u32 2147483647, %v7158_v34  ;;  %v3713_v30 = vmul.f32 %v3285_v31, %v1180_v2  ;;  %v3715_v5 = vmul.f32 %v3287_v41, %v1677_v32  ;;  %v3286_v22 = vmax.f32 %v2998_v44, 0.0 }
 0x23a   : > { %v3289_v51 = vmax.f32 %v3001_v7, 0.0  ;;  %v3291_v24 = vmax.f32 %v3003_v60, 0.0  ;;  %v3002_v40 = vsub.f32 1.0, %v2714_v15  ;;  %v3706_v26 = vmul.f32 %v3282_v17, %v6746_v12 }
 0x23b   : > { %v3004_v35 = vsub.f32 1.0, %v2716_v3  ;;  %v3708_v11 = vmul.f32 %v3284_v48, %v6749_v58  ;;  %v3714_v47 = vmul.f32 %v3286_v22, %v1182_v54  ;;  %v3288_v27 = vmax.f32 %v3000_v55, 0.0 }
 0x23c   : > { %v3717_v4 = vmul.f32 %v3289_v51, %v1186_v14  ;;  %v3719_v42 = vmul.f32 %v3291_v24, %v1683_v1  ;;  %v3290_v46 = vmax.f32 %v3002_v40, 0.0  ;;  %v3711_v57 = vadd.f32 %v3707_v9, %v3703_v10 }
 0x23d   : > { %v3292_v20 = vmax.f32 %v3004_v35, 0.0  ;;  %v3791_v32 = vadd.f32 %v6771_v0, %v6731_v8  ;;  %v3704_v31 = vmul.f32 %v3280_v56, %v6725_v29  ;;  %v3716_v12 = vmul.f32 %v3288_v27, %v1679_v37 }
 0x23e   : > { %v3721_v45 = vadd.f32 %v3717_v4, %v3713_v30  ;;  %v3723_v50 = vadd.f32 %v3719_v42, %v3715_v5  ;;  %v3718_v2 = vmul.f32 %v3290_v46, %v1188_v61  ;;  %v3710_v25 = vadd.f32 %v3706_v26, %v3702_v23 }
 0x23f   : > { %v3720_v41 = vmul.f32 %v3292_v20, %v1685_v19  ;;  %v3688_v54 = vadd.f32 %v6721_v6, %v6714_v21  ;;  %v3712_v36 = vadd.f32 %v3708_v11, %v3704_v31  ;;  %v3790_v17 = vadd.f32 %v6773_v18, %v6734_v16 }
 0x240   : > { %v3793_v63 = vadd.f32 %v3721_v45, %v3709_v13  ;;  %v3795_v49 = vadd.f32 %v3723_v50, %v3711_v57  ;;  %v3722_v58 = vadd.f32 %v3718_v2, %v3714_v47 }
 0x241   : > { %v3724_v10 = vadd.f32 %v3720_v41, %v3716_v12  ;;  %v3792_v29 = vadd.f32 %v6779_v33, %v3688_v54 }
 0x242   : > { %v3829_v48 = vadd.f32 %v3793_v63, %v6768_v59  ;;  %v3831_v8 = vadd.f32 %v3795_v49, %v3791_v32  ;;  %v3794_v0 = vadd.f32 %v3722_v58, %v3710_v25 }
 0x243   : > { %v3796_v56 = vadd.f32 %v3724_v10, %v3712_v36 }
 0x244   : > { %v3861_v37 = vadd.f32 %v6765_v28, %v3829_v48  ;;  %v3863_v23 = vadd.f32 %v3859_v62, %v3831_v8  ;;  %v3830_v21 = vadd.f32 %v3794_v0, %v3790_v17 }
 0x245   : > { %v3832_v6 = vadd.f32 %v3796_v56, %v3792_v29 }
 0x246   : > { %3865 = vst [vmem:[%s216_s26] sm:$0xff] %v3861_v37  ;;  %3867 = vst [vmem:[%s216_s26 + $0x10] sm:$0xff] %v3863_v23  ;;  %v3862_v44 = vadd.f32 %v3858_v39, %v3830_v21 }
 0x247   : > { %v3864_v16 = vadd.f32 %v3860_v53, %v3832_v6 }
 0x248   : > { %3866 = vst [vmem:[%s216_s26 + $0x8] sm:$0xff] %v3862_v44 }
 0x249   : > { %3868 = vst [vmem:[%s216_s26 + $0x18] sm:$0xff] %v3864_v16 }
 0x24a PF: > { %s13_s16 = sadd.s32 1, %s4205_s16   ;;  %s7160_s12 = smov %s4197_s14 }
 0x24b   : > { %p10_p8 = scmp.ge.s32.totalorder %s13_s16, 6   ;;  %s7161_s13 = smov %s4201_s15 }
 0x24c   : > { %s7162_s14 = smov %s7165_s17  ;;  %s7163_s15 = smov %s7169_s18 }
 0x24d   :  { %12 = sbr.rel (!%p10_p8) target bundleno = 3 (0x3), region = 66 }

</bundles_post_ra>
